<compile_context>
chip_gen: v5e
topology: v5e:2x2
jax: 0.10.0
libtpu: 0.0.40
codegen_flags: <defaults>
</compile_context>

<pallas_src>
import jax
import jax.numpy as jnp
from jax import lax
from jax.experimental import pallas as pl
from jax.experimental.pallas import tpu as pltpu


# ----------------------------------------------------------------------------
# Fused block: BN -> tanh -> conv3x3 -> scale -> PReLU -> +residual   (x2)
# ----------------------------------------------------------------------------
def strong_baseline_fp_block(x_nchw, params, eps=1e-5):
    """x: (N, C, H, W) float32 -> (N, C, H, W) float32."""
    x = jnp.transpose(x_nchw, (0, 2, 3, 1)).astype(jnp.float32)   # NHWC
    N, H, W, C = x.shape

    # ---- parameter folding (cheap one-time glue) ----------------------------
    def fold_bn(g, b, m, v):
        s = g / jnp.sqrt(v + eps)
        return s, b - m * s

    s1, t1 = fold_bn(params["bn1_gamma"], params["bn1_beta"],
                     params["bn1_mean"], params["bn1_var"])
    s2, t2 = fold_bn(params["bn2_gamma"], params["bn2_beta"],
                     params["bn2_mean"], params["bn2_var"])
    # rows: bn1_s, bn1_t, scale1, prelu1, bn2_s, bn2_t, scale2, prelu2
    ptab = jnp.stack([s1, t1, params["scale1"], params["prelu1"],
                      s2, t2, params["scale2"], params["prelu2"]],
                     axis=0).astype(jnp.float32)                  # (8, C)

    def prep_w(w_oihw):
        # (Cout, Cin, 3, 3) -> (9*Cin, Cout), row = (ky*3 + kx)*Cin + ci, bf16
        return jnp.transpose(w_oihw, (2, 3, 1, 0)).reshape(9 * C, C) \
                  .astype(jnp.bfloat16)

    w1 = prep_w(params["w1"])
    w2 = prep_w(params["w2"])

    # padded scratch: interior lives at rows [1, H+1), cols [W0, W0+W)
    # W0 = 8 keeps the interior *store* sublane-aligned; the +/-1 shifted
    # reads (cols 7..9) are unaligned *loads*, which are cheap/supported.
    W0 = 8
    PW = W0 + ((W + 1 + 7) // 8) * 8

    def kernel(x_ref, w1_ref, w2_ref, p_ref, out_ref, pad_ref):
        # zero the padded scratch once; both stages overwrite only the interior
        pad_ref[...] = jnp.zeros(pad_ref.shape, pad_ref.dtype)

        def conv3x3(a_flat, w_ref_):
            # a_flat: (H*W, C) f32 -> zero-padded 3x3 conv as ONE bf16 matmul
            pad_ref[1:H + 1, W0:W0 + W, :] = a_flat.reshape(H, W, C)
            padv = pad_ref[...]                                    # (H+2, PW, C)
            cols = [padv[dy:dy + H, W0 - 1 + dx:W0 - 1 + dx + W, :]
                    .reshape(H * W, C)
                    for dy in range(3) for dx in range(3)]
            patch = jnp.concatenate(cols, axis=-1).astype(jnp.bfloat16)
            return jnp.dot(patch, w_ref_[...],                     # (H*W, C) f32
                           preferred_element_type=jnp.float32)

        def stage(inp, w_ref_, r):
            bn_s = p_ref[r + 0:r + 1, :]
            bn_t = p_ref[r + 1:r + 2, :]
            alpha = p_ref[r + 2:r + 3, :]
            slope = p_ref[r + 3:r + 4, :]
            a = jnp.tanh(inp * bn_s + bn_t)          # BN (eval, folded) + tanh
            y = conv3x3(a, w_ref_)                   # 3x3 conv, pad=1, no bias
            y = y * alpha                            # LearnableScale
            y = jnp.where(y >= 0, y, y * slope)      # PReLU (per channel)
            return y + inp                           # residual add

        x_flat = x_ref[...].reshape(H * W, C)
        o1 = stage(x_flat, w1_ref, 0)                # identity = x
        o2 = stage(o1, w2_ref, 4)                    # identity = out1
        out_ref[...] = o2.reshape(1, H, W, C).astype(out_ref.dtype)

    out = pl.pallas_call(
        kernel,
        out_shape=jax.ShapeDtypeStruct((N, H, W, C), jnp.float32),
        grid_spec=pltpu.PrefetchScalarGridSpec(
            num_scalar_prefetch=0,
            grid=(N,),
            in_specs=[
                pl.BlockSpec((1, H, W, C), lambda n: (n, 0, 0, 0)),  # x
                pl.BlockSpec((9 * C, C), lambda n: (0, 0)),          # w1 (bf16)
                pl.BlockSpec((9 * C, C), lambda n: (0, 0)),          # w2 (bf16)
                pl.BlockSpec((8, C), lambda n: (0, 0)),              # param table
            ],
            out_specs=pl.BlockSpec((1, H, W, C), lambda n: (n, 0, 0, 0)),
            scratch_shapes=[pltpu.VMEM((H + 2, PW, C), jnp.float32)],
        ),
        compiler_params=pltpu.CompilerParams(
            dimension_semantics=("parallel",),
            vmem_limit_bytes=32 * 1024 * 1024,
        ),
    )(x, w1, w2, ptab)

    return jnp.transpose(out, (0, 3, 1, 2))                        # -> NCHW


# ----------------------------------------------------------------------------
# Pure-JAX reference (module semantics; conv_dtype lets us match MXU precision)
# ----------------------------------------------------------------------------
def _reference(x_nchw, params, conv_dtype=jnp.float32, eps=1e-5):
    x = jnp.transpose(x_nchw, (0, 2, 3, 1)).astype(jnp.float32)

    def stage(inp, g, b, m, v, w_oihw, alpha, slope):
        s = g / jnp.sqrt(v + eps)
        t = b - m * s
        a = jnp.tanh(inp * s + t)
        w = jnp.transpose(w_oihw, (2, 3, 1, 0))                    # HWIO
        y = lax.conv_general_dilated(
            a.astype(conv_dtype), w.astype(conv_dtype),
            window_strides=(1, 1), padding=((1, 1), (1, 1)),
            dimension_numbers=("NHWC", "HWIO", "NHWC"),
            preferred_element_type=jnp.float32)
        y = y * alpha
        y = jnp.where(y >= 0, y, y * slope)
        return y + inp

    o = stage(x, params["bn1_gamma"], params["bn1_beta"], params["bn1_mean"],
              params["bn1_var"], params["w1"], params["scale1"], params["prelu1"])
    o = stage(o, params["bn2_gamma"], params["bn2_beta"], params["bn2_mean"],
              params["bn2_var"], params["w2"], params["scale2"], params["prelu2"])
    return jnp.transpose(o, (0, 3, 1, 2))


# ----------------------------------------------------------------------------
if __name__ == "__main__":
    N, C, H, W = 2, 4, 16, 16        # in_channels == out_channels, stride=1
    key = jax.random.PRNGKey(0)
    ks = jax.random.split(key, 16)

    x = jax.random.normal(ks[0], (N, C, H, W), jnp.float32)

    def rnd(i, shape, scale=1.0, base=0.0):
        return base + scale * jax.random.normal(ks[i], shape, jnp.float32)

    params = dict(
        w1=0.1 * jax.random.normal(ks[1], (C, C, 3, 3), jnp.float32),
        w2=0.1 * jax.random.normal(ks[2], (C, C, 3, 3), jnp.float32),
        bn1_gamma=rnd(3, (C,), 0.1, 1.0), bn1_beta=rnd(4, (C,), 0.1),
        bn1_mean=rnd(5, (C,), 0.1),
        bn1_var=0.5 + jax.random.uniform(ks[6], (C,), jnp.float32),
        bn2_gamma=rnd(7, (C,), 0.1, 1.0), bn2_beta=rnd(8, (C,), 0.1),
        bn2_mean=rnd(9, (C,), 0.1),
        bn2_var=0.5 + jax.random.uniform(ks[10], (C,), jnp.float32),
        scale1=rnd(11, (C,), 0.1, 1.0), scale2=rnd(12, (C,), 0.1, 1.0),
        prelu1=rnd(13, (C,), 0.05, 0.25), prelu2=rnd(14, (C,), 0.05, 0.25),
    )

    fwd = jax.jit(strong_baseline_fp_block)
    out = jax.block_until_ready(fwd(x, params))

    ref_mx = _reference(x, params, conv_dtype=jnp.bfloat16)   # MXU-precision ref
    ref_fp = _reference(x, params, conv_dtype=jnp.float32)    # full-f32 ref

    assert out.shape == (N, C, H, W), out.shape
    err_mx = float(jnp.max(jnp.abs(out - ref_mx)))
    err_fp = float(jnp.max(jnp.abs(out - ref_fp)))
    assert err_mx < 1e-2, f"mismatch vs bf16-matmul reference: {err_mx}"
    assert err_fp < 5e-2, f"mismatch vs f32 reference: {err_fp}"
    print("KERNEL_OK")
</pallas_src>

<mosaic_0001>
module attributes {stable_mosaic.version = 11 : i64} {
  func.func @kernel(%arg0: i32, %arg1: memref<1x16x16x4xf32, #tpu.memory_space<vmem>>, %arg2: memref<36x4xbf16, #tpu.memory_space<vmem>>, %arg3: memref<36x4xbf16, #tpu.memory_space<vmem>>, %arg4: memref<8x4xf32, #tpu.memory_space<vmem>>, %arg5: memref<1x16x16x4xf32, #tpu.memory_space<vmem>>, %arg6: memref<18x32x4xf32, #tpu.memory_space<vmem>>) attributes {dimension_semantics = [#tpu.dimension_semantics<parallel>], iteration_bounds = array<i64: 2>, scalar_prefetch = 0 : i64, scratch_operands = 1 : i64, tpu.core_type = #tpu.core_type<tc>, window_params = [{transform_indices = @transform_0, window_bounds = array<i64: 1, 16, 16, 4>}, {pipeline_mode = #tpu.pipeline_mode<synchronous>, transform_indices = @transform_1, window_bounds = array<i64: 36, 4>}, {pipeline_mode = #tpu.pipeline_mode<synchronous>, transform_indices = @transform_2, window_bounds = array<i64: 36, 4>}, {pipeline_mode = #tpu.pipeline_mode<synchronous>, transform_indices = @transform_3, window_bounds = array<i64: 8, 4>}, {transform_indices = @transform_4, window_bounds = array<i64: 1, 16, 16, 4>}]} {
    %cst = arith.constant 0.000000e+00 : f32
    %0 = vector.broadcast %cst : f32 to vector<18x32x4xf32>
    %c0 = arith.constant 0 : index
    %c0_0 = arith.constant 0 : index
    %c0_1 = arith.constant 0 : index
    %1 = vector.load %arg6[%c0, %c0_0, %c0_1] : memref<18x32x4xf32, #tpu.memory_space<vmem>>, vector<18x32x4xf32>
    tpu.vector_store %arg6[%c0, %c0_0, %c0_1], %0 {strides = array<i32>} : memref<18x32x4xf32, #tpu.memory_space<vmem>>, vector<18x32x4xf32>,
    %c0_2 = arith.constant 0 : index
    %c0_3 = arith.constant 0 : index
    %c0_4 = arith.constant 0 : index
    %c0_5 = arith.constant 0 : index
    %2 = vector.load %arg1[%c0_2, %c0_3, %c0_4, %c0_5] : memref<1x16x16x4xf32, #tpu.memory_space<vmem>>, vector<1x16x16x4xf32>
    %3 = vector.shape_cast %2 : vector<1x16x16x4xf32> to vector<256x4xf32>
    %c0_6 = arith.constant 0 : index
    %c0_7 = arith.constant 0 : index
    %4 = vector.load %arg4[%c0_6, %c0_7] : memref<8x4xf32, #tpu.memory_space<vmem>>, vector<1x4xf32>
    %c1 = arith.constant 1 : index
    %c0_8 = arith.constant 0 : index
    %5 = vector.load %arg4[%c1, %c0_8] : memref<8x4xf32, #tpu.memory_space<vmem>>, vector<1x4xf32>
    %c2 = arith.constant 2 : index
    %c0_9 = arith.constant 0 : index
    %6 = vector.load %arg4[%c2, %c0_9] : memref<8x4xf32, #tpu.memory_space<vmem>>, vector<1x4xf32>
    %c3 = arith.constant 3 : index
    %c0_10 = arith.constant 0 : index
    %7 = vector.load %arg4[%c3, %c0_10] : memref<8x4xf32, #tpu.memory_space<vmem>>, vector<1x4xf32>
    %8 = vector.broadcast %4 : vector<1x4xf32> to vector<256x4xf32>
    %9 = arith.mulf %3, %8 : vector<256x4xf32>
    %10 = vector.broadcast %5 : vector<1x4xf32> to vector<256x4xf32>
    %11 = arith.addf %9, %10 : vector<256x4xf32>
    %12 = math.tanh %11 : vector<256x4xf32>
    %13 = vector.shape_cast %12 : vector<256x4xf32> to vector<16x16x4xf32>
    %c1_11 = arith.constant 1 : index
    %c8 = arith.constant 8 : index
    %c0_12 = arith.constant 0 : index
    %14 = vector.load %arg6[%c1_11, %c8, %c0_12] : memref<18x32x4xf32, #tpu.memory_space<vmem>>, vector<16x16x4xf32>
    tpu.vector_store %arg6[%c1_11, %c8, %c0_12], %13 {strides = array<i32>} : memref<18x32x4xf32, #tpu.memory_space<vmem>>, vector<16x16x4xf32>,
    %c0_13 = arith.constant 0 : index
    %c0_14 = arith.constant 0 : index
    %c0_15 = arith.constant 0 : index
    %15 = vector.load %arg6[%c0_13, %c0_14, %c0_15] : memref<18x32x4xf32, #tpu.memory_space<vmem>>, vector<18x32x4xf32>
    %16 = vector.extract_strided_slice %15 {offsets = [0, 7, 0], sizes = [16, 16, 4], strides = [1, 1, 1]} : vector<18x32x4xf32> to vector<16x16x4xf32>
    %17 = vector.shape_cast %16 : vector<16x16x4xf32> to vector<256x4xf32>
    %18 = vector.extract_strided_slice %15 {offsets = [0, 8, 0], sizes = [16, 16, 4], strides = [1, 1, 1]} : vector<18x32x4xf32> to vector<16x16x4xf32>
    %19 = vector.shape_cast %18 : vector<16x16x4xf32> to vector<256x4xf32>
    %20 = vector.extract_strided_slice %15 {offsets = [0, 9, 0], sizes = [16, 16, 4], strides = [1, 1, 1]} : vector<18x32x4xf32> to vector<16x16x4xf32>
    %21 = vector.shape_cast %20 : vector<16x16x4xf32> to vector<256x4xf32>
    %22 = vector.extract_strided_slice %15 {offsets = [1, 7, 0], sizes = [16, 16, 4], strides = [1, 1, 1]} : vector<18x32x4xf32> to vector<16x16x4xf32>
    %23 = vector.shape_cast %22 : vector<16x16x4xf32> to vector<256x4xf32>
    %24 = vector.extract_strided_slice %15 {offsets = [1, 8, 0], sizes = [16, 16, 4], strides = [1, 1, 1]} : vector<18x32x4xf32> to vector<16x16x4xf32>
    %25 = vector.shape_cast %24 : vector<16x16x4xf32> to vector<256x4xf32>
    %26 = vector.extract_strided_slice %15 {offsets = [1, 9, 0], sizes = [16, 16, 4], strides = [1, 1, 1]} : vector<18x32x4xf32> to vector<16x16x4xf32>
    %27 = vector.shape_cast %26 : vector<16x16x4xf32> to vector<256x4xf32>
    %28 = vector.extract_strided_slice %15 {offsets = [2, 7, 0], sizes = [16, 16, 4], strides = [1, 1, 1]} : vector<18x32x4xf32> to vector<16x16x4xf32>
    %29 = vector.shape_cast %28 : vector<16x16x4xf32> to vector<256x4xf32>
    %30 = vector.extract_strided_slice %15 {offsets = [2, 8, 0], sizes = [16, 16, 4], strides = [1, 1, 1]} : vector<18x32x4xf32> to vector<16x16x4xf32>
    %31 = vector.shape_cast %30 : vector<16x16x4xf32> to vector<256x4xf32>
    %32 = vector.extract_strided_slice %15 {offsets = [2, 9, 0], sizes = [16, 16, 4], strides = [1, 1, 1]} : vector<18x32x4xf32> to vector<16x16x4xf32>
    %33 = vector.shape_cast %32 : vector<16x16x4xf32> to vector<256x4xf32>
    %34 = tpu.concatenate %17, %19, %21, %23, %25, %27, %29, %31, %33 in 1 : vector<256x4xf32>, vector<256x4xf32>, vector<256x4xf32>, vector<256x4xf32>, vector<256x4xf32>, vector<256x4xf32>, vector<256x4xf32>, vector<256x4xf32>, vector<256x4xf32> -> vector<256x36xf32>
    %35 = arith.truncf %34 : vector<256x36xf32> to vector<256x36xbf16>
    %c0_16 = arith.constant 0 : index
    %c0_17 = arith.constant 0 : index
    %36 = vector.load %arg2[%c0_16, %c0_17] : memref<36x4xbf16, #tpu.memory_space<vmem>>, vector<36x4xbf16>
    %cst_18 = arith.constant dense<0.000000e+00> : vector<256x4xf32>
    %37 = tpu.matmul %35, %36, %cst_18 {dimension_numbers = #tpu.dot_dimension_numbers<[1], [0], [0], [1], [0, 0, 1, 1], [], []>} : vector<256x36xbf16>, vector<36x4xbf16>, vector<256x4xf32> -> vector<256x4xf32>
    %38 = vector.broadcast %6 : vector<1x4xf32> to vector<256x4xf32>
    %39 = arith.mulf %37, %38 : vector<256x4xf32>
    %cst_19 = arith.constant 0.000000e+00 : f32
    %40 = vector.broadcast %cst_19 : f32 to vector<256x4xf32>
    %41 = arith.cmpf oge, %39, %40 : vector<256x4xf32>
    %42 = vector.broadcast %7 : vector<1x4xf32> to vector<256x4xf32>
    %43 = arith.mulf %39, %42 : vector<256x4xf32>
    %44 = arith.select %41, %39, %43 : vector<256x4xi1>, vector<256x4xf32>
    %45 = arith.addf %44, %3 : vector<256x4xf32>
    %c4 = arith.constant 4 : index
    %c0_20 = arith.constant 0 : index
    %46 = vector.load %arg4[%c4, %c0_20] : memref<8x4xf32, #tpu.memory_space<vmem>>, vector<1x4xf32>
    %c5 = arith.constant 5 : index
    %c0_21 = arith.constant 0 : index
    %47 = vector.load %arg4[%c5, %c0_21] : memref<8x4xf32, #tpu.memory_space<vmem>>, vector<1x4xf32>
    %c6 = arith.constant 6 : index
    %c0_22 = arith.constant 0 : index
    %48 = vector.load %arg4[%c6, %c0_22] : memref<8x4xf32, #tpu.memory_space<vmem>>, vector<1x4xf32>
    %c7 = arith.constant 7 : index
    %c0_23 = arith.constant 0 : index
    %49 = vector.load %arg4[%c7, %c0_23] : memref<8x4xf32, #tpu.memory_space<vmem>>, vector<1x4xf32>
    %50 = vector.broadcast %46 : vector<1x4xf32> to vector<256x4xf32>
    %51 = arith.mulf %45, %50 : vector<256x4xf32>
    %52 = vector.broadcast %47 : vector<1x4xf32> to vector<256x4xf32>
    %53 = arith.addf %51, %52 : vector<256x4xf32>
    %54 = math.tanh %53 : vector<256x4xf32>
    %55 = vector.shape_cast %54 : vector<256x4xf32> to vector<16x16x4xf32>
    %c1_24 = arith.constant 1 : index
    %c8_25 = arith.constant 8 : index
    %c0_26 = arith.constant 0 : index
    %56 = vector.load %arg6[%c1_24, %c8_25, %c0_26] : memref<18x32x4xf32, #tpu.memory_space<vmem>>, vector<16x16x4xf32>
    tpu.vector_store %arg6[%c1_24, %c8_25, %c0_26], %55 {strides = array<i32>} : memref<18x32x4xf32, #tpu.memory_space<vmem>>, vector<16x16x4xf32>,
    %c0_27 = arith.constant 0 : index
    %c0_28 = arith.constant 0 : index
    %c0_29 = arith.constant 0 : index
    %57 = vector.load %arg6[%c0_27, %c0_28, %c0_29] : memref<18x32x4xf32, #tpu.memory_space<vmem>>, vector<18x32x4xf32>
    %58 = vector.extract_strided_slice %57 {offsets = [0, 7, 0], sizes = [16, 16, 4], strides = [1, 1, 1]} : vector<18x32x4xf32> to vector<16x16x4xf32>
    %59 = vector.shape_cast %58 : vector<16x16x4xf32> to vector<256x4xf32>
    %60 = vector.extract_strided_slice %57 {offsets = [0, 8, 0], sizes = [16, 16, 4], strides = [1, 1, 1]} : vector<18x32x4xf32> to vector<16x16x4xf32>
    %61 = vector.shape_cast %60 : vector<16x16x4xf32> to vector<256x4xf32>
    %62 = vector.extract_strided_slice %57 {offsets = [0, 9, 0], sizes = [16, 16, 4], strides = [1, 1, 1]} : vector<18x32x4xf32> to vector<16x16x4xf32>
    %63 = vector.shape_cast %62 : vector<16x16x4xf32> to vector<256x4xf32>
    %64 = vector.extract_strided_slice %57 {offsets = [1, 7, 0], sizes = [16, 16, 4], strides = [1, 1, 1]} : vector<18x32x4xf32> to vector<16x16x4xf32>
    %65 = vector.shape_cast %64 : vector<16x16x4xf32> to vector<256x4xf32>
    %66 = vector.extract_strided_slice %57 {offsets = [1, 8, 0], sizes = [16, 16, 4], strides = [1, 1, 1]} : vector<18x32x4xf32> to vector<16x16x4xf32>
    %67 = vector.shape_cast %66 : vector<16x16x4xf32> to vector<256x4xf32>
    %68 = vector.extract_strided_slice %57 {offsets = [1, 9, 0], sizes = [16, 16, 4], strides = [1, 1, 1]} : vector<18x32x4xf32> to vector<16x16x4xf32>
    %69 = vector.shape_cast %68 : vector<16x16x4xf32> to vector<256x4xf32>
    %70 = vector.extract_strided_slice %57 {offsets = [2, 7, 0], sizes = [16, 16, 4], strides = [1, 1, 1]} : vector<18x32x4xf32> to vector<16x16x4xf32>
    %71 = vector.shape_cast %70 : vector<16x16x4xf32> to vector<256x4xf32>
    %72 = vector.extract_strided_slice %57 {offsets = [2, 8, 0], sizes = [16, 16, 4], strides = [1, 1, 1]} : vector<18x32x4xf32> to vector<16x16x4xf32>
    %73 = vector.shape_cast %72 : vector<16x16x4xf32> to vector<256x4xf32>
    %74 = vector.extract_strided_slice %57 {offsets = [2, 9, 0], sizes = [16, 16, 4], strides = [1, 1, 1]} : vector<18x32x4xf32> to vector<16x16x4xf32>
    %75 = vector.shape_cast %74 : vector<16x16x4xf32> to vector<256x4xf32>
    %76 = tpu.concatenate %59, %61, %63, %65, %67, %69, %71, %73, %75 in 1 : vector<256x4xf32>, vector<256x4xf32>, vector<256x4xf32>, vector<256x4xf32>, vector<256x4xf32>, vector<256x4xf32>, vector<256x4xf32>, vector<256x4xf32>, vector<256x4xf32> -> vector<256x36xf32>
    %77 = arith.truncf %76 : vector<256x36xf32> to vector<256x36xbf16>
    %c0_30 = arith.constant 0 : index
    %c0_31 = arith.constant 0 : index
    %78 = vector.load %arg3[%c0_30, %c0_31] : memref<36x4xbf16, #tpu.memory_space<vmem>>, vector<36x4xbf16>
    %cst_32 = arith.constant dense<0.000000e+00> : vector<256x4xf32>
    %79 = tpu.matmul %77, %78, %cst_32 {dimension_numbers = #tpu.dot_dimension_numbers<[1], [0], [0], [1], [0, 0, 1, 1], [], []>} : vector<256x36xbf16>, vector<36x4xbf16>, vector<256x4xf32> -> vector<256x4xf32>
    %80 = vector.broadcast %48 : vector<1x4xf32> to vector<256x4xf32>
    %81 = arith.mulf %79, %80 : vector<256x4xf32>
    %cst_33 = arith.constant 0.000000e+00 : f32
    %82 = vector.broadcast %cst_33 : f32 to vector<256x4xf32>
    %83 = arith.cmpf oge, %81, %82 : vector<256x4xf32>
    %84 = vector.broadcast %49 : vector<1x4xf32> to vector<256x4xf32>
    %85 = arith.mulf %81, %84 : vector<256x4xf32>
    %86 = arith.select %83, %81, %85 : vector<256x4xi1>, vector<256x4xf32>
    %87 = arith.addf %86, %45 : vector<256x4xf32>
    %88 = vector.shape_cast %87 : vector<256x4xf32> to vector<1x16x16x4xf32>
    %c0_34 = arith.constant 0 : index
    %c0_35 = arith.constant 0 : index
    %c0_36 = arith.constant 0 : index
    %c0_37 = arith.constant 0 : index
    %89 = vector.load %arg5[%c0_34, %c0_35, %c0_36, %c0_37] : memref<1x16x16x4xf32, #tpu.memory_space<vmem>>, vector<1x16x16x4xf32>
    tpu.vector_store %arg5[%c0_34, %c0_35, %c0_36, %c0_37], %88 {strides = array<i32>} : memref<1x16x16x4xf32, #tpu.memory_space<vmem>>, vector<1x16x16x4xf32>,
    return
  }
  func.func @transform_0(%arg0: i32) -> (i32, i32, i32, i32) {
    %c0_i32 = arith.constant 0 : i32
    %c0_i32_0 = arith.constant 0 : i32
    %c0_i32_1 = arith.constant 0 : i32
    %c0_i32_2 = arith.constant 0 : i32
    return %arg0, %c0_i32, %c0_i32_0, %c0_i32_1 : i32, i32, i32, i32
  }
  func.func @transform_1(%arg0: i32) -> (i32, i32) {
    %c0_i32 = arith.constant 0 : i32
    %c0_i32_0 = arith.constant 0 : i32
    %c0_i32_1 = arith.constant 0 : i32
    return %c0_i32, %c0_i32_0 : i32, i32
  }
  func.func @transform_2(%arg0: i32) -> (i32, i32) {
    %c0_i32 = arith.constant 0 : i32
    %c0_i32_0 = arith.constant 0 : i32
    %c0_i32_1 = arith.constant 0 : i32
    return %c0_i32, %c0_i32_0 : i32, i32
  }
  func.func @transform_3(%arg0: i32) -> (i32, i32) {
    %c0_i32 = arith.constant 0 : i32
    %c0_i32_0 = arith.constant 0 : i32
    %c0_i32_1 = arith.constant 0 : i32
    return %c0_i32, %c0_i32_0 : i32, i32
  }
  func.func @transform_4(%arg0: i32) -> (i32, i32, i32, i32) {
    %c0_i32 = arith.constant 0 : i32
    %c0_i32_0 = arith.constant 0 : i32
    %c0_i32_1 = arith.constant 0 : i32
    %c0_i32_2 = arith.constant 0 : i32
    return %arg0, %c0_i32, %c0_i32_0, %c0_i32_1 : i32, i32, i32, i32
  }
}

</mosaic_0001>

<bundles_post_ra>
// kernel: strong_baseline_fp_block.1
= control target key start
LH: loop header
LB: loop body
LE: loop exit
PB: predicated region body
PF: predicated region fallthrough
CT: control target
= control target key end

     0   :  { %s5707_s15 = smov 0   ;;  %s9400_s0 = inlined_call_operand.vmem [shape: f32[2,16,16,4], index: 0, kind: input, shape index: {}]   ;;  %s9401_s1 = inlined_call_operand.vmem [shape: bf16[36,4], index: 1, kind: input, shape index: {}]   ;;  %s9402_s2 = inlined_call_operand.vmem [shape: bf16[36,4], index: 2, kind: input, shape index: {}]   ;;  %s9403_s3 = inlined_call_operand.vmem [shape: f32[8,4], index: 3, kind: input, shape index: {}]   ;;  %s9404_s4 = inlined_call_operand.vmem [shape: f32[2,16,16,4], index: 4, kind: output, shape index: {}]  }
   0x1 LB: > { %s4107_s16 = sadd.s32 4294967295, %s5671_s15   ;;  %p4111_p0 = scmp.ge.s32.totalorder %s5671_s15, 1  ;;  %s5671_s15 = sphi %s5707_s15, %s14_s15  }
   0x2   : > { %p162_p1 = scmp.lt.s32.totalorder %s5671_s15, 3 }
   0x4   : > { %p163_p2 = pnand %p4111_p0, %p162_p1 }
   0x6   : > { %166 = sbr.rel (%p163_p2) target bundleno = 1330 (0x532), region = 36 }
   0xb   : > { %vm199_vm0 = vcmask 31744   ;;  %v5673_v0 = vmov 0.0   ;;  %s5674_s17 = smov 4   ;;  %p188_p3 = scmp.lt.s32.totalorder %s4107_s16, 1  ;;  %v5843_v4 = vld [vmem:[%s9403_s3] ss:$0 sm:$0xff] }
   0xc   : > { %201 = vst.msk [vmem:[#allocation2 + $0x8] sm:$0xff] %vm199_vm0, %v5673_v0  ;;  %v5860_v9 = vld [vmem:[%s9403_s3 + $0x1] ss:$0 sm:$0xff]  ;;  %vm688_vm1 = vcmask 1046528   ;;  %s5675_s26 = smov 8   ;;  %vm559_vm2 = vcmask 1040384  }
   0xd   : > { %202 = vst.msk [vmem:[#allocation2 + $0x10] sm:$0xff] %vm199_vm0, %v5673_v0  ;;  %s10029_s16 = smov (!%p188_p3, %s4107_s16), 1  ;;  %s5676_s27 = smov 12   ;;  %vm1913_vm3 = vcmask 1041408   ;;  %vm1630_vm4 = vcmask 97280   ;;  %vm1597_vm5 = vcmask 64512  }
   0xe   : > { %200 = vst.msk [vmem:[#allocation2] sm:$0xff] %vm199_vm0, %v5673_v0  ;;  %s4166_s18 = sshll.u32 %s10029_s16, 8  ;;  %s5677_s28 = smov 16   ;;  %vm1663_vm6 = vcmask 130048   ;;  %vm1729_vm7 = vcmask 195584   ;;  %vm1696_vm8 = vcmask 162816  }
   0xf   : > { %203 = vst.msk [vmem:[#allocation2 + $0x18] sm:$0xff] %vm199_vm0, %v5673_v0  ;;  %s5834_s21 = scalar_lea.vmem %s9400_s0, %s4166_s18  ;;  %s5678_s29 = smov 20   ;;  %vm1762_vm9 = vcmask 228352   ;;  %vm1795_vm10 = vcmask 261120   ;;  %vm1864_vm11 = vcmask 293888  }
  0x10   : > { %204 = vst.msk [vmem:[#allocation2 + $0x20] sm:$0xff] %vm199_vm0, %v5673_v0  ;;  %v278_v5 = vld [vmem:[%s5834_s21 + $0x30] sm:$0xff]  ;;  %v279_v6 = vld [vmem:[%s5834_s21 + $0x38] sm:$0xff]  ;;  %v272_v12 = vld [vmem:[%s5834_s21] sm:$0xff]  ;;  %s5679_s30 = smov 24   ;;  %s5680_s5 = smov 28  }
  0x11   : > { %205 = vst.msk [vmem:[#allocation2 + $0x28] sm:$0xff] %vm199_vm0, %v5673_v0  ;;  %v274_v7 = vld [vmem:[%s5834_s21 + $0x10] sm:$0xff]  ;;  %v315_v8 = vmul.f32 %v5843_v4, %v278_v5  ;;  %v275_v10 = vld [vmem:[%s5834_s21 + $0x18] sm:$0xff]  ;;  %v316_v11 = vmul.f32 %v5843_v4, %v279_v6  ;;  %v273_v14 = vld [vmem:[%s5834_s21 + $0x8] sm:$0xff]  ;;  %v309_v18 = vmul.f32 %v5843_v4, %v272_v12  ;;  %s5681_s6 = smov 32   ;;  %s9238_s23 = scalar_lea.vmem %s9404_s4, %s4166_s18 }
  0x12   : > { %206 = vst.msk [vmem:[#allocation2 + $0x30] sm:$0xff] %vm199_vm0, %v5673_v0  ;;  %v311_v13 = vmul.f32 %v5843_v4, %v274_v7  ;;  %v312_v15 = vmul.f32 %v5843_v4, %v275_v10  ;;  %v280_v16 = vld [vmem:[%s5834_s21 + $0x40] sm:$0xff]  ;;  %v281_v19 = vld [vmem:[%s5834_s21 + $0x48] sm:$0xff]  ;;  %v310_v21 = vmul.f32 %v5843_v4, %v273_v14  ;;  %v282_v28 = vld [vmem:[%s5834_s21 + $0x50] sm:$0xff] }
  0x13   : > { %v5729_v1 = vld [vmem:[#allocation2 + $0x8] sm:$0xff]  ;;  %207 = vst.msk [vmem:[#allocation2 + $0x38] sm:$0xff] %vm199_vm0, %v5673_v0  ;;  %v348_v17 = vadd.f32 %v5860_v9, %v315_v8  ;;  %v349_v20 = vadd.f32 %v5860_v9, %v316_v11  ;;  %v276_v22 = vld [vmem:[%s5834_s21 + $0x20] sm:$0xff]  ;;  %v317_v24 = vmul.f32 %v5843_v4, %v280_v16  ;;  %v318_v27 = vmul.f32 %v5843_v4, %v281_v19  ;;  %v283_v31 = vld [vmem:[%s5834_s21 + $0x58] sm:$0xff] }
  0x14   : > { %v5733_v2 = vld [vmem:[#allocation2 + $0x10] sm:$0xff]  ;;  %208 = vst.msk [vmem:[#allocation2 + $0x40] sm:$0xff] %vm199_vm0, %v5673_v0  ;;  %v344_v23 = vadd.f32 %v5860_v9, %v311_v13  ;;  %v277_v25 = vld [vmem:[%s5834_s21 + $0x28] sm:$0xff]  ;;  %v345_v26 = vadd.f32 %v5860_v9, %v312_v15  ;;  %v342_v29 = vadd.f32 %v5860_v9, %v309_v18  ;;  %v313_v30 = vmul.f32 %v5843_v4, %v276_v22  ;;  %v287_v37 = vld [vmem:[%s5834_s21 + $0x78] sm:$0xff] }
  0x15   : > { %v4195_v3 = vpack.i.bf16 %v5733_v2, %v5729_v1  ;;  %209 = vst.msk [vmem:[#allocation2 + $0x48] sm:$0xff] %vm199_vm0, %v5673_v0  ;;  %5483 = vtanh.f32 %v348_v17  ;;  %v343_v32 = vadd.f32 %v5860_v9, %v310_v21  ;;  %v314_v33 = vmul.f32 %v5843_v4, %v277_v25  ;;  %v286_v34 = vld [vmem:[%s5834_s21 + $0x70] sm:$0xff]  ;;  %v284_v40 = vld [vmem:[%s5834_s21 + $0x60] sm:$0xff]  ;;  %v285_v43 = vld [vmem:[%s5834_s21 + $0x68] sm:$0xff] }
  0x16   : > { %210 = vst.msk [vmem:[#allocation2 + $0x50] sm:$0xff] %vm199_vm0, %v5673_v0  ;;  %5485 = vtanh.f32 %v349_v20  ;;  %v350_v35 = vadd.f32 %v5860_v9, %v317_v24  ;;  %v319_v36 = vmul.f32 %v5843_v4, %v282_v28  ;;  %v351_v38 = vadd.f32 %v5860_v9, %v318_v27  ;;  %v288_v46 = vld [vmem:[%s5834_s21 + $0x80] sm:$0xff]  ;;  %v289_v50 = vld [vmem:[%s5834_s21 + $0x88] sm:$0xff]  ;;  %v290_v62 = vld [vmem:[%s5834_s21 + $0x90] sm:$0xff] }
  0x17   : > { %4196 = vrot.lane.b32.xlu0 %v4195_v3, %s5674_s17  ;;  %211 = vst.msk [vmem:[#allocation2 + $0x58] sm:$0xff] %vm199_vm0, %v5673_v0  ;;  %5487 = vtanh.f32 %v344_v23  ;;  %v320_v39 = vmul.f32 %v5843_v4, %v283_v31  ;;  %v346_v41 = vadd.f32 %v5860_v9, %v313_v30  ;;  %v323_v42 = vmul.f32 %v5843_v4, %v286_v34  ;;  %v292_v54 = vld [vmem:[%s5834_s21 + $0xa0] sm:$0xff]  ;;  %v293_v58 = vld [vmem:[%s5834_s21 + $0xa8] sm:$0xff]  ;;  %v291_v5 = vld [vmem:[%s5834_s21 + $0x98] sm:$0xff] }
  0x18   : > { %212 = vst.msk [vmem:[#allocation2 + $0x60] sm:$0xff] %vm199_vm0, %v5673_v0  ;;  %5489 = vtanh.f32 %v345_v26  ;;  %v347_v44 = vadd.f32 %v5860_v9, %v314_v33  ;;  %v324_v45 = vmul.f32 %v5843_v4, %v287_v37  ;;  %v352_v48 = vadd.f32 %v5860_v9, %v319_v36  ;;  %v294_v10 = vld [vmem:[%s5834_s21 + $0xb0] sm:$0xff]  ;;  %v295_v14 = vld [vmem:[%s5834_s21 + $0xb8] sm:$0xff]  ;;  %v296_v26 = vld [vmem:[%s5834_s21 + $0xc0] sm:$0xff] }
  0x19   : > { %213 = vst.msk [vmem:[#allocation2 + $0x68] sm:$0xff] %vm199_vm0, %v5673_v0  ;;  %5491 = vtanh.f32 %v342_v29  ;;  %v321_v49 = vmul.f32 %v5843_v4, %v284_v40  ;;  %v353_v52 = vadd.f32 %v5860_v9, %v320_v39  ;;  %v322_v53 = vmul.f32 %v5843_v4, %v285_v43  ;;  %v298_v18 = vld [vmem:[%s5834_s21 + $0xd0] sm:$0xff]  ;;  %v299_v22 = vld [vmem:[%s5834_s21 + $0xd8] sm:$0xff]  ;;  %v297_v31 = vld [vmem:[%s5834_s21 + $0xc8] sm:$0xff] }
  0x1a   : > { %214 = vst.msk [vmem:[#allocation2 + $0x70] sm:$0xff] %vm199_vm0, %v5673_v0  ;;  %5493 = vtanh.f32 %v343_v32  ;;  %v356_v56 = vadd.f32 %v5860_v9, %v323_v42  ;;  %v325_v57 = vmul.f32 %v5843_v4, %v288_v46  ;;  %v357_v60 = vadd.f32 %v5860_v9, %v324_v45  ;;  %v300_v36 = vld [vmem:[%s5834_s21 + $0xe0] sm:$0xff]  ;;  %v301_v42 = vld [vmem:[%s5834_s21 + $0xe8] sm:$0xff] }
  0x1b   : > { %215 = vst.msk [vmem:[#allocation2 + $0x78] sm:$0xff] %vm199_vm0, %v5673_v0  ;;  %v5484_v47 = vpop.eup %5483  ;;  %5495 = vtanh.f32 %v350_v35  ;;  %v326_v61 = vmul.f32 %v5843_v4, %v289_v50  ;;  %v329_v3 = vmul.f32 %v5843_v4, %v292_v54  ;;  %v355_v7 = vadd.f32 %v5860_v9, %v322_v53 }
  0x1c   : > { %216 = vst.msk [vmem:[#allocation2 + $0x80] sm:$0xff] %vm199_vm0, %v5673_v0  ;;  %v5486_v51 = vpop.eup %5485  ;;  %5497 = vtanh.f32 %v351_v38  ;;  %v330_v8 = vmul.f32 %v5843_v4, %v293_v58  ;;  %v358_v12 = vadd.f32 %v5860_v9, %v325_v57  ;;  %v327_v13 = vmul.f32 %v5843_v4, %v290_v62 }
  0x1d   : > { %217 = vst.msk [vmem:[#allocation2 + $0x88] sm:$0xff] %vm199_vm0, %v5673_v0  ;;  %v5488_v55 = vpop.eup %5487  ;;  %5499 = vtanh.f32 %v346_v41  ;;  %v359_v16 = vadd.f32 %v5860_v9, %v326_v61  ;;  %v328_v17 = vmul.f32 %v5843_v4, %v291_v5  ;;  %v362_v20 = vadd.f32 %v5860_v9, %v329_v3 }
  0x1e   : > { %218 = vst.msk [vmem:[#allocation2 + $0x90] sm:$0xff] %vm199_vm0, %v5673_v0  ;;  %v5490_v59 = vpop.eup %5489  ;;  %5501 = vtanh.f32 %v347_v44  ;;  %v331_v21 = vmul.f32 %v5843_v4, %v294_v10  ;;  %v363_v24 = vadd.f32 %v5860_v9, %v330_v8  ;;  %v332_v25 = vmul.f32 %v5843_v4, %v295_v14  ;;  %v442_v8 = vld [vmem:[#allocation2 + $0x18] sm:$0xff] }
  0x1f   : > { %219 = vst.msk [vmem:[#allocation2 + $0x98] sm:$0xff] %vm199_vm0, %v5673_v0  ;;  %v5492_v63 = vpop.eup %5491  ;;  %5503 = vtanh.f32 %v352_v48  ;;  %v360_v29 = vadd.f32 %v5860_v9, %v327_v13  ;;  %v335_v30 = vmul.f32 %v5843_v4, %v298_v18  ;;  %v361_v34 = vadd.f32 %v5860_v9, %v328_v17 }
  0x20   : > { %220 = vst.msk [vmem:[#allocation2 + $0xa0] sm:$0xff] %vm199_vm0, %v5673_v0  ;;  %v5494_v6 = vpop.eup %5493  ;;  %5505 = vtanh.f32 %v353_v52  ;;  %v336_v35 = vmul.f32 %v5843_v4, %v299_v22  ;;  %v364_v40 = vadd.f32 %v5860_v9, %v331_v21  ;;  %v333_v41 = vmul.f32 %v5843_v4, %v296_v26 }
  0x21   : > { %221 = vst.msk [vmem:[#allocation2 + $0xa8] sm:$0xff] %vm199_vm0, %v5673_v0  ;;  %v5496_v11 = vpop.eup %5495  ;;  %5507 = vtanh.f32 %v356_v56  ;;  %v689_v44 = vrot.slane %v5729_v1, 1  ;;  %v365_v46 = vadd.f32 %v5860_v9, %v332_v25  ;;  %v337_v52 = vmul.f32 %v5843_v4, %v300_v36 }
  0x22   : > { %222 = vst.msk [vmem:[#allocation2 + $0xb0] sm:$0xff] %vm199_vm0, %v5673_v0  ;;  %v5498_v15 = vpop.eup %5497  ;;  %5509 = vtanh.f32 %v357_v60  ;;  %v690_v54 = vrot.slane %v5733_v2, 1  ;;  %v369_v56 = vadd.f32 %v5860_v9, %v336_v35  ;;  %v338_v57 = vmul.f32 %v5843_v4, %v301_v42 }
  0x23   : > { %223 = vst.msk [vmem:[#allocation2 + $0xb8] sm:$0xff] %vm199_vm0, %v5673_v0  ;;  %v5500_v19 = vpop.eup %5499  ;;  %v366_v61 = vadd.f32 %v5860_v9, %v333_v41  ;;  %v692_v14 = vrot.slane %v442_v8, 1 }
  0x24   : > { %224 = vst.msk [vmem:[#allocation2 + $0xc0] sm:$0xff] %vm199_vm0, %v5673_v0  ;;  %v5502_v23 = vpop.eup %5501  ;;  %v6042_v13 = vsel %vm688_vm1, %v689_v44, %v690_v54 }
  0x25   : > { %225 = vst.msk [vmem:[#allocation2 + $0xc8] sm:$0xff] %vm199_vm0, %v5673_v0  ;;  %v5504_v27 = vpop.eup %5503 }
  0x26   : > { %226 = vst.msk [vmem:[#allocation2 + $0xd0] sm:$0xff] %vm199_vm0, %v5673_v0  ;;  %v5506_v32 = vpop.eup %5505 }
  0x27   : > { %227 = vst.msk [vmem:[#allocation2 + $0xd8] sm:$0xff] %vm199_vm0, %v5673_v0  ;;  %v5508_v37 = vpop.eup %5507 }
  0x28   : > { %228 = vst.msk [vmem:[#allocation2 + $0xe0] sm:$0xff] %vm199_vm0, %v5673_v0  ;;  %v5510_v43 = vpop.eup %5509 }
  0x29   : > { %229 = vst.msk [vmem:[#allocation2 + $0xe8] sm:$0xff] %vm199_vm0, %v5673_v0 }
  0x2a   : > { %230 = vst.msk [vmem:[#allocation2 + $0xf0] sm:$0xff] %vm199_vm0, %v5673_v0 }
  0x2b   : > { %231 = vst.msk [vmem:[#allocation2 + $0xf8] sm:$0xff] %vm199_vm0, %v5673_v0 }
  0x2c   : > { %232 = vst.msk [vmem:[#allocation2 + $0x100] sm:$0xff] %vm199_vm0, %v5673_v0 }
  0x2d   : > { %233 = vst.msk [vmem:[#allocation2 + $0x108] sm:$0xff] %vm199_vm0, %v5673_v0 }
  0x2e   : > { %234 = vst.msk [vmem:[#allocation2 + $0x110] sm:$0xff] %vm199_vm0, %v5673_v0 }
  0x2f   : > { %235 = vst.msk [vmem:[#allocation2 + $0x118] sm:$0xff] %vm199_vm0, %v5673_v0 }
  0x30   : > { %236 = vst.msk [vmem:[#allocation2 + $0x120] sm:$0xff] %vm199_vm0, %v5673_v0 }
  0x31   : > { %237 = vst.msk [vmem:[#allocation2 + $0x128] sm:$0xff] %vm199_vm0, %v5673_v0 }
  0x32   : > { %238 = vst.msk [vmem:[#allocation2 + $0x130] sm:$0xff] %vm199_vm0, %v5673_v0 }
  0x33   : > { %239 = vst.msk [vmem:[#allocation2 + $0x138] sm:$0xff] %vm199_vm0, %v5673_v0 }
  0x34   : > { %240 = vst.msk [vmem:[#allocation2 + $0x140] sm:$0xff] %vm199_vm0, %v5673_v0 }
  0x35   : > { %241 = vst.msk [vmem:[#allocation2 + $0x148] sm:$0xff] %vm199_vm0, %v5673_v0 }
  0x36   : > { %242 = vst.msk [vmem:[#allocation2 + $0x150] sm:$0xff] %vm199_vm0, %v5673_v0 }
  0x37   : > { %243 = vst.msk [vmem:[#allocation2 + $0x158] sm:$0xff] %vm199_vm0, %v5673_v0 }
  0x38   : > { %244 = vst.msk [vmem:[#allocation2 + $0x160] sm:$0xff] %vm199_vm0, %v5673_v0 }
  0x39   : > { %245 = vst.msk [vmem:[#allocation2 + $0x168] sm:$0xff] %vm199_vm0, %v5673_v0 }
  0x3a   : > { %246 = vst.msk [vmem:[#allocation2 + $0x170] sm:$0xff] %vm199_vm0, %v5673_v0 }
  0x3b   : > { %247 = vst.msk [vmem:[#allocation2 + $0x178] sm:$0xff] %vm199_vm0, %v5673_v0 }
  0x3c   : > { %248 = vst.msk [vmem:[#allocation2 + $0x180] sm:$0xff] %vm199_vm0, %v5673_v0 }
  0x3d   : > { %249 = vst.msk [vmem:[#allocation2 + $0x188] sm:$0xff] %vm199_vm0, %v5673_v0 }
  0x3e   : > { %250 = vst.msk [vmem:[#allocation2 + $0x190] sm:$0xff] %vm199_vm0, %v5673_v0 }
  0x3f   : > { %251 = vst.msk [vmem:[#allocation2 + $0x198] sm:$0xff] %vm199_vm0, %v5673_v0 }
  0x40   : > { %252 = vst.msk [vmem:[#allocation2 + $0x1a0] sm:$0xff] %vm199_vm0, %v5673_v0 }
  0x41   : > { %253 = vst.msk [vmem:[#allocation2 + $0x1a8] sm:$0xff] %vm199_vm0, %v5673_v0 }
  0x42   : > { %254 = vst.msk [vmem:[#allocation2 + $0x1b0] sm:$0xff] %vm199_vm0, %v5673_v0 }
  0x43   : > { %255 = vst.msk [vmem:[#allocation2 + $0x1b8] sm:$0xff] %vm199_vm0, %v5673_v0 }
  0x44   : > { %256 = vst.msk [vmem:[#allocation2 + $0x1c0] sm:$0xff] %vm199_vm0, %v5673_v0 }
  0x45   : > { %257 = vst.msk [vmem:[#allocation2 + $0x1c8] sm:$0xff] %vm199_vm0, %v5673_v0 }
  0x46   : > { %258 = vst.msk [vmem:[#allocation2 + $0x1d0] sm:$0xff] %vm199_vm0, %v5673_v0 }
  0x47   : > { %259 = vst.msk [vmem:[#allocation2 + $0x1d8] sm:$0xff] %vm199_vm0, %v5673_v0 }
  0x48   : > { %260 = vst.msk [vmem:[#allocation2 + $0x1e0] sm:$0xff] %vm199_vm0, %v5673_v0 }
  0x49   : > { %261 = vst.msk [vmem:[#allocation2 + $0x1e8] sm:$0xff] %vm199_vm0, %v5673_v0 }
  0x4a   : > { %262 = vst.msk [vmem:[#allocation2 + $0x1f0] sm:$0xff] %vm199_vm0, %v5673_v0 }
  0x4b   : > { %263 = vst.msk [vmem:[#allocation2 + $0x1f8] sm:$0xff] %vm199_vm0, %v5673_v0 }
  0x4c   : > { %264 = vst.msk [vmem:[#allocation2 + $0x200] sm:$0xff] %vm199_vm0, %v5673_v0 }
  0x4d   : > { %265 = vst.msk [vmem:[#allocation2 + $0x208] sm:$0xff] %vm199_vm0, %v5673_v0 }
  0x4e   : > { %266 = vst.msk [vmem:[#allocation2 + $0x210] sm:$0xff] %vm199_vm0, %v5673_v0 }
  0x4f   : > { %267 = vst.msk [vmem:[#allocation2 + $0x218] sm:$0xff] %vm199_vm0, %v5673_v0 }
  0x50   : > { %268 = vst.msk [vmem:[#allocation2 + $0x220] sm:$0xff] %vm199_vm0, %v5673_v0 }
  0x51   : > { %269 = vst.msk [vmem:[#allocation2 + $0x228] sm:$0xff] %vm199_vm0, %v5673_v0 }
  0x52   : > { %270 = vst.msk [vmem:[#allocation2 + $0x230] sm:$0xff] %vm199_vm0, %v5673_v0 }
  0x53   : > { %271 = vst.msk [vmem:[#allocation2 + $0x238] sm:$0xff] %vm199_vm0, %v5673_v0  ;;  %v354_v0 = vadd.f32 %v5860_v9, %v321_v49 }
  0x54   : > { %413 = vst.msk [vmem:[#allocation2 + $0x88] sm:$0xff] %vm199_vm0, %v5484_v47  ;;  %v334_v47 = vmul.f32 %v5843_v4, %v297_v31 }
  0x55   : > { %414 = vst.msk [vmem:[#allocation2 + $0x90] sm:$0xff] %vm199_vm0, %v5486_v51  ;;  %5511 = vtanh.f32 %v354_v0  ;;  %v368_v51 = vadd.f32 %v5860_v9, %v335_v30 }
  0x56   : > { %409 = vst.msk [vmem:[#allocation2 + $0x48] sm:$0xff] %vm199_vm0, %v5488_v55  ;;  %5513 = vtanh.f32 %v355_v7  ;;  %v367_v0 = vadd.f32 %v5860_v9, %v334_v47  ;;  %v370_v7 = vadd.f32 %v5860_v9, %v337_v52 }
  0x57   : > { %410 = vst.msk [vmem:[#allocation2 + $0x50] sm:$0xff] %vm199_vm0, %v5490_v59  ;;  %5515 = vtanh.f32 %v358_v12  ;;  %v371_v12 = vadd.f32 %v5860_v9, %v338_v57 }
  0x58   : > { %407 = vst.msk [vmem:[#allocation2 + $0x28] sm:$0xff] %vm199_vm0, %v5492_v63  ;;  %5517 = vtanh.f32 %v359_v16 }
  0x59   : > { %408 = vst.msk [vmem:[#allocation2 + $0x30] sm:$0xff] %vm199_vm0, %v5494_v6  ;;  %5519 = vtanh.f32 %v362_v20  ;;  %v6055_v20 = vsel %vm688_vm1, %v690_v54, %v692_v14 }
  0x5a   : > { %415 = vst.msk [vmem:[#allocation2 + $0xa8] sm:$0xff] %vm199_vm0, %v5496_v11  ;;  %5521 = vtanh.f32 %v363_v24 }
  0x5b   : > { %v5968_v28 = vld [vmem:[#allocation2 + $0x88] sm:$0xff]  ;;  %416 = vst.msk [vmem:[#allocation2 + $0xb0] sm:$0xff] %vm199_vm0, %v5498_v15  ;;  %v5512_v48 = vpop.eup %5511  ;;  %5523 = vtanh.f32 %v360_v29 }
  0x5c   : > { %v5974_v33 = vld [vmem:[#allocation2 + $0x90] sm:$0xff]  ;;  %411 = vst.msk [vmem:[#allocation2 + $0x68] sm:$0xff] %vm199_vm0, %v5500_v19  ;;  %v5514_v53 = vpop.eup %5513  ;;  %5525 = vtanh.f32 %v361_v34 }
  0x5d   : > { %v5982_v38 = vpack.i.bf16 %v5974_v33, %v5968_v28  ;;  %v5984_v39 = vld [vmem:[#allocation2 + $0x48] sm:$0xff]  ;;  %412 = vst.msk [vmem:[#allocation2 + $0x70] sm:$0xff] %vm199_vm0, %v5502_v23  ;;  %v5516_v58 = vpop.eup %5515  ;;  %5527 = vtanh.f32 %v364_v40  ;;  %v454_v23 = vld [vmem:[#allocation2 + $0x78] sm:$0xff] }
  0x5e   : > { %v5991_v45 = vld [vmem:[#allocation2 + $0x50] sm:$0xff]  ;;  %417 = vst.msk [vmem:[#allocation2 + $0xc8] sm:$0xff] %vm199_vm0, %v5504_v27  ;;  %v5518_v62 = vpop.eup %5517  ;;  %5529 = vtanh.f32 %v365_v46 }
  0x5f   : > { %4216 = vrot.lane.b32.xlu2 %v5982_v38, %s5674_s17  ;;  %v6000_v49 = vpack.i.bf16 %v5991_v45, %v5984_v39  ;;  %v6002_v50 = vld [vmem:[#allocation2 + $0x28] sm:$0xff]  ;;  %418 = vst.msk [vmem:[#allocation2 + $0xd0] sm:$0xff] %vm199_vm0, %v5506_v32  ;;  %v5520_v3 = vpop.eup %5519  ;;  %5531 = vtanh.f32 %v368_v51 }
  0x60   : > { %v6008_v55 = vld [vmem:[#allocation2 + $0x30] sm:$0xff]  ;;  %421 = vst.msk [vmem:[#allocation2 + $0x108] sm:$0xff] %vm199_vm0, %v5508_v37  ;;  %v5522_v10 = vpop.eup %5521  ;;  %5533 = vtanh.f32 %v369_v56 }
  0x61   : > { %4206 = vrot.lane.b32.xlu1 %v6000_v49, %s5674_s17  ;;  %v6017_v59 = vpack.i.bf16 %v6008_v55, %v6002_v50  ;;  %v6019_v60 = vld [vmem:[#allocation2 + $0xa8] sm:$0xff]  ;;  %422 = vst.msk [vmem:[#allocation2 + $0x110] sm:$0xff] %vm199_vm0, %v5510_v43  ;;  %v5524_v15 = vpop.eup %5523  ;;  %5535 = vtanh.f32 %v366_v61  ;;  %v446_v61 = vld [vmem:[#allocation2 + $0x38] sm:$0xff] }
  0x62   : > { %v6023_v63 = vld [vmem:[#allocation2 + $0xb0] sm:$0xff]  ;;  %419 = vst.msk [vmem:[#allocation2 + $0xe8] sm:$0xff] %vm199_vm0, %v5512_v48  ;;  %v5526_v18 = vpop.eup %5525  ;;  %5537 = vtanh.f32 %v367_v0  ;;  %v697_v14 = vrot.slane %v446_v61, 1 }
  0x63   : > { %4201 = vrot.lane.b32.xlu0 %v6017_v59, %s5674_s17  ;;  %v6031_v5 = vpack.i.bf16 %v6023_v63, %v6019_v60  ;;  %v6033_v6 = vld [vmem:[#allocation2 + $0x68] sm:$0xff]  ;;  %420 = vst.msk [vmem:[#allocation2 + $0xf0] sm:$0xff] %vm199_vm0, %v5514_v53  ;;  %v5528_v21 = vpop.eup %5527  ;;  %5539 = vtanh.f32 %v370_v7 }
  0x64   : > { %v6037_v11 = vld [vmem:[#allocation2 + $0x70] sm:$0xff]  ;;  %423 = vst.msk [vmem:[#allocation2 + $0x128] sm:$0xff] %vm199_vm0, %v5516_v58  ;;  %v5530_v24 = vpop.eup %5529  ;;  %5541 = vtanh.f32 %v371_v12  ;;  %v695_v12 = vrot.slane %v6008_v55, 1 }
  0x65   : > { %v6046_v16 = vpack.i.bf16 %v6037_v11, %v6033_v6  ;;  %v6048_v17 = vld [vmem:[#allocation2 + $0xc8] sm:$0xff]  ;;  %424 = vst.msk [vmem:[#allocation2 + $0x130] sm:$0xff] %vm199_vm0, %v5518_v62  ;;  %v5532_v27 = vpop.eup %5531 }
  0x66   : > { %v6051_v19 = vld [vmem:[#allocation2 + $0xd0] sm:$0xff]  ;;  %427 = vst.msk [vmem:[#allocation2 + $0x168] sm:$0xff] %vm199_vm0, %v5520_v3  ;;  %v5534_v29 = vpop.eup %5533 }
  0x67   : > { %4221 = vrot.lane.b32.xlu2 %v6031_v5, %s5674_s17  ;;  %v6061_v22 = vpack.i.bf16 %v6051_v19, %v6048_v17  ;;  %428 = vst.msk [vmem:[#allocation2 + $0x170] sm:$0xff] %vm199_vm0, %v5522_v10  ;;  %v6066_v25 = vld [vmem:[#allocation2 + $0x108] sm:$0xff]  ;;  %v5536_v32 = vpop.eup %5535  ;;  %v694_v10 = vrot.slane %v6002_v50, 1 }
  0x68   : > { %v6068_v26 = vld [vmem:[#allocation2 + $0x110] sm:$0xff]  ;;  %425 = vst.msk [vmem:[#allocation2 + $0x148] sm:$0xff] %vm199_vm0, %v5524_v15  ;;  %v5538_v35 = vpop.eup %5537 }
  0x69   : > { %4211 = vrot.lane.b32.xlu1 %v6046_v16, %s5674_s17  ;;  %426 = vst.msk [vmem:[#allocation2 + $0x150] sm:$0xff] %vm199_vm0, %v5526_v18  ;;  %v6074_v30 = vld [vmem:[#allocation2 + $0xe8] sm:$0xff]  ;;  %v6083_v34 = vpack.i.bf16 %v6068_v26, %v6066_v25  ;;  %v5540_v40 = vpop.eup %5539  ;;  %v450_v18 = vld [vmem:[#allocation2 + $0x58] sm:$0xff] }
  0x6a   : > { %v6076_v31 = vld [vmem:[#allocation2 + $0xf0] sm:$0xff]  ;;  %429 = vst.msk [vmem:[#allocation2 + $0x188] sm:$0xff] %vm199_vm0, %v5528_v21  ;;  %v5542_v42 = vpop.eup %5541 }
  0x6b   : > { %4226 = vrot.lane.b32.xlu0 %v6061_v22, %s5674_s17  ;;  %9628 = vst [vmem:[#allocation3_spill] sm:$0xff] %v6083_v34  ;;  %v6086_v36 = vld [vmem:[#allocation2 + $0x128] sm:$0xff]  ;;  %v6093_v41 = vpack.i.bf16 %v6076_v31, %v6074_v30 }
  0x6c   : > { %430 = vst.msk [vmem:[#allocation2 + $0x190] sm:$0xff] %vm199_vm0, %v5530_v24  ;;  %v6088_v37 = vld [vmem:[#allocation2 + $0x130] sm:$0xff]  ;;  %v699_v24 = vrot.slane %v5984_v39, 1 }
  0x6d   : > { %433 = vst.msk [vmem:[#allocation2 + $0x1c8] sm:$0xff] %vm199_vm0, %v5532_v27  ;;  %v6101_v43 = vpack.i.bf16 %v6088_v37, %v6086_v36  ;;  %v6104_v44 = vld [vmem:[#allocation2 + $0x168] sm:$0xff]  ;;  %v700_v27 = vrot.slane %v5991_v45, 1 }
  0x6e   : > { %434 = vst.msk [vmem:[#allocation2 + $0x1d0] sm:$0xff] %vm199_vm0, %v5534_v29  ;;  %v6106_v46 = vld [vmem:[#allocation2 + $0x170] sm:$0xff]  ;;  %v702_v29 = vrot.slane %v450_v18, 1  ;;  %v709_v18 = vrot.slane %v5968_v28, 1 }
  0x6f   : > { %431 = vst.msk [vmem:[#allocation2 + $0x1a8] sm:$0xff] %vm199_vm0, %v5536_v32  ;;  %4236 = vrot.lane.b32.xlu2 %v6083_v34, %s5674_s17  ;;  %v6112_v47 = vld [vmem:[#allocation2 + $0x148] sm:$0xff]  ;;  %v6120_v51 = vpack.i.bf16 %v6106_v46, %v6104_v44  ;;  %v696_v32 = vsel %vm688_vm1, %v694_v10, %v695_v12  ;;  %v710_v10 = vrot.slane %v5974_v33, 1 }
  0x70   : > { %432 = vst.msk [vmem:[#allocation2 + $0x1b0] sm:$0xff] %vm199_vm0, %v5538_v35  ;;  %v6114_v48 = vld [vmem:[#allocation2 + $0x150] sm:$0xff]  ;;  %v698_v35 = vsel %vm688_vm1, %v695_v12, %v697_v14  ;;  %v462_v12 = vld [vmem:[#allocation2 + $0xb8] sm:$0xff]  ;;  %v704_v14 = vrot.slane %v6033_v6, 1 }
  0x71   : > { %435 = vst.msk [vmem:[#allocation2 + $0x1e8] sm:$0xff] %vm199_vm0, %v5540_v40  ;;  %4231 = vrot.lane.b32.xlu1 %v6093_v41, %s5674_s17  ;;  %v6122_v52 = vld [vmem:[#allocation2 + $0x188] sm:$0xff]  ;;  %v6128_v54 = vpack.i.bf16 %v6114_v48, %v6112_v47  ;;  %v458_v40 = vld [vmem:[#allocation2 + $0x98] sm:$0xff]  ;;  %v6177_v61 = vpack.i.bf16 %v698_v35, %v696_v32  ;;  %v711_v32 = vsel %vm688_vm1, %v709_v18, %v710_v10 }
  0x72   : > { %436 = vst.msk [vmem:[#allocation2 + $0x1f0] sm:$0xff] %vm199_vm0, %v5542_v42  ;;  %v701_v42 = vsel %vm688_vm1, %v699_v24, %v700_v27  ;;  %v714_v24 = vrot.slane %v6019_v60, 1  ;;  %v466_v18 = vld [vmem:[#allocation2 + $0xd8] sm:$0xff] }
  0x73   : > { %4241 = vrot.lane.b32.xlu0 %v6101_v43, %s5674_s17  ;;  %9629 = vst [vmem:[#allocation4_spill] sm:$0xff] %v6120_v51  ;;  %v6124_v53 = vld [vmem:[#allocation2 + $0x190] sm:$0xff] }
  0x74   : > { %9630 = vst [vmem:[#allocation5_spill] sm:$0xff] %v6128_v54  ;;  %v6134_v56 = vpack.i.bf16 %v6124_v53, %v6122_v52  ;;  %v6136_v57 = vld [vmem:[#allocation2 + $0x1c8] sm:$0xff] }
  0x75   : > { %v6138_v58 = vld [vmem:[#allocation2 + $0x1d0] sm:$0xff]  ;;  %9635 = vst [vmem:[#allocation10_spill] sm:$0xff] %v6177_v61 }
  0x76   : > { %9631 = vst [vmem:[#allocation6_spill] sm:$0xff] %v6134_v56  ;;  %v6142_v62 = vld [vmem:[#allocation2 + $0x1a8] sm:$0xff]  ;;  %v6150_v3 = vpack.i.bf16 %v6138_v58, %v6136_v57 }
  0x77   : > { %4251 = vrot.lane.b32.xlu2 %v6120_v51, %s5674_s17  ;;  %v6144_v0 = vld [vmem:[#allocation2 + $0x1b0] sm:$0xff]  ;;  %v712_v51 = vrot.slane %v458_v40, 1  ;;  %v9637_v40 = vpack.i.bf16 %v6055_v20, %v6042_v13  ;;  %v725_v13 = vrot.slane %v6076_v31, 1 }
  0x78   : > { %9632 = vst [vmem:[#allocation7_spill] sm:$0xff] %v6150_v3  ;;  %v6152_v7 = vld [vmem:[#allocation2 + $0x1e8] sm:$0xff]  ;;  %v6160_v15 = vpack.i.bf16 %v6144_v0, %v6142_v62 }
  0x79   : > { %4246 = vrot.lane.b32.xlu1 %v6128_v54, %s5674_s17  ;;  %v6154_v8 = vld [vmem:[#allocation2 + $0x1f0] sm:$0xff]  ;;  %v713_v35 = vsel %vm688_vm1, %v710_v10, %v712_v51  ;;  %v724_v10 = vrot.slane %v6074_v30, 1 }
  0x7a   : > { %9633 = vst [vmem:[#allocation8_spill] sm:$0xff] %v6160_v15  ;;  %v6166_v21 = vpack.i.bf16 %v6154_v8, %v6152_v7 }
  0x7b   : > { %4256 = vrot.lane.b32.xlu0 %v6134_v56, %s5674_s17  ;;  %v707_v56 = vrot.slane %v454_v23, 1  ;;  %v470_v23 = vld [vmem:[#allocation2 + $0xf8] sm:$0xff] }
  0x7c   : > { %9634 = vst [vmem:[#allocation9_spill] sm:$0xff] %v6166_v21  ;;  %v727_v20 = vrot.slane %v470_v23, 1  ;;  %v482_v23 = vld [vmem:[#allocation2 + $0x158] sm:$0xff] }
  0x7f   : > { %4266 = vrot.lane.b32.xlu2 %v6150_v3, %s5674_s17  ;;  %v703_v3 = vsel %vm688_vm1, %v700_v27, %v702_v29  ;;  %v715_v27 = vrot.slane %v6023_v63, 1  ;;  %v717_v29 = vrot.slane %v462_v12, 1  ;;  %v6201_v12 = vpack.i.bf16 %v713_v35, %v711_v32 }
  0x80   : > { %v6184_v54 = vpack.i.bf16 %v703_v3, %v701_v42  ;;  %v726_v32 = vsel %vm688_vm1, %v724_v10, %v725_v13  ;;  %v728_v35 = vsel %vm688_vm1, %v725_v13, %v727_v20  ;;  %v739_v13 = vrot.slane %v6112_v47, 1 }
  0x81   : > { %4261 = vrot.lane.b32.xlu1 %v6160_v15, %s5674_s17  ;;  %v705_v15 = vrot.slane %v6037_v11, 1  ;;  %9638 = vst [vmem:[#allocation12_spill] sm:$0xff] %v6201_v12  ;;  %v718_v51 = vsel %vm688_vm1, %v715_v27, %v717_v29  ;;  %v740_v20 = vrot.slane %v6114_v48, 1 }
  0x82   : > { %9636 = vst [vmem:[#allocation11_spill] sm:$0xff] %v6184_v54 }
  0x83   : > { %4271 = vrot.lane.b32.xlu0 %v6166_v21, %s5674_s17  ;;  %v706_v3 = vsel %vm688_vm1, %v704_v14, %v705_v15  ;;  %v708_v42 = vsel %vm688_vm1, %v705_v15, %v707_v56  ;;  %v474_v14 = vld [vmem:[#allocation2 + $0x118] sm:$0xff]  ;;  %v719_v56 = vrot.slane %v6048_v17, 1  ;;  %v720_v15 = vrot.slane %v6051_v19, 1 }
  0x84   : > { %v732_v29 = vrot.slane %v474_v14, 1  ;;  %v742_v14 = vrot.slane %v482_v23, 1  ;;  %v494_v23 = vld [vmem:[#allocation2 + $0x1b8] sm:$0xff] }
  0x87   : > { %4281 = vrot.lane.b32.xlu2 %v6177_v61, %s5675_s26  ;;  %v716_v61 = vsel %vm688_vm1, %v714_v24, %v715_v27  ;;  %v729_v24 = vrot.slane %v6066_v25, 1  ;;  %v730_v27 = vrot.slane %v6068_v26, 1 }
  0x88   : > { %v6210_v21 = vpack.i.bf16 %v718_v51, %v716_v61  ;;  %v478_v51 = vld [vmem:[#allocation2 + $0x138] sm:$0xff] }
  0x89   : > { %4276 = vrot.lane.b32.xlu1 %v9637_v40, %s5675_s26  ;;  %v6206_v40 = vpack.i.bf16 %v708_v42, %v706_v3  ;;  %v721_v3 = vsel %vm688_vm1, %v719_v56, %v720_v15  ;;  %v731_v42 = vsel %vm688_vm1, %v729_v24, %v730_v27  ;;  %v733_v10 = vsel %vm688_vm1, %v730_v27, %v732_v29  ;;  %v486_v56 = vld [vmem:[#allocation2 + $0x178] sm:$0xff] }
  0x8a   : > { %9640 = vst [vmem:[#allocation14_spill] sm:$0xff] %v6210_v21  ;;  %v744_v24 = vrot.slane %v6104_v44, 1  ;;  %v745_v27 = vrot.slane %v6106_v46, 1  ;;  %v747_v29 = vrot.slane %v486_v56, 1  ;;  %v757_v56 = vrot.slane %v494_v23, 1 }
  0x8b   : > { %4286 = vrot.lane.b32.xlu0 %v6184_v54, %s5675_s26  ;;  %9639 = vst [vmem:[#allocation13_spill] sm:$0xff] %v6206_v40  ;;  %v722_v54 = vrot.slane %v466_v18, 1  ;;  %v6225_v18 = vpack.i.bf16 %v728_v35, %v726_v32  ;;  %v741_v32 = vsel %vm688_vm1, %v739_v13, %v740_v20  ;;  %v743_v35 = vsel %vm688_vm1, %v740_v20, %v742_v14 }
  0x8c   : > { %v748_v13 = vsel %vm688_vm1, %v745_v27, %v747_v29  ;;  %v754_v20 = vrot.slane %v6142_v62, 1  ;;  %v755_v14 = vrot.slane %v6144_v0, 1  ;;  %v760_v29 = vrot.slane %v6138_v58, 1 }
  0x8d   : > { %v723_v61 = vsel %vm688_vm1, %v720_v15, %v722_v54  ;;  %9641 = vst [vmem:[#allocation15_spill] sm:$0xff] %v6225_v18  ;;  %v734_v54 = vrot.slane %v6086_v36, 1  ;;  %v735_v15 = vrot.slane %v6088_v37, 1 }
  0x8e   : > { %v756_v23 = vsel %vm688_vm1, %v754_v20, %v755_v14  ;;  %v502_v20 = vld [vmem:[#allocation2 + $0x1f8] sm:$0xff] }
  0x8f   : > { %4296 = vrot.lane.b32.xlu2 %v6201_v12, %s5675_s26  ;;  %v6230_v12 = vpack.i.bf16 %v723_v61, %v721_v3  ;;  %v736_v3 = vsel %vm688_vm1, %v734_v54, %v735_v15  ;;  %v498_v54 = vld [vmem:[#allocation2 + $0x1d8] sm:$0xff] }
  0x91   : > { %4291 = vrot.lane.b32.xlu1 %v6206_v40, %s5675_s26  ;;  %9642 = vst [vmem:[#allocation16_spill] sm:$0xff] %v6230_v12  ;;  %v6234_v40 = vpack.i.bf16 %v733_v10, %v731_v42  ;;  %v746_v42 = vsel %vm688_vm1, %v744_v24, %v745_v27  ;;  %v490_v10 = vld [vmem:[#allocation2 + $0x198] sm:$0xff]  ;;  %v759_v27 = vrot.slane %v6136_v57, 1 }
  0x92   : > { %v752_v24 = vrot.slane %v490_v10, 1 }
  0x93   : > { %4301 = vrot.lane.b32.xlu0 %v6210_v21, %s5675_s26  ;;  %v737_v21 = vrot.slane %v478_v51, 1  ;;  %9643 = vst [vmem:[#allocation17_spill] sm:$0xff] %v6234_v40  ;;  %v6249_v51 = vpack.i.bf16 %v743_v35, %v741_v32  ;;  %v6258_v32 = vpack.i.bf16 %v748_v13, %v746_v42  ;;  %v762_v35 = vrot.slane %v498_v54, 1  ;;  %v302_v13 = vld [vmem:[%s5834_s21 + $0xf0] sm:$0xff] }
  0x95   : > { %v738_v61 = vsel %vm688_vm1, %v735_v15, %v737_v21  ;;  %9644 = vst [vmem:[#allocation18_spill] sm:$0xff] %v6249_v51  ;;  %v749_v21 = vrot.slane %v6122_v52, 1  ;;  %v750_v15 = vrot.slane %v6124_v53, 1 }
  0x97   : > { %4311 = vrot.lane.b32.xlu2 %v6225_v18, %s5675_s26  ;;  %v6254_v18 = vpack.i.bf16 %v738_v61, %v736_v3  ;;  %v758_v3 = vsel %vm688_vm1, %v755_v14, %v757_v56  ;;  %v443_v61 = vld [vmem:[#allocation2 + $0x20] sm:$0xff]  ;;  %v751_v10 = vsel %vm688_vm1, %v749_v21, %v750_v15  ;;  %v753_v42 = vsel %vm688_vm1, %v750_v15, %v752_v24 }
  0x98   : > { %v6275_v54 = vpack.i.bf16 %v758_v3, %v756_v23  ;;  %v339_v14 = vmul.f32 %v5843_v4, %v302_v13  ;;  %v565_v21 = vrot.slane %v443_v61, 7  ;;  %v566_v15 = vrot.slane %v6002_v50, 7 }
  0x99   : > { %4306 = vrot.lane.b32.xlu1 %v6230_v12, %s5675_s26  ;;  %9645 = vst [vmem:[#allocation19_spill] sm:$0xff] %v6254_v18  ;;  %v447_v12 = vld [vmem:[#allocation2 + $0x40] sm:$0xff]  ;;  %v568_v24 = vrot.slane %v6008_v55, 7  ;;  %v6282_v34 = vpack.i.bf16 %v753_v42, %v751_v10  ;;  %v9438_v3 = vrot.slane %v5729_v1, 7  ;;  %v764_v13 = vrot.slane %v6152_v7, 1 }
  0x9a   : > { %v570_v50 = vrot.slane %v447_v12, 7  ;;  %v571_v55 = vrot.slane %v5984_v39, 7  ;;  %v573_v61 = vrot.slane %v5991_v45, 7 }
  0x9b   : > { %4316 = vrot.lane.b32.xlu0 %v6234_v40, %s5675_s26  ;;  %v303_v40 = vld [vmem:[%s5834_s21 + $0xf8] sm:$0xff]  ;;  %v6300_v10 = vsel %vm559_vm2, %v566_v15, %v568_v24 }
  0x9c   : > { %v340_v56 = vmul.f32 %v5843_v4, %v303_v40  ;;  %v765_v4 = vrot.slane %v6154_v8, 1  ;;  %v767_v40 = vrot.slane %v502_v20, 1  ;;  %9647 = vst [vmem:[#allocation21_spill] sm:$0xff] %v6300_v10  ;;  %v6309_v39 = vsel %vm559_vm2, %v570_v50, %v571_v55 }
  0x9d   : > { %9648 = vst [vmem:[#allocation22_spill] sm:$0xff] %v6309_v39  ;;  %v6319_v20 = vsel %vm559_vm2, %v571_v55, %v573_v61 }
  0x9e   : > { %v373_v23 = vadd.f32 %v5860_v9, %v340_v56  ;;  %v768_v12 = vsel %vm688_vm1, %v765_v4, %v767_v40  ;;  %9649 = vst [vmem:[#allocation23_spill] sm:$0xff] %v6319_v20 }
  0x9f   : > { %4326 = vrot.lane.b32.xlu2 %v6249_v51, %s5675_s26  ;;  %v761_v51 = vsel %vm688_vm1, %v759_v27, %v760_v29  ;;  %v372_v27 = vadd.f32 %v5860_v9, %v339_v14  ;;  %v6297_v9 = vsel %vm559_vm2, %v565_v21, %v566_v15  ;;  %v459_v14 = vld [vmem:[#allocation2 + $0xa0] sm:$0xff]  ;;  %v581_v21 = vrot.slane %v5968_v28, 7 }
  0xa0   : > { %9646 = vst [vmem:[#allocation20_spill] sm:$0xff] %v6297_v9  ;;  %v4355_v45 = vpack.i.bf16 %v6300_v10, %v6297_v9  ;;  %v583_v15 = vrot.slane %v5974_v33, 7  ;;  %v585_v50 = vrot.slane %v459_v14, 7  ;;  %v586_v28 = vrot.slane %v6019_v60, 7  ;;  %v9710_v9 = vld [vmem:[#allocation19_spill] sm:$0xff] }
  0xa1   : > { %4321 = vrot.lane.b32.xlu1 %v6254_v18, %s5675_s26  ;;  %v763_v18 = vsel %vm688_vm1, %v760_v29, %v762_v35  ;;  %v563_v29 = vrot.slane %v5733_v2, 7  ;;  %5543 = vtanh.f32 %v372_v27  ;;  %v455_v2 = vld [vmem:[#allocation2 + $0x80] sm:$0xff]  ;;  %v588_v33 = vrot.slane %v6023_v63, 7 }
  0xa2   : > { %v6290_v35 = vpack.i.bf16 %v763_v18, %v761_v51  ;;  %5545 = vtanh.f32 %v373_v23  ;;  %v766_v18 = vsel %vm688_vm1, %v764_v13, %v765_v4  ;;  %v451_v51 = vld [vmem:[#allocation2 + $0x60] sm:$0xff]  ;;  %v580_v56 = vrot.slane %v455_v2, 7 }
  0xa3   : > { %4331 = vrot.lane.b32.xlu0 %v6258_v32, %s5675_s26  ;;  %v6316_v42 = vsel %vm559_vm2, %v9438_v3, %v563_v29  ;;  %v6323_v24 = vpack.i.bf16 %v768_v12, %v766_v18  ;;  %v575_v23 = vrot.slane %v451_v51, 7  ;;  %v576_v13 = vrot.slane %v6033_v6, 7  ;;  %v463_v18 = vld [vmem:[#allocation2 + $0xc0] sm:$0xff] }
  0xa4   : > { %v578_v4 = vrot.slane %v6037_v11, 7  ;;  %v6329_v29 = vpack.i.bf16 %v6319_v20, %v6309_v39  ;;  %v6336_v55 = vsel %vm559_vm2, %v580_v56, %v581_v21  ;;  %v6339_v6 = vsel %vm559_vm2, %v581_v21, %v583_v15  ;;  %v467_v11 = vld [vmem:[#allocation2 + $0xe0] sm:$0xff] }
  0xa5   : > { %v6345_v61 = vsel %vm559_vm2, %v575_v23, %v576_v13  ;;  %v6353_v63 = vsel %vm559_vm2, %v585_v50, %v586_v28  ;;  %v6357_v2 = vpack.i.bf16 %v6339_v6, %v6336_v55  ;;  %v6360_v12 = vsel %vm559_vm2, %v586_v28, %v588_v33 }
  0xa6   : > { %9650 = vst [vmem:[#allocation24_spill] sm:$0xff] %v6345_v61  ;;  %v6348_v60 = vsel %vm559_vm2, %v576_v13, %v578_v4  ;;  %v595_v51 = vrot.slane %v467_v11, 7  ;;  %v596_v14 = vrot.slane %v6074_v30, 7  ;;  %v598_v56 = vrot.slane %v6076_v31, 7  ;;  %v475_v11 = vld [vmem:[#allocation2 + $0x120] sm:$0xff] }
  0xa7   : > { %4341 = vrot.lane.b32.xlu2 %v6275_v54, %s5675_s26  ;;  %v5544_v27 = vpop.eup %5543  ;;  %9651 = vst [vmem:[#allocation25_spill] sm:$0xff] %v6348_v60  ;;  %v6366_v21 = vpack.i.bf16 %v6348_v60, %v6345_v61  ;;  %v590_v15 = vrot.slane %v463_v18, 7  ;;  %v593_v23 = vrot.slane %v6051_v19, 7  ;;  %v6372_v13 = vpack.i.bf16 %v6360_v12, %v6353_v63  ;;  %v479_v19 = vld [vmem:[#allocation2 + $0x140] sm:$0xff]  ;;  %v9698_v60 = vld [vmem:[#allocation13_spill] sm:$0xff] }
  0xa8   : > { %v5546_v40 = vpop.eup %5545  ;;  %437 = vst.msk [vmem:[#allocation2 + $0x208] sm:$0xff] %vm199_vm0, %v5544_v27  ;;  %v591_v27 = vrot.slane %v6048_v17, 7  ;;  %v601_v30 = vrot.slane %v6066_v25, 7  ;;  %v603_v31 = vrot.slane %v6068_v26, 7  ;;  %v6382_v50 = vsel %vm559_vm2, %v596_v14, %v598_v56  ;;  %v9696_v61 = vld [vmem:[#allocation11_spill] sm:$0xff] }
  0xa9   : > { %4336 = vrot.lane.b32.xlu1 %v6282_v34, %s5675_s26  ;;  %438 = vst.msk [vmem:[#allocation2 + $0x210] sm:$0xff] %vm199_vm0, %v5546_v40  ;;  %v6379_v40 = vsel %vm559_vm2, %v595_v51, %v596_v14  ;;  %v610_v51 = vrot.slane %v479_v19, 7  ;;  %v611_v14 = vrot.slane %v6112_v47, 7  ;;  %v613_v56 = vrot.slane %v6114_v48, 7 }
  0xaa   : > { %9652 = vst [vmem:[#allocation26_spill] sm:$0xff] %v6353_v63  ;;  %v6389_v28 = vsel %vm559_vm2, %v590_v15, %v591_v27  ;;  %v6392_v33 = vsel %vm559_vm2, %v591_v27, %v593_v23  ;;  %v6401_v26 = vpack.i.bf16 %v6382_v50, %v6379_v40  ;;  %v6404_v18 = vsel %vm559_vm2, %v601_v30, %v603_v31 }
  0xab   : > { %4346 = vrot.lane.b32.xlu0 %v6290_v35, %s5675_s26  ;;  %9653 = vst [vmem:[#allocation27_spill] sm:$0xff] %v6379_v40  ;;  %v6410_v15 = vpack.i.bf16 %v6392_v33, %v6389_v28  ;;  %v605_v27 = vrot.slane %v475_v11, 7  ;;  %v606_v23 = vrot.slane %v6086_v36, 7  ;;  %v616_v47 = vrot.slane %v6104_v44, 7 }
  0xac   : > { %9654 = vst [vmem:[#allocation28_spill] sm:$0xff] %v6382_v50  ;;  %v618_v48 = vrot.slane %v6106_v46, 7  ;;  %v6423_v31 = vsel %vm559_vm2, %v610_v51, %v611_v14  ;;  %v6426_v19 = vsel %vm559_vm2, %v611_v14, %v613_v56  ;;  %v487_v51 = vld [vmem:[#allocation2 + $0x180] sm:$0xff]  ;;  %v626_v40 = vrot.slane %v6142_v62, 7 }
  0xad   : > { %9655 = vst [vmem:[#allocation29_spill] sm:$0xff] %v6389_v28  ;;  %v6433_v11 = vsel %vm559_vm2, %v605_v27, %v606_v23  ;;  %v6445_v46 = vpack.i.bf16 %v6426_v19, %v6423_v31  ;;  %v495_v56 = vld [vmem:[#allocation2 + $0x1c0] sm:$0xff]  ;;  %v621_v50 = vrot.slane %v6122_v52, 7  ;;  %v623_v28 = vrot.slane %v6124_v53, 7 }
  0xae   : > { %9656 = vst [vmem:[#allocation30_spill] sm:$0xff] %v6392_v33  ;;  %v6448_v14 = vsel %vm559_vm2, %v616_v47, %v618_v48  ;;  %v631_v62 = vrot.slane %v6136_v57, 7  ;;  %v503_v53 = vld [vmem:[#allocation2 + $0x200] sm:$0xff] }
  0xaf   : > { %4356 = vrot.lane.b32.xlu2 %v4355_v45, %s5676_s27  ;;  %v471_v45 = vld [vmem:[#allocation2 + $0x100] sm:$0xff]  ;;  %9657 = vst [vmem:[#allocation31_spill] sm:$0xff] %v6423_v31 }
  0xb0   : > { %v600_v4 = vrot.slane %v471_v45, 7  ;;  %v483_v45 = vld [vmem:[#allocation2 + $0x160] sm:$0xff]  ;;  %9658 = vst [vmem:[#allocation32_spill] sm:$0xff] %v6426_v19  ;;  %v638_v19 = vrot.slane %v6154_v8, 7 }
  0xb1   : > { %4351 = vrot.lane.b32.xlu1 %v6323_v24, %s5675_s26  ;;  %9659 = vst [vmem:[#allocation33_spill] sm:$0xff] %v6433_v11 }
  0xb2   : > { %v6397_v25 = vsel %vm559_vm2, %v600_v4, %v601_v30  ;;  %v608_v4 = vrot.slane %v6088_v37, 7  ;;  %v615_v30 = vrot.slane %v483_v45, 7  ;;  %v491_v37 = vld [vmem:[#allocation2 + $0x1a0] sm:$0xff]  ;;  %9662 = vst [vmem:[#allocation36_spill] sm:$0xff] %v6448_v14 }
  0xb3   : > { %4361 = vrot.lane.b32.xlu0 %v6329_v29, %s5676_s27  ;;  %v6416_v3 = vpack.i.bf16 %v6404_v18, %v6397_v25  ;;  %v625_v27 = vrot.slane %v491_v37, 7 }
  0xb4   : > { %v6436_v45 = vsel %vm559_vm2, %v606_v23, %v608_v4  ;;  %v6441_v44 = vsel %vm559_vm2, %v615_v30, %v616_v47  ;;  %v628_v23 = vrot.slane %v6144_v0, 7  ;;  %v620_v30 = vrot.slane %v487_v51, 7  ;;  %v6476_v51 = vld [vmem:[#allocation2 + $0x208] sm:$0xff] }
  0xb5   : > { %9660 = vst [vmem:[#allocation34_spill] sm:$0xff] %v6436_v45  ;;  %v6454_v4 = vpack.i.bf16 %v6436_v45, %v6433_v11  ;;  %v6460_v33 = vpack.i.bf16 %v6448_v14, %v6441_v44  ;;  %v630_v47 = vrot.slane %v495_v56, 7  ;;  %v633_v0 = vrot.slane %v6138_v58, 7 }
  0xb6   : > { %9661 = vst [vmem:[#allocation35_spill] sm:$0xff] %v6441_v44  ;;  %v6467_v48 = vsel %vm559_vm2, %v625_v27, %v626_v40  ;;  %v6470_v37 = vsel %vm559_vm2, %v626_v40, %v628_v23  ;;  %v6478_v44 = vld [vmem:[#allocation2 + $0x210] sm:$0xff]  ;;  %v6481_v57 = vsel %vm559_vm2, %v620_v30, %v621_v50  ;;  %v6484_v58 = vsel %vm559_vm2, %v621_v50, %v623_v28  ;;  %v6488_v40 = vpop.permute.xlu0 %4196  ;;  %v499_v23 = vld [vmem:[#allocation2 + $0x1e0] sm:$0xff] }
  0xb7   : > { %4371 = vrot.lane.b32.xlu2 %v6357_v2, %s5676_s27  ;;  %9663 = vst [vmem:[#allocation37_spill] sm:$0xff] %v6467_v48  ;;  %v6491_v56 = vsel %vm559_vm2, %v630_v47, %v631_v62  ;;  %v6495_v27 = vpack.i.bf16 %v6470_v37, %v6467_v48  ;;  %v6498_v14 = vsel %vm559_vm2, %v631_v62, %v633_v0  ;;  %v772_v30 = vrot.slane %v503_v53, 7 }
  0xb8   : > { %9664 = vst [vmem:[#allocation38_spill] sm:$0xff] %v6470_v37  ;;  %v773_v50 = vrot.slane %v6476_v51, 7  ;;  %v775_v28 = vrot.slane %v6478_v44, 7  ;;  %v6504_v63 = vpack.i.bf16 %v6484_v58, %v6481_v57  ;;  %v635_v31 = vrot.slane %v499_v23, 7 }
  0xb9   : > { %4366 = vrot.lane.b32.xlu1 %v6366_v21, %s5676_s27  ;;  %v6386_v17 = vpop.permute.xlu2 %4216  ;;  %9665 = vst [vmem:[#allocation39_spill] sm:$0xff] %v6481_v57  ;;  %v636_v47 = vrot.slane %v6152_v7, 7  ;;  %v6510_v48 = vpack.i.bf16 %v6498_v14, %v6491_v56  ;;  %v9689_v57 = vld [vmem:[#allocation8_spill] sm:$0xff] }
  0xba   : > { %9666 = vst [vmem:[#allocation40_spill] sm:$0xff] %v6484_v58  ;;  %v774_v62 = vsel %vm559_vm2, %v772_v30, %v773_v50  ;;  %v776_v0 = vsel %vm559_vm2, %v773_v50, %v775_v28 }
  0xbb   : > { %4376 = vrot.lane.b32.xlu0 %v6372_v13, %s5676_s27  ;;  %9667 = vst [vmem:[#allocation41_spill] sm:$0xff] %v6491_v56  ;;  %v6521_v7 = vsel %vm559_vm2, %v635_v31, %v636_v47  ;;  %v6524_v8 = vsel %vm559_vm2, %v636_v47, %v638_v19  ;;  %v6530_v56 = vpack.i.bf16 %v776_v0, %v774_v62 }
  0xbc   : > { %9668 = vst [vmem:[#allocation42_spill] sm:$0xff] %v6498_v14  ;;  %v6536_v50 = vpack.i.bf16 %v6524_v8, %v6521_v7  ;;  %v9687_v14 = vld [vmem:[#allocation4_spill] sm:$0xff] }
  0xbd   : > { %9670 = vst [vmem:[#allocation44_spill] sm:$0xff] %v6521_v7 }
  0xbe   : > { %9671 = vst [vmem:[#allocation45_spill] sm:$0xff] %v6524_v8 }
  0xbf   : > { %4386 = vrot.lane.b32.xlu2 %v6401_v26, %s5676_s27 }
  0xc1   : > { %4381 = vrot.lane.b32.xlu1 %v6410_v15, %s5676_s27  ;;  %v6430_v36 = vpop.permute.xlu2 %4221 }
  0xc3   : > { %4391 = vrot.lane.b32.xlu0 %v6416_v3, %s5676_s27 }
  0xc7   : > { %4401 = vrot.lane.b32.xlu2 %v6445_v46, %s5676_s27 }
  0xc9   : > { %4396 = vrot.lane.b32.xlu1 %v6454_v4, %s5676_s27  ;;  %v6474_v52 = vpop.permute.xlu2 %4236 }
  0xcb   : > { %4406 = vrot.lane.b32.xlu0 %v6460_v33, %s5676_s27 }
  0xcf   : > { %4416 = vrot.lane.b32.xlu2 %v6495_v27, %s5676_s27 }
  0xd1   : > { %4411 = vrot.lane.b32.xlu1 %v6504_v63, %s5676_s27  ;;  %v6518_v53 = vpop.permute.xlu2 %4251 }
  0xd2   : > { %9669 = vst [vmem:[#allocation43_spill] sm:$0xff] %v6518_v53 }
  0xd3   : > { %4421 = vrot.lane.b32.xlu0 %v6510_v48, %s5676_s27  ;;  %v6528_v23 = vpop.permute.xlu1 %4206 }
  0xd5   : > { %v6532_v30 = vpop.permute.xlu0 %4201 }
  0xd7   : > { %4431 = vrot.lane.b32.xlu2 %v6530_v56, %s5676_s27 }
  0xd9   : > { %4426 = vrot.lane.b32.xlu1 %v6536_v50, %s5676_s27  ;;  %v6542_v31 = vpop.permute.xlu2 %4266 }
  0xda   : > { %9672 = vst [vmem:[#allocation46_spill] sm:$0xff] %v6542_v31 }
  0xdb   : > { %4436 = vrot.lane.b32.xlu0 %v6017_v59, %s5677_s28  ;;  %v6546_v19 = vpop.permute.xlu1 %4211 }
  0xdc   : > { %9673 = vst [vmem:[#allocation47_spill] sm:$0xff] %v6546_v19  ;;  %v9707_v19 = vld [vmem:[#allocation17_spill] sm:$0xff] }
  0xdd   : > { %v6548_v28 = vpop.permute.xlu0 %4226 }
  0xde   : > { %9674 = vst [vmem:[#allocation48_spill] sm:$0xff] %v6548_v28 }
  0xdf   : > { %4446 = vrot.lane.b32.xlu2 %v6046_v16, %s5677_s28 }
  0xe1   : > { %4441 = vrot.lane.b32.xlu1 %v6000_v49, %s5677_s28  ;;  %v6554_v47 = vpop.permute.xlu2 %4281 }
  0xe2   : > { %9675 = vst [vmem:[#allocation49_spill] sm:$0xff] %v6554_v47 }
  0xe3   : > { %4451 = vrot.lane.b32.xlu0 %v5982_v38, %s5677_s28  ;;  %v6558_v62 = vpop.permute.xlu1 %4231  ;;  %v9681_v38 = vld [vmem:[#allocation3_spill] sm:$0xff] }
  0xe4   : > { %9676 = vst [vmem:[#allocation50_spill] sm:$0xff] %v6558_v62  ;;  %v9686_v62 = vld [vmem:[#allocation6_spill] sm:$0xff] }
  0xe5   : > { %v6560_v0 = vpop.permute.xlu0 %4241 }
  0xe6   : > { %9677 = vst [vmem:[#allocation51_spill] sm:$0xff] %v6560_v0 }
  0xe7   : > { %4461 = vrot.lane.b32.xlu2 %v6061_v22, %s5677_s28  ;;  %v9683_v22 = vld [vmem:[#allocation5_spill] sm:$0xff] }
  0xe9   : > { %4456 = vrot.lane.b32.xlu1 %v6031_v5, %s5677_s28  ;;  %v6566_v59 = vpop.permute.xlu2 %4296 }
  0xea   : > { %9678 = vst [vmem:[#allocation52_spill] sm:$0xff] %v6566_v59 }
  0xeb   : > { %4466 = vrot.lane.b32.xlu0 %v6093_v41, %s5677_s28  ;;  %v6570_v49 = vpop.permute.xlu1 %4246 }
  0xec   : > { %9679 = vst [vmem:[#allocation53_spill] sm:$0xff] %v6570_v49 }
  0xed   : > { %v6572_v16 = vpop.permute.xlu0 %4256 }
  0xee   : > { %9680 = vst [vmem:[#allocation54_spill] sm:$0xff] %v6572_v16  ;;  %v9692_v16 = vld [vmem:[#allocation7_spill] sm:$0xff] }
  0xef   : > { %4476 = vrot.lane.b32.xlu2 %v6101_v43, %s5677_s28 }
  0xf1   : > { %4471 = vrot.lane.b32.xlu1 %v9681_v38, %s5677_s28  ;;  %v6578_v7 = vpop.permute.xlu2 %4311 }
  0xf2   : > { %9682 = vst [vmem:[#allocation3_spill] sm:$0xff] %v6578_v7 }
  0xf3   : > { %4481 = vrot.lane.b32.xlu0 %v9683_v22, %s5677_s28  ;;  %v6582_v5 = vpop.permute.xlu1 %4261 }
  0xf4   : > { %9684 = vst [vmem:[#allocation5_spill] sm:$0xff] %v6582_v5  ;;  %v6600_v5 = vpack.i.bf16 %v6478_v44, %v6476_v51 }
  0xf5   : > { %v6584_v8 = vpop.permute.xlu0 %4271 }
  0xf6   : > { %9685 = vst [vmem:[#allocation55_spill] sm:$0xff] %v6584_v8  ;;  %v9691_v8 = vld [vmem:[#allocation9_spill] sm:$0xff] }
  0xf7   : > { %4491 = vrot.lane.b32.xlu2 %v9686_v62, %s5677_s28 }
  0xf9   : > { %4486 = vrot.lane.b32.xlu1 %v9687_v14, %s5677_s28  ;;  %v6590_v37 = vpop.permute.xlu2 %4326 }
  0xfa   : > { %9688 = vst [vmem:[#allocation6_spill] sm:$0xff] %v6590_v37  ;;  %v9697_v37 = vld [vmem:[#allocation10_spill] sm:$0xff] }
  0xfb   : > { %4496 = vrot.lane.b32.xlu0 %v9689_v57, %s5677_s28  ;;  %v6594_v58 = vpop.permute.xlu1 %4276 }
  0xfd   : > { %v6596_v7 = vpop.permute.xlu0 %4286 }
  0xfe   : > { %9690 = vst [vmem:[#allocation4_spill] sm:$0xff] %v6596_v7  ;;  %v9704_v7 = vld [vmem:[#allocation16_spill] sm:$0xff] }
  0xff   : > { %4506 = vrot.lane.b32.xlu2 %v9691_v8, %s5677_s28 }
 0x101   : > { %4501 = vrot.lane.b32.xlu1 %v9692_v16, %s5677_s28  ;;  %v6606_v28 = vpop.permute.xlu2 %4341 }
 0x102   : > { %9693 = vst [vmem:[#allocation8_spill] sm:$0xff] %v6606_v28 }
 0x103   : > { %4511 = vrot.lane.b32.xlu0 %v6600_v5, %s5677_s28  ;;  %v6610_v31 = vpop.permute.xlu1 %4291 }
 0x104   : > { %9694 = vst [vmem:[#allocation9_spill] sm:$0xff] %v6610_v31  ;;  %v9701_v31 = vld [vmem:[#allocation14_spill] sm:$0xff] }
 0x105   : > { %v6612_v59 = vpop.permute.xlu0 %4301 }
 0x106   : > { %9695 = vst [vmem:[#allocation7_spill] sm:$0xff] %v6612_v59  ;;  %v9702_v59 = vld [vmem:[#allocation12_spill] sm:$0xff] }
 0x107   : > { %4521 = vrot.lane.b32.xlu2 %v9696_v61, %s5678_s29 }
 0x109   : > { %4516 = vrot.lane.b32.xlu1 %v9697_v37, %s5678_s29  ;;  %v6618_v49 = vpop.permute.xlu2 %4356 }
 0x10b   : > { %4526 = vrot.lane.b32.xlu0 %v9698_v60, %s5678_s29  ;;  %v6622_v28 = vpop.permute.xlu1 %4306 }
 0x10c   : > { %9699 = vst [vmem:[#allocation11_spill] sm:$0xff] %v6622_v28  ;;  %v9708_v28 = vld [vmem:[#allocation15_spill] sm:$0xff] }
 0x10d   : > { %v6624_v11 = vpop.permute.xlu0 %4316 }
 0x10e   : > { %9700 = vst [vmem:[#allocation10_spill] sm:$0xff] %v6624_v11 }
 0x10f   : > { %4536 = vrot.lane.b32.xlu2 %v9701_v31, %s5678_s29 }
 0x111   : > { %4531 = vrot.lane.b32.xlu1 %v9702_v59, %s5678_s29  ;;  %v6630_v45 = vpop.permute.xlu2 %4371 }
 0x112   : > { %9703 = vst [vmem:[#allocation13_spill] sm:$0xff] %v6630_v45 }
 0x113   : > { %4541 = vrot.lane.b32.xlu0 %v9704_v7, %s5678_s29  ;;  %v6634_v37 = vpop.permute.xlu1 %4321 }
 0x114   : > { %9705 = vst [vmem:[#allocation14_spill] sm:$0xff] %v6634_v37 }
 0x115   : > { %v6636_v0 = vpop.permute.xlu0 %4331 }
 0x116   : > { %9706 = vst [vmem:[#allocation12_spill] sm:$0xff] %v6636_v0  ;;  %v9713_v0 = vld [vmem:[#allocation18_spill] sm:$0xff] }
 0x117   : > { %4551 = vrot.lane.b32.xlu2 %v9707_v19, %s5678_s29 }
 0x119   : > { %4546 = vrot.lane.b32.xlu1 %v9708_v28, %s5678_s29  ;;  %v6642_v10 = vpop.permute.xlu2 %4386 }
 0x11a   : > { %9709 = vst [vmem:[#allocation16_spill] sm:$0xff] %v6642_v10  ;;  %v506_v10 = vld [vmem:[#allocation2 + $0x218] sm:$0xff] }
 0x11b   : > { %4556 = vrot.lane.b32.xlu0 %v9710_v9, %s5678_s29  ;;  %v6646_v20 = vpop.permute.xlu1 %4336  ;;  %v781_v53 = vrot.slane %v506_v10, 1 }
 0x11c   : > { %9711 = vst [vmem:[#allocation17_spill] sm:$0xff] %v6646_v20  ;;  %v778_v20 = vrot.slane %v6476_v51, 1 }
 0x11d   : > { %v6648_v45 = vpop.permute.xlu0 %4346 }
 0x11e   : > { %9712 = vst [vmem:[#allocation15_spill] sm:$0xff] %v6648_v45  ;;  %v779_v45 = vrot.slane %v6478_v44, 1 }
 0x11f   : > { %4566 = vrot.lane.b32.xlu2 %v6258_v32, %s5678_s29 }
 0x120   : > { %v780_v47 = vsel %vm688_vm1, %v778_v20, %v779_v45 }
 0x121   : > { %4561 = vrot.lane.b32.xlu1 %v9713_v0, %s5678_s29  ;;  %v6654_v37 = vpop.permute.xlu2 %4401 }
 0x122   : > { %9714 = vst [vmem:[#allocation19_spill] sm:$0xff] %v6654_v37 }
 0x123   : > { %4571 = vrot.lane.b32.xlu0 %v6282_v34, %s5678_s29  ;;  %v6658_v11 = vpop.permute.xlu1 %4351 }
 0x124   : > { %9715 = vst [vmem:[#allocation18_spill] sm:$0xff] %v6658_v11  ;;  %v782_v11 = vsel %vm688_vm1, %v779_v45, %v781_v53 }
 0x125   : > { %v6660_v39 = vpop.permute.xlu0 %4361  ;;  %v6678_v10 = vpack.i.bf16 %v782_v11, %v780_v47  ;;  %v6722_v47 = vld [vmem:[#allocation2 + $0x228] sm:$0xff] }
 0x126   : > { %9716 = vst [vmem:[#allocation56_spill] sm:$0xff] %v6660_v39 }
 0x127   : > { %4581 = vrot.lane.b32.xlu2 %v6290_v35, %s5678_s29 }
 0x129   : > { %4576 = vrot.lane.b32.xlu1 %v6275_v54, %s5678_s29  ;;  %v6668_v37 = vpop.permute.xlu2 %4416 }
 0x12a   : > { %9717 = vst [vmem:[#allocation57_spill] sm:$0xff] %v6668_v37  ;;  %v5611_v37 = vld [vmem:[#allocation2 + $0x48] sm:$0xff] }
 0x12b   : > { %4586 = vrot.lane.b32.xlu0 %v6323_v24, %s5678_s29  ;;  %v6674_v39 = vpop.permute.xlu1 %4366 }
 0x12d   : > { %v6676_v51 = vpop.permute.xlu0 %4376 }
 0x12e   : > { %9718 = vst [vmem:[#allocation58_spill] sm:$0xff] %v6676_v51 }
 0x12f   : > { %4596 = vrot.lane.b32.xlu2 %v6329_v29, %s5679_s30 }
 0x131   : > { %4591 = vrot.lane.b32.xlu1 %v6678_v10, %s5678_s29  ;;  %v6684_v44 = vpop.permute.xlu2 %4431 }
 0x132   : > { %9719 = vst [vmem:[#allocation59_spill] sm:$0xff] %v6684_v44 }
 0x133   : > { %4601 = vrot.lane.b32.xlu0 %v6366_v21, %s5679_s30  ;;  %v6688_v20 = vpop.permute.xlu1 %4381 }
 0x134   : > { %9720 = vst [vmem:[#allocation60_spill] sm:$0xff] %v6688_v20 }
 0x135   : > { %v6690_v45 = vpop.permute.xlu0 %4391 }
 0x136   : > { %9721 = vst [vmem:[#allocation61_spill] sm:$0xff] %v6690_v45  ;;  %v787_v45 = vrot.slane %v6722_v47, 7 }
 0x137   : > { %4611 = vrot.lane.b32.xlu2 %v6372_v13, %s5679_s30 }
 0x139   : > { %4606 = vrot.lane.b32.xlu1 %v6357_v2, %s5679_s30  ;;  %v6696_v11 = vpop.permute.xlu2 %4446 }
 0x13b   : > { %4616 = vrot.lane.b32.xlu0 %v6410_v15, %s5679_s30  ;;  %v6700_v29 = vpop.permute.xlu1 %4396 }
 0x13d   : > { %v6702_v53 = vpop.permute.xlu0 %4406 }
 0x13f   : > { %4626 = vrot.lane.b32.xlu2 %v6416_v3, %s5679_s30  ;;  %v507_v3 = vld [vmem:[#allocation2 + $0x220] sm:$0xff] }
 0x140   : > { %v786_v44 = vrot.slane %v507_v3, 7 }
 0x141   : > { %4621 = vrot.lane.b32.xlu1 %v6401_v26, %s5679_s30  ;;  %v6708_v21 = vpop.permute.xlu2 %4461  ;;  %v6724_v26 = vld [vmem:[#allocation2 + $0x230] sm:$0xff] }
 0x142   : > { %9722 = vst [vmem:[#allocation62_spill] sm:$0xff] %v6708_v21 }
 0x143   : > { %4631 = vrot.lane.b32.xlu0 %v6454_v4, %s5679_s30  ;;  %v6712_v2 = vpop.permute.xlu1 %4411 }
 0x144   : > { %9723 = vst [vmem:[#allocation63_spill] sm:$0xff] %v6712_v2  ;;  %v5612_v2 = vld [vmem:[#allocation2 + $0x50] sm:$0xff] }
 0x145   : > { %v6714_v13 = vpop.permute.xlu0 %4421 }
 0x146   : > { %9724 = vst [vmem:[#allocation64_spill] sm:$0xff] %v6714_v13 }
 0x147   : > { %4641 = vrot.lane.b32.xlu2 %v6460_v33, %s5679_s30  ;;  %v789_v33 = vrot.slane %v6724_v26, 7 }
 0x149   : > { %4636 = vrot.lane.b32.xlu1 %v6445_v46, %s5679_s30  ;;  %v6720_v15 = vpop.permute.xlu2 %4476  ;;  %v788_v46 = vsel %vm559_vm2, %v786_v44, %v787_v45  ;;  %v790_v21 = vsel %vm559_vm2, %v787_v45, %v789_v33  ;;  %v5614_v45 = vld [vmem:[#allocation2 + $0x90] sm:$0xff] }
 0x14b   : > { %4646 = vrot.lane.b32.xlu0 %v6504_v63, %s5679_s30  ;;  %v6728_v4 = vpop.permute.xlu1 %4426 }
 0x14c   : > { %9725 = vst [vmem:[#allocation65_spill] sm:$0xff] %v6728_v4  ;;  %v4670_v4 = vpack.i.bf16 %v790_v21, %v788_v46  ;;  %v5615_v46 = vld [vmem:[#allocation2 + $0x68] sm:$0xff] }
 0x14d   : > { %v6732_v13 = vpop.permute.xlu0 %4436 }
 0x14f   : > { %4656 = vrot.lane.b32.xlu2 %v6510_v48, %s5679_s30  ;;  %v4675_v48 = vpack.i.bf16 %v5612_v2, %v5611_v37  ;;  %v5617_v2 = vld [vmem:[#allocation2 + $0xa8] sm:$0xff] }
 0x151   : > { %4651 = vrot.lane.b32.xlu1 %v6495_v27, %s5679_s30  ;;  %v6740_v63 = vpop.permute.xlu2 %4491 }
 0x152   : > { %9726 = vst [vmem:[#allocation66_spill] sm:$0xff] %v6740_v63  ;;  %v5616_v63 = vld [vmem:[#allocation2 + $0x70] sm:$0xff] }
 0x153   : > { %4661 = vrot.lane.b32.xlu0 %v6536_v50, %s5679_s30  ;;  %v6744_v3 = vpop.permute.xlu1 %4441  ;;  %v5613_v50 = vld [vmem:[#allocation2 + $0x88] sm:$0xff]  ;;  %v4680_v37 = vpack.i.bf16 %v5616_v63, %v5615_v46 }
 0x154   : > { %v4685_v21 = vpack.i.bf16 %v5614_v45, %v5613_v50  ;;  %v5619_v50 = vld [vmem:[#allocation2 + $0xc8] sm:$0xff]  ;;  %v5620_v45 = vld [vmem:[#allocation2 + $0xd0] sm:$0xff] }
 0x155   : > { %v6746_v20 = vpop.permute.xlu0 %4451 }
 0x157   : > { %4671 = vrot.lane.b32.xlu2 %v4670_v4, %s5679_s30  ;;  %v5618_v4 = vld [vmem:[#allocation2 + $0xb0] sm:$0xff] }
 0x158   : > { %v4690_v51 = vpack.i.bf16 %v5618_v4, %v5617_v2  ;;  %v793_v2 = vrot.slane %v6724_v26, 1 }
 0x159   : > { %4666 = vrot.lane.b32.xlu1 %v6530_v56, %s5679_s30  ;;  %v6754_v44 = vpop.permute.xlu2 %4506 }
 0x15a   : > { %9727 = vst [vmem:[#allocation67_spill] sm:$0xff] %v6754_v44 }
 0x15b   : > { %4676 = vrot.lane.b32.xlu0 %v4675_v48, %s5680_s5  ;;  %v6752_v27 = vpop.permute.xlu1 %4456 }
 0x15d   : > { %v6756_v33 = vpop.permute.xlu0 %4466 }
 0x15e   : > { %9728 = vst [vmem:[#allocation68_spill] sm:$0xff] %v6756_v33  ;;  %v4695_v33 = vpack.i.bf16 %v5620_v45, %v5619_v50 }
 0x15f   : > { %4686 = vrot.lane.b32.xlu2 %v4685_v21, %s5680_s5 }
 0x161   : > { %4681 = vrot.lane.b32.xlu1 %v4680_v37, %s5680_s5  ;;  %v6765_v44 = vpop.permute.xlu2 %4521 }
 0x163   : > { %4691 = vrot.lane.b32.xlu0 %v4690_v51, %s5680_s5  ;;  %v6761_v56 = vpop.permute.xlu1 %4471 }
 0x164   : > { %9729 = vst [vmem:[#allocation69_spill] sm:$0xff] %v6761_v56 }
 0x165   : > { %v6763_v48 = vpop.permute.xlu0 %4481 }
 0x167   : > { %4701 = vrot.lane.b32.xlu2 %v6093_v41, %s5680_s5 }
 0x169   : > { %4696 = vrot.lane.b32.xlu1 %v4695_v33, %s5680_s5  ;;  %v6776_v21 = vpop.permute.xlu2 %4536 }
 0x16b   : > { %4706 = vrot.lane.b32.xlu0 %v9681_v38, %s5680_s5  ;;  %v6772_v63 = vpop.permute.xlu1 %4486 }
 0x16d   : > { %v6774_v51 = vpop.permute.xlu0 %4496 }
 0x16e   : > { %9730 = vst [vmem:[#allocation70_spill] sm:$0xff] %v6774_v51 }
 0x16f   : > { %4716 = vrot.lane.b32.xlu2 %v9683_v22, %s5680_s5 }
 0x171   : > { %4711 = vrot.lane.b32.xlu1 %v6101_v43, %s5680_s5  ;;  %v6790_v38 = vpop.permute.xlu2 %4551 }
 0x172   : > { %9733 = vst [vmem:[#allocation73_spill] sm:$0xff] %v6790_v38 }
 0x173   : > { %4721 = vrot.lane.b32.xlu0 %v9687_v14, %s5680_s5  ;;  %v6784_v41 = vpop.permute.xlu1 %4501  ;;  %v4750_v14 = vpack.i.bf16 %v6724_v26, %v6722_v47 }
 0x174   : > { %9731 = vst [vmem:[#allocation71_spill] sm:$0xff] %v6784_v41 }
 0x175   : > { %v6786_v33 = vpop.permute.xlu0 %4511 }
 0x176   : > { %9732 = vst [vmem:[#allocation72_spill] sm:$0xff] %v6786_v33 }
 0x177   : > { %4731 = vrot.lane.b32.xlu2 %v9689_v57, %s5680_s5 }
 0x179   : > { %4726 = vrot.lane.b32.xlu1 %v9686_v62, %s5680_s5  ;;  %v6806_v57 = vpop.permute.xlu2 %4566 }
 0x17b   : > { %4736 = vrot.lane.b32.xlu0 %v9692_v16, %s5680_s5  ;;  %v6796_v22 = vpop.permute.xlu1 %4516 }
 0x17d   : > { %v6798_v43 = vpop.permute.xlu0 %4526 }
 0x17f   : > { %4746 = vrot.lane.b32.xlu2 %v6600_v5, %s5680_s5 }
 0x181   : > { %4741 = vrot.lane.b32.xlu1 %v9691_v8, %s5680_s5  ;;  %v6821_v8 = vpop.permute.xlu2 %4581 }
 0x182   : > { %9736 = vst [vmem:[#allocation76_spill] sm:$0xff] %v6821_v8 }
 0x183   : > { %4751 = vrot.lane.b32.xlu0 %v4750_v14, %s5680_s5  ;;  %v6809_v62 = vpop.permute.xlu1 %4531 }
 0x185   : > { %v6811_v16 = vpop.permute.xlu0 %4541 }
 0x186   : > { %9734 = vst [vmem:[#allocation74_spill] sm:$0xff] %v6811_v16  ;;  %v4239_v16 = vunpack.i.h.bf16 %v6474_v52 }
 0x187   : > { %4761 = vrot.lane.b32.xlu2 %v9698_v60, %s5681_s6 }
 0x189   : > { %4756 = vrot.lane.b32.xlu1 %v9696_v61, %s5681_s6 }
 0x18b   : > { %4766 = vrot.lane.b32.xlu0 %v9702_v59, %s5681_s6  ;;  %v6819_v5 = vpop.permute.xlu1 %4546  ;;  %v6835_v59 = vpop.permute.xlu2 %4596 }
 0x18c   : > { %9735 = vst [vmem:[#allocation75_spill] sm:$0xff] %v6819_v5 }
 0x18d   : > { %v6823_v46 = vpop.permute.xlu0 %4556 }
 0x18f   : > { %4776 = vrot.lane.b32.xlu2 %v9704_v7, %s5681_s6 }
 0x191   : > { %4771 = vrot.lane.b32.xlu1 %v9701_v31, %s5681_s6 }
 0x193   : > { %4781 = vrot.lane.b32.xlu0 %v9708_v28, %s5681_s6  ;;  %v6831_v60 = vpop.permute.xlu1 %4561  ;;  %v6849_v28 = vpop.permute.xlu2 %4611 }
 0x195   : > { %v6833_v61 = vpop.permute.xlu0 %4571 }
 0x197   : > { %4791 = vrot.lane.b32.xlu2 %v9710_v9, %s5681_s6 }
 0x199   : > { %4786 = vrot.lane.b32.xlu1 %v9707_v19, %s5681_s6  ;;  %v510_v19 = vld [vmem:[#allocation2 + $0x238] sm:$0xff] }
 0x19a   : > { %v795_v4 = vrot.slane %v510_v19, 1 }
 0x19b   : > { %4796 = vrot.lane.b32.xlu0 %v9713_v0, %s5681_s6  ;;  %v6843_v7 = vpop.permute.xlu1 %4576  ;;  %v792_v0 = vrot.slane %v6722_v47, 1 }
 0x19c   : > { %9737 = vst [vmem:[#allocation77_spill] sm:$0xff] %v6843_v7 }
 0x19d   : > { %v6845_v31 = vpop.permute.xlu0 %4586 }
 0x19e   : > { %9738 = vst [vmem:[#allocation78_spill] sm:$0xff] %v6845_v31 }
 0x19f   : > { %4806 = vrot.lane.b32.xlu2 %v6282_v34, %s5681_s6  ;;  %v794_v34 = vsel %vm688_vm1, %v792_v0, %v793_v2 }
 0x1a1   : > { %4801 = vrot.lane.b32.xlu1 %v6258_v32, %s5681_s6  ;;  %v796_v32 = vsel %vm688_vm1, %v793_v2, %v795_v4 }
 0x1a2   : > { %v4830_v26 = vpack.i.bf16 %v796_v32, %v794_v34 }
 0x1a3   : > { %4811 = vrot.lane.b32.xlu0 %v6275_v54, %s5681_s6  ;;  %v6855_v9 = vpop.permute.xlu1 %4591  ;;  %v6867_v54 = vpop.permute.xlu2 %4626 }
 0x1a4   : > { %9739 = vst [vmem:[#allocation79_spill] sm:$0xff] %v6855_v9 }
 0x1a5   : > { %v6857_v37 = vpop.permute.xlu0 %4601  ;;  %9740 = vst [vmem:[#allocation80_spill] sm:$0xff] %v6867_v54 }
 0x1a7   : > { %4821 = vrot.lane.b32.xlu2 %v6323_v24, %s5681_s6 }
 0x1a9   : > { %4816 = vrot.lane.b32.xlu1 %v6290_v35, %s5681_s6 }
 0x1ab   : > { %4826 = vrot.lane.b32.xlu0 %v6678_v10, %s5681_s6  ;;  %v6871_v50 = vpop.permute.xlu1 %4606  ;;  %v6878_v45 = vpop.permute.xlu2 %4641 }
 0x1ad   : > { %v6873_v47 = vpop.permute.xlu0 %4616 }
 0x1b1   : > { %4831 = vrot.lane.b32.xlu1 %v4830_v26, %s5681_s6  ;;  %v1848_v26 = vld [vmem:[%s9401_s1 + $0x10] sm:$0x3] }
 0x1b2   : > { %v1858_v31 = vunpack.c.l.b16 %v1848_v26 }
 0x1b3   : > { %v6876_v24 = vpop.permute.xlu1 %4621  ;;  %v6886_v0 = vpop.permute.xlu2 %4656 }
 0x1b4   : > { %9741 = vst [vmem:[#allocation81_spill] sm:$0xff] %v6876_v24  ;;  %v1861_v38 = vpack.c.b16 %v1858_v31, %v1858_v31  ;;  %v4168_v31 = vld [vmem:[%s9401_s1] sm:$0xff]  ;;  %v4224_v24 = vunpack.i.h.bf16 %v6430_v36 }
 0x1b5   : > { %v6880_v35 = vpop.permute.xlu0 %4631  ;;  %9743 = vst [vmem:[#allocation83_spill] sm:$0xff] %v6886_v0  ;;  %v4218_v0 = vunpack.i.l.bf16 %v6386_v17 }
 0x1b6   : > { %9742 = vst [vmem:[#allocation82_spill] sm:$0xff] %v6880_v35  ;;  %v1915_v56 = vsel %vm1913_vm3, %v1861_v38, 0 }
 0x1b7   : > { %1922 = vmatpush.bf16.msra.mxu0 %v1915_v56  ;;  %4172 = vmatpush.bf16.msra.mxu2 %v1915_v56  ;;  %v439_v56 = vld [vmem:[#allocation2] sm:$0xff] }
 0x1bb   : > { %v6882_v14 = vpop.permute.xlu1 %4636  ;;  %v6892_v4 = vpop.permute.xlu2 %4671 }
 0x1bc   : > { %9746 = vst [vmem:[#allocation86_spill] sm:$0xff] %v6892_v4  ;;  %v4169_v4 = vld [vmem:[%s9401_s1 + $0x8] sm:$0xff] }
 0x1bd   : > { %v6884_v19 = vpop.permute.xlu0 %4646  ;;  %1923 = vmatpush.bf16.msra.mxu0 %v4169_v4  ;;  %4173 = vmatpush.bf16.msra.mxu2 %v4169_v4  ;;  %v560_v4 = vrot.slane %v439_v56, 7 }
 0x1c1   : > { %1924 = vmatpush.bf16.msra.mxu0 %v4168_v31  ;;  %4174 = vmatpush.bf16.msra.mxu2 %v4168_v31  ;;  %v4219_v31 = vunpack.i.h.bf16 %v6386_v17  ;;  %v6947_v17 = vsel %vm199_vm0, %v6336_v55, %v4218_v0  ;;  %v6962_v55 = vsel %vm199_vm0, %v6360_v12, %v4224_v24 }
 0x1c2   : > { %9755 = vst [vmem:[#allocation94_spill] sm:$0xff] %v6962_v55 }
 0x1c3   : > { %v6888_v10 = vpop.permute.xlu1 %4651  ;;  %v6901_v9 = vpop.permute.xlu2 %4686 }
 0x1c4   : > { %9744 = vst [vmem:[#allocation84_spill] sm:$0xff] %v6888_v10  ;;  %v4279_v10 = vunpack.i.h.bf16 %v6594_v58 }
 0x1c5   : > { %v6890_v2 = vpop.permute.xlu0 %4661 }
 0x1c6   : > { %9745 = vst [vmem:[#allocation85_spill] sm:$0xff] %v6890_v2 }
 0x1cb   : > { %v6894_v34 = vpop.permute.xlu1 %4666  ;;  %v6913_v2 = vpop.permute.xlu2 %4701 }
 0x1cc   : > { %9747 = vst [vmem:[#allocation87_spill] sm:$0xff] %v6894_v34 }
 0x1cd   : > { %v6896_v32 = vpop.permute.xlu0 %4676  ;;  %9748 = vst [vmem:[#allocation88_spill] sm:$0xff] %v6913_v2  ;;  %v4198_v2 = vunpack.i.l.bf16 %v6488_v40 }
 0x1d3   : > { %v6903_v33 = vpop.permute.xlu1 %4681  ;;  %v6924_v54 = vpop.permute.xlu2 %4716 }
 0x1d5   : > { %v6905_v35 = vpop.permute.xlu0 %4691 }
 0x1db   : > { %v6911_v34 = vpop.permute.xlu1 %4696  ;;  %v6939_v51 = vpop.permute.xlu2 %4731 }
 0x1dc   : > { %9753 = vst [vmem:[#allocation92_spill] sm:$0xff] %v6939_v51  ;;  %v6956_v51 = vsel %vm199_vm0, %v6339_v6, %v4219_v31 }
 0x1dd   : > { %v6915_v8 = vpop.permute.xlu0 %4706 }
 0x1de   : > { %9749 = vst [vmem:[#allocation89_spill] sm:$0xff] %v6915_v8  ;;  %v4199_v8 = vunpack.i.h.bf16 %v6488_v40  ;;  %v4278_v40 = vunpack.i.l.bf16 %v6594_v58  ;;  %v6966_v58 = vsel %vm199_vm0, %v6404_v18, %v4239_v16  ;;  %v4519_v18 = vunpack.i.h.bf16 %v6796_v22 }
 0x1df   : > { %v4598_v16 = vunpack.i.l.bf16 %v6835_v59 }
 0x1e0   : > { %v1566_v56 = vsel %vm199_vm0, %v6316_v42, %v4199_v8  ;;  %v4438_v8 = vunpack.i.l.bf16 %v6732_v13  ;;  %v9758_v42 = vld [vmem:[#allocation49_spill] sm:$0xff] }
 0x1e1   : > { %v1599_v0 = vsel %vm1597_vm5, %v1566_v56, %v4279_v10  ;;  %v4678_v10 = vunpack.i.l.bf16 %v6896_v32  ;;  %v4209_v56 = vunpack.i.h.bf16 %v6528_v23 }
 0x1e3   : > { %v6920_v38 = vpop.permute.xlu1 %4711 }
 0x1e4   : > { %9750 = vst [vmem:[#allocation90_spill] sm:$0xff] %v6920_v38  ;;  %v9752_v38 = vrot.slane %v5729_v1, 7 }
 0x1e5   : > { %v6922_v26 = vpop.permute.xlu0 %4721 }
 0x1e6   : > { %v562_v7 = vsel %vm559_vm2, %v560_v4, %v9752_v38  ;;  %v4359_v38 = vunpack.i.h.bf16 %v6618_v49 }
 0x1e7   : > { %v1565_v1 = vsel %vm199_vm0, %v562_v7, %v4198_v2  ;;  %v4518_v2 = vunpack.i.l.bf16 %v6796_v22 }
 0x1e8   : > { %v1598_v12 = vsel %vm1597_vm5, %v1565_v1, %v4278_v40  ;;  %v1632_v24 = vsel %vm1630_vm4, %v1599_v0, %v4359_v38  ;;  %v4208_v1 = vunpack.i.l.bf16 %v6528_v23  ;;  %v4204_v38 = vunpack.i.h.bf16 %v6532_v30  ;;  %v6993_v0 = vpop.permute.xlu2 %4746 }
 0x1e9   : > { %9757 = vst [vmem:[#allocation96_spill] sm:$0xff] %v6993_v0 }
 0x1eb   : > { %v6926_v5 = vpop.permute.xlu1 %4726 }
 0x1ed   : > { %v6928_v41 = vpop.permute.xlu0 %4736 }
 0x1ee   : > { %9751 = vst [vmem:[#allocation91_spill] sm:$0xff] %v6928_v41  ;;  %v4238_v41 = vunpack.i.l.bf16 %v6474_v52  ;;  %v4358_v52 = vunpack.i.l.bf16 %v6618_v49  ;;  %v4439_v49 = vunpack.i.h.bf16 %v6732_v13  ;;  %v4679_v13 = vunpack.i.h.bf16 %v6896_v32 }
 0x1f0   : > { %v1581_v6 = vsel %vm199_vm0, %v6397_v25, %v4238_v41  ;;  %v1631_v31 = vsel %vm1630_vm4, %v1598_v12, %v4358_v52  ;;  %v4599_v25 = vunpack.i.h.bf16 %v6835_v59  ;;  %v1665_v22 = vsel %vm1663_vm6, %v1632_v24, %v4439_v49 }
 0x1f1   : > { %v1664_v41 = vsel %vm1663_vm6, %v1631_v31, %v4438_v8  ;;  %v4203_v52 = vunpack.i.l.bf16 %v6532_v30  ;;  %v1698_v59 = vsel %vm1696_vm8, %v1665_v22, %v4519_v18  ;;  %v4283_v49 = vunpack.i.l.bf16 %v9758_v42 }
 0x1f2   : > { %v1697_v40 = vsel %vm1696_vm8, %v1664_v41, %v4518_v2  ;;  %v1731_v32 = vsel %vm1729_vm7, %v1698_v59, %v4599_v25  ;;  %v4284_v18 = vunpack.i.h.bf16 %v9758_v42  ;;  %v9759_v25 = vld [vmem:[#allocation43_spill] sm:$0xff] }
 0x1f3   : > { %v6952_v4 = vpop.permute.xlu1 %4741  ;;  %v1730_v8 = vsel %vm1729_vm7, %v1697_v40, %v4598_v16  ;;  %v1764_v30 = vsel %vm1762_vm9, %v1731_v32, %v4679_v13  ;;  %v9760_v40 = vld [vmem:[#allocation22_spill] sm:$0xff]  ;;  %v9764_v32 = vld [vmem:[#allocation21_spill] sm:$0xff] }
 0x1f4   : > { %9754 = vst [vmem:[#allocation93_spill] sm:$0xff] %v6952_v4  ;;  %v1763_v2 = vsel %vm1762_vm9, %v1730_v8, %v4678_v10  ;;  %v7007_v59 = vsel %vm199_vm0, %v9760_v40, %v4208_v1  ;;  %v9762_v10 = vld [vmem:[#allocation23_spill] sm:$0xff]  ;;  %v9763_v8 = vld [vmem:[#allocation20_spill] sm:$0xff]  ;;  %v4762_v4 = vpop.permute.xlu2 %4761 }
 0x1f5   : > { %v6969_v7 = vpop.permute.xlu0 %4751  ;;  %v7012_v13 = vsel %vm199_vm0, %v9762_v10, %v4209_v56  ;;  %v1567_v42 = vsel %vm199_vm0, %v9763_v8, %v4203_v52  ;;  %v9766_v40 = vld [vmem:[#allocation56_spill] sm:$0xff]  ;;  %v9767_v56 = vld [vmem:[#allocation51_spill] sm:$0xff]  ;;  %v4399_v52 = vunpack.i.h.bf16 %v6700_v29 }
 0x1f6   : > { %9756 = vst [vmem:[#allocation95_spill] sm:$0xff] %v6969_v7  ;;  %v1600_v1 = vsel %vm1597_vm5, %v1567_v42, %v4283_v49  ;;  %v4364_v22 = vunpack.i.h.bf16 %v9766_v40  ;;  %v9768_v8 = vld [vmem:[#allocation4_spill] sm:$0xff]  ;;  %v4523_v49 = vunpack.i.l.bf16 %v6765_v44 }
 0x1fb   : > { %v4757_v12 = vpop.permute.xlu1 %4756 }
 0x1fc   : > { %v4759_v31 = vunpack.i.h.bf16 %v4757_v12  ;;  %v4758_v23 = vunpack.i.l.bf16 %v4757_v12  ;;  %v9761_v12 = vld [vmem:[#allocation10_spill] sm:$0xff] }
 0x1fd   : > { %v6997_v24 = vpop.permute.xlu0 %4766  ;;  %v4319_v7 = vunpack.i.h.bf16 %v9761_v12 }
 0x1fe   : > { %v1796_v16 = vsel %vm1795_vm10, %v1763_v2, %v4758_v23  ;;  %v1797_v41 = vsel %vm1795_vm10, %v1764_v30, %v4759_v31  ;;  %v1568_v31 = vsel %vm199_vm0, %v9764_v32, %v4204_v38  ;;  %v4318_v23 = vunpack.i.l.bf16 %v9761_v12  ;;  %v9765_v2 = vld [vmem:[#allocation47_spill] sm:$0xff]  ;;  %v9769_v30 = vld [vmem:[#allocation14_spill] sm:$0xff] }
 0x1ff   : > { %v1828_v0 = vpack.c.bf16 %v1797_v41, %v1796_v16  ;;  %v4363_v16 = vunpack.i.l.bf16 %v9766_v40  ;;  %v1601_v10 = vsel %vm1597_vm5, %v1568_v31, %v4284_v18  ;;  %v4398_v38 = vunpack.i.l.bf16 %v6700_v29 }
 0x200   : > { %v1615_v42 = vsel %vm1597_vm5, %v6966_v58, %v4319_v7  ;;  %v4444_v18 = vunpack.i.h.bf16 %v6744_v3  ;;  %v4443_v31 = vunpack.i.l.bf16 %v6744_v3  ;;  %v1634_v12 = vsel %vm1630_vm4, %v1601_v10, %v4364_v22 }
 0x201   : > { %4124 = vmatmul.msk.bf16.vlgmr.msra.gmra.mxu0 %vm1864_vm11, %v1828_v0  ;;  %v1614_v0 = vsel %vm1597_vm5, %v1581_v6, %v4318_v23  ;;  %v1633_v29 = vsel %vm1630_vm4, %v1600_v1, %v4363_v16  ;;  %v4524_v32 = vunpack.i.h.bf16 %v6765_v44  ;;  %v1648_v6 = vsel %vm1630_vm4, %v1615_v42, %v4399_v52 }
 0x202   : > { %v1647_v7 = vsel %vm1630_vm4, %v1614_v0, %v4398_v38  ;;  %v4604_v23 = vunpack.i.h.bf16 %v6857_v37  ;;  %v4603_v41 = vunpack.i.l.bf16 %v6857_v37  ;;  %v4479_v3 = vunpack.i.h.bf16 %v6720_v15 }
 0x203   : > { %v7033_v40 = vpop.permute.xlu1 %4771  ;;  %v4478_v1 = vunpack.i.l.bf16 %v6720_v15  ;;  %v4684_v22 = vunpack.i.h.bf16 %v6903_v33  ;;  %v4683_v16 = vunpack.i.l.bf16 %v6903_v33  ;;  %v1666_v44 = vsel %vm1663_vm6, %v1633_v29, %v4443_v31 }
 0x204   : > { %v1667_v10 = vsel %vm1663_vm6, %v1634_v12, %v4444_v18  ;;  %v4763_v38 = vunpack.i.l.bf16 %v4762_v4  ;;  %v1699_v42 = vsel %vm1696_vm8, %v1666_v44, %v4523_v49  ;;  %v4559_v37 = vunpack.i.h.bf16 %v6823_v46  ;;  %v9771_v44 = vld [vmem:[#allocation19_spill] sm:$0xff] }
 0x205   : > { %v7043_v58 = vpop.permute.xlu0 %4781  ;;  %v1700_v52 = vsel %vm1696_vm8, %v1667_v10, %v4524_v32  ;;  %v4558_v0 = vunpack.i.l.bf16 %v6823_v46  ;;  %v1732_v15 = vsel %vm1729_vm7, %v1699_v42, %v4603_v41  ;;  %v4639_v33 = vunpack.i.h.bf16 %v6882_v14 }
 0x206   : > { %9770 = vst [vmem:[#allocation49_spill] sm:$0xff] %v7043_v58  ;;  %v4764_v58 = vunpack.i.h.bf16 %v4762_v4  ;;  %v1733_v55 = vsel %vm1729_vm7, %v1700_v52, %v4604_v23  ;;  %v4638_v31 = vunpack.i.l.bf16 %v6882_v14  ;;  %v4719_v12 = vunpack.i.h.bf16 %v6924_v54 }
 0x207   : > { %v4718_v4 = vunpack.i.l.bf16 %v6924_v54  ;;  %v1765_v32 = vsel %vm1762_vm9, %v1732_v15, %v4683_v16  ;;  %v1766_v49 = vsel %vm1762_vm9, %v1733_v55, %v4684_v22  ;;  %v1681_v18 = vsel %vm1663_vm6, %v1648_v6, %v4479_v3 }
 0x208   : > { %v1680_v46 = vsel %vm1663_vm6, %v1647_v7, %v4478_v1  ;;  %v1798_v41 = vsel %vm1795_vm10, %v1765_v32, %v4763_v38  ;;  %v1799_v29 = vsel %vm1795_vm10, %v1766_v49, %v4764_v58  ;;  %v4323_v23 = vunpack.i.l.bf16 %v9769_v30 }
 0x209   : > { %v4404_v14 = vunpack.i.h.bf16 %v9771_v44  ;;  %v1713_v10 = vsel %vm1696_vm8, %v1680_v46, %v4558_v0  ;;  %v1714_v54 = vsel %vm1696_vm8, %v1681_v18, %v4559_v37  ;;  %v4403_v1 = vunpack.i.l.bf16 %v9771_v44  ;;  %v9775_v46 = vld [vmem:[#allocation33_spill] sm:$0xff] }
 0x20a   : > { %v1746_v55 = vsel %vm1729_vm7, %v1713_v10, %v4638_v31  ;;  %v1747_v6 = vsel %vm1729_vm7, %v1714_v54, %v4639_v33  ;;  %v1829_v58 = vpack.c.bf16 %v1799_v29, %v1798_v41  ;;  %v4369_v42 = vunpack.i.h.bf16 %v6674_v39 }
 0x20b   : > { %v7075_v16 = vpop.permute.xlu1 %4786  ;;  %v1779_v22 = vsel %vm1762_vm9, %v1746_v55, %v4718_v4  ;;  %v1780_v38 = vsel %vm1762_vm9, %v1747_v6, %v4719_v12  ;;  %v4368_v37 = vunpack.i.l.bf16 %v6674_v39  ;;  %v4213_v31 = vunpack.i.l.bf16 %v9765_v2  ;;  %v9773_v12 = vld [vmem:[#allocation34_spill] sm:$0xff] }
 0x20c   : > { %v4449_v33 = vunpack.i.h.bf16 %v6696_v11  ;;  %v4448_v32 = vunpack.i.l.bf16 %v6696_v11  ;;  %v9772_v4 = vunpack.i.h.bf16 %v9767_v56  ;;  %v9774_v39 = vunpack.i.l.bf16 %v9767_v56 }
 0x20d   : > { %v4797_v52 = vpop.permute.xlu0 %4796  ;;  %v4484_v29 = vunpack.i.h.bf16 %v6763_v48  ;;  %v4483_v44 = vunpack.i.l.bf16 %v6763_v48  ;;  %v9776_v10 = vunpack.i.h.bf16 %v9768_v8  ;;  %v9777_v54 = vunpack.i.l.bf16 %v9768_v8 }
 0x20e   : > { %v4799_v7 = vunpack.i.h.bf16 %v4797_v52  ;;  %v4798_v3 = vunpack.i.l.bf16 %v4797_v52  ;;  %v1584_v18 = vsel %vm199_vm0, %v9773_v12, %v9772_v4  ;;  %v1583_v41 = vsel %vm199_vm0, %v9775_v46, %v9774_v39 }
 0x20f   : > { %v1603_v11 = vsel %vm1597_vm5, %v7012_v13, %v9776_v10  ;;  %v1602_v52 = vsel %vm1597_vm5, %v7007_v59, %v9777_v54  ;;  %v1616_v55 = vsel %vm1597_vm5, %v1583_v41, %v4323_v23  ;;  %v9778_v56 = vunpack.i.h.bf16 %v9769_v30 }
 0x210   : > { %v1812_v0 = vsel %vm1795_vm10, %v1779_v22, %v4798_v3  ;;  %v1813_v15 = vsel %vm1795_vm10, %v1780_v38, %v4799_v7  ;;  %v7112_v7 = vpop.permute.xlu2 %4776  ;;  %v1649_v3 = vsel %vm1630_vm4, %v1616_v55, %v4403_v1  ;;  %v1635_v13 = vsel %vm1630_vm4, %v1602_v52, %v4368_v37  ;;  %v9780_v55 = vld [vmem:[#allocation25_spill] sm:$0xff] }
 0x211   : > { %4125 = vmatmul.msk.bf16.gmra.mxu0 %vm1864_vm11, %v1829_v58  ;;  %v1836_v49 = vpack.c.bf16 %v1813_v15, %v1812_v0  ;;  %v1617_v6 = vsel %vm1597_vm5, %v1584_v18, %v9778_v56  ;;  %v1636_v8 = vsel %vm1630_vm4, %v1603_v11, %v4369_v42  ;;  %v1668_v23 = vsel %vm1663_vm6, %v1635_v13, %v4448_v32 }
 0x212   : > { %v1650_v48 = vsel %vm1630_vm4, %v1617_v6, %v4404_v14  ;;  %v1669_v59 = vsel %vm1663_vm6, %v1636_v8, %v4449_v33  ;;  %v4529_v30 = vunpack.i.h.bf16 %v6798_v43  ;;  %v4528_v58 = vunpack.i.l.bf16 %v6798_v43  ;;  %v9781_v6 = vld [vmem:[#allocation53_spill] sm:$0xff] }
 0x213   : > { %4132 = vmatmul.msk.bf16.vlgmr.msra.gmra.mxu2 %vm1864_vm11, %v1836_v49  ;;  %v1682_v22 = vsel %vm1663_vm6, %v1649_v3, %v4483_v44  ;;  %v1683_v38 = vsel %vm1663_vm6, %v1650_v48, %v4484_v29  ;;  %v4609_v14 = vunpack.i.h.bf16 %v6871_v50  ;;  %v4608_v1 = vunpack.i.l.bf16 %v6871_v50  ;;  %v4802_v33 = vpop.permute.xlu1 %4801 }
 0x214   : > { %v4564_v37 = vunpack.i.h.bf16 %v6831_v60  ;;  %v4563_v42 = vunpack.i.l.bf16 %v6831_v60  ;;  %v4689_v0 = vunpack.i.h.bf16 %v6901_v9  ;;  %v4688_v15 = vunpack.i.l.bf16 %v6901_v9 }
 0x215   : > { %v4644_v32 = vunpack.i.h.bf16 %v6878_v45  ;;  %v4643_v43 = vunpack.i.l.bf16 %v6878_v45  ;;  %v4769_v49 = vunpack.i.h.bf16 %v6997_v24  ;;  %v4768_v4 = vunpack.i.l.bf16 %v6997_v24 }
 0x216   : > { %v1701_v12 = vsel %vm1696_vm8, %v1668_v23, %v4528_v58  ;;  %v1702_v50 = vsel %vm1696_vm8, %v1669_v59, %v4529_v30  ;;  %v4724_v18 = vunpack.i.h.bf16 %v6922_v26  ;;  %v4723_v60 = vunpack.i.l.bf16 %v6922_v26  ;;  %v9782_v23 = vld [vmem:[#allocation6_spill] sm:$0xff] }
 0x217   : > { %v1734_v39 = vsel %vm1729_vm7, %v1701_v12, %v4608_v1  ;;  %v1735_v9 = vsel %vm1729_vm7, %v1702_v50, %v4609_v14  ;;  %v4804_v46 = vunpack.i.h.bf16 %v4802_v33  ;;  %v4803_v41 = vunpack.i.l.bf16 %v4802_v33  ;;  %v9783_v14 = vld [vmem:[#allocation9_spill] sm:$0xff] }
 0x218   : > { %v1715_v45 = vsel %vm1696_vm8, %v1682_v22, %v4563_v42  ;;  %v1716_v29 = vsel %vm1696_vm8, %v1683_v38, %v4564_v37  ;;  %v1767_v24 = vsel %vm1762_vm9, %v1734_v39, %v4688_v15  ;;  %v1768_v44 = vsel %vm1762_vm9, %v1735_v9, %v4689_v0  ;;  %v7154_v3 = vpop.permute.xlu2 %4791  ;;  %v9784_v0 = vld [vmem:[#allocation13_spill] sm:$0xff]  ;;  %v9787_v9 = vld [vmem:[#allocation31_spill] sm:$0xff] }
 0x219   : > { %v1748_v10 = vsel %vm1729_vm7, %v1715_v45, %v4643_v43  ;;  %v1749_v11 = vsel %vm1729_vm7, %v1716_v29, %v4644_v32  ;;  %v1800_v26 = vsel %vm1795_vm10, %v1767_v24, %v4768_v4  ;;  %v1801_v54 = vsel %vm1795_vm10, %v1768_v44, %v4769_v49  ;;  %v9785_v49 = vld [vmem:[#allocation24_spill] sm:$0xff] }
 0x21a   : > { %v9779_v52 = vunpack.i.h.bf16 %v9765_v2  ;;  %v4249_v48 = vunpack.i.h.bf16 %v9781_v6  ;;  %v1781_v13 = vsel %vm1762_vm9, %v1748_v10, %v4723_v60  ;;  %v1782_v8 = vsel %vm1762_vm9, %v1749_v11, %v4724_v18  ;;  %v9786_v60 = vld [vmem:[#allocation32_spill] sm:$0xff] }
 0x21b   : > { %v4248_v59 = vunpack.i.l.bf16 %v9781_v6  ;;  %v4329_v30 = vunpack.i.h.bf16 %v9782_v23  ;;  %v1814_v58 = vsel %vm1795_vm10, %v1781_v13, %v4803_v41  ;;  %v1815_v22 = vsel %vm1795_vm10, %v1782_v8, %v4804_v46 }
 0x21c   : > { %v1572_v56 = vsel %vm199_vm0, %v9780_v55, %v9779_v52  ;;  %v4328_v38 = vunpack.i.l.bf16 %v9782_v23  ;;  %v4294_v1 = vunpack.i.h.bf16 %v9783_v14  ;;  %v4293_v37 = vunpack.i.l.bf16 %v9783_v14 }
 0x21d   : > { %v1830_v42 = vpack.c.bf16 %v1801_v54, %v1800_v26  ;;  %v4374_v15 = vunpack.i.h.bf16 %v9784_v0  ;;  %v4373_v33 = vunpack.i.l.bf16 %v9784_v0  ;;  %v4409_v32 = vunpack.i.h.bf16 %v6702_v53 }
 0x21e   : > { %v4408_v43 = vunpack.i.l.bf16 %v6702_v53  ;;  %v1571_v4 = vsel %vm199_vm0, %v9785_v49, %v4213_v31  ;;  %v4454_v12 = vunpack.i.h.bf16 %v6746_v20  ;;  %v4453_v50 = vunpack.i.l.bf16 %v6746_v20 }
 0x21f   : > { %v1837_v18 = vpack.c.bf16 %v1815_v22, %v1814_v58  ;;  %v1586_v39 = vsel %vm199_vm0, %v9786_v60, %v4249_v48  ;;  %v1585_v46 = vsel %vm199_vm0, %v9787_v9, %v4248_v59  ;;  %v4489_v53 = vunpack.i.h.bf16 %v6772_v63  ;;  %v9791_v9 = vld [vmem:[#allocation36_spill] sm:$0xff] }
 0x220   : > { %v4488_v2 = vunpack.i.l.bf16 %v6772_v63  ;;  %v1619_v41 = vsel %vm1597_vm5, %v1586_v39, %v4329_v30  ;;  %v1618_v31 = vsel %vm1597_vm5, %v1585_v46, %v4328_v38  ;;  %v1604_v45 = vsel %vm1597_vm5, %v1571_v4, %v4293_v37  ;;  %v4807_v23 = vpop.permute.xlu2 %4806  ;;  %v9789_v4 = vld [vmem:[#allocation26_spill] sm:$0xff] }
 0x221   : > { %4126 = vmatmul.msk.bf16.gmra.mxu0 %vm1864_vm11, %v1830_v42  ;;  %v1605_v20 = vsel %vm1597_vm5, %v1572_v56, %v4294_v1  ;;  %v1637_v24 = vsel %vm1630_vm4, %v1604_v45, %v4373_v33  ;;  %v1651_v44 = vsel %vm1630_vm4, %v1618_v31, %v4408_v43  ;;  %v1652_v10 = vsel %vm1630_vm4, %v1619_v41, %v4409_v32  ;;  %v9793_v45 = vld [vmem:[#allocation12_spill] sm:$0xff] }
 0x222   : > { %v1638_v29 = vsel %vm1630_vm4, %v1605_v20, %v4374_v15  ;;  %v1670_v63 = vsel %vm1663_vm6, %v1637_v24, %v4453_v50  ;;  %v4534_v26 = vunpack.i.h.bf16 %v6809_v62  ;;  %v4533_v54 = vunpack.i.l.bf16 %v6809_v62 }
 0x223   : > { %4133 = vmatmul.msk.bf16.gmra.mxu2 %vm1864_vm11, %v1837_v18  ;;  %v1671_v11 = vsel %vm1663_vm6, %v1638_v29, %v4454_v12  ;;  %v1684_v52 = vsel %vm1663_vm6, %v1651_v44, %v4488_v2  ;;  %v1685_v55 = vsel %vm1663_vm6, %v1652_v10, %v4489_v53  ;;  %v4614_v56 = vunpack.i.h.bf16 %v6849_v28  ;;  %v9792_v53 = vld [vmem:[#allocation52_spill] sm:$0xff]  ;;  %v9794_v44 = vld [vmem:[#allocation58_spill] sm:$0xff] }
 0x224   : > { %v4613_v6 = vunpack.i.l.bf16 %v6849_v28  ;;  %v4569_v48 = vunpack.i.h.bf16 %v6806_v57  ;;  %v4568_v13 = vunpack.i.l.bf16 %v6806_v57  ;;  %v4694_v8 = vunpack.i.h.bf16 %v6905_v35 }
 0x225   : > { %v4693_v59 = vunpack.i.l.bf16 %v6905_v35  ;;  %v4649_v30 = vunpack.i.h.bf16 %v6884_v19  ;;  %v4648_v62 = vunpack.i.l.bf16 %v6884_v19  ;;  %v4774_v58 = vunpack.i.h.bf16 %v7033_v40 }
 0x226   : > { %v4773_v22 = vunpack.i.l.bf16 %v7033_v40  ;;  %v1703_v38 = vsel %vm1696_vm8, %v1670_v63, %v4533_v54  ;;  %v1704_v28 = vsel %vm1696_vm8, %v1671_v11, %v4534_v26  ;;  %v4729_v14 = vunpack.i.h.bf16 %v6926_v5  ;;  %v9795_v63 = vld [vmem:[#allocation63_spill] sm:$0xff] }
 0x227   : > { %v4728_v57 = vunpack.i.l.bf16 %v6926_v5  ;;  %v1736_v1 = vsel %vm1729_vm7, %v1703_v38, %v4613_v6  ;;  %v1737_v35 = vsel %vm1729_vm7, %v1704_v28, %v4614_v56  ;;  %v4809_v37 = vunpack.i.h.bf16 %v4807_v23  ;;  %v9796_v54 = vld [vmem:[#allocation35_spill] sm:$0xff] }
 0x228   : > { %v4808_v42 = vunpack.i.l.bf16 %v4807_v23  ;;  %v1718_v19 = vsel %vm1696_vm8, %v1685_v55, %v4569_v48  ;;  %v1717_v0 = vsel %vm1696_vm8, %v1684_v52, %v4568_v13  ;;  %v1769_v40 = vsel %vm1762_vm9, %v1736_v1, %v4693_v59  ;;  %v9797_v55 = vld [vmem:[#allocation66_spill] sm:$0xff] }
 0x229   : > { %v1770_v15 = vsel %vm1762_vm9, %v1737_v35, %v4694_v8  ;;  %v1750_v33 = vsel %vm1729_vm7, %v1717_v0, %v4648_v62  ;;  %v1751_v32 = vsel %vm1729_vm7, %v1718_v19, %v4649_v30  ;;  %v1802_v5 = vsel %vm1795_vm10, %v1769_v40, %v4773_v22  ;;  %v9798_v13 = vld [vmem:[#allocation46_spill] sm:$0xff] }
 0x22a   : > { %v1803_v43 = vsel %vm1795_vm10, %v1770_v15, %v4774_v58  ;;  %v9788_v49 = vunpack.i.l.bf16 %v6430_v36  ;;  %v4253_v50 = vunpack.i.l.bf16 %v9759_v25  ;;  %v1783_v18 = vsel %vm1762_vm9, %v1750_v33, %v4728_v57 }
 0x22b   : > { %v1784_v60 = vsel %vm1762_vm9, %v1751_v32, %v4729_v14  ;;  %v9790_v39 = vunpack.i.h.bf16 %v9759_v25  ;;  %v4299_v2 = vunpack.i.h.bf16 %v9792_v53  ;;  %v1816_v41 = vsel %vm1795_vm10, %v1783_v18, %v4808_v42 }
 0x22c   : > { %v7225_v12 = vsel %vm199_vm0, %v9789_v4, %v9788_v49  ;;  %v1817_v36 = vsel %vm1795_vm10, %v1784_v60, %v4809_v37  ;;  %v4298_v31 = vunpack.i.l.bf16 %v9792_v53  ;;  %v4334_v20 = vunpack.i.h.bf16 %v9793_v45  ;;  %v9800_v60 = vld [vmem:[#allocation92_spill] sm:$0xff] }
 0x22d   : > { %v1588_v46 = vsel %vm199_vm0, %v9791_v9, %v9790_v39  ;;  %v4333_v29 = vunpack.i.l.bf16 %v9793_v45  ;;  %v1831_v24 = vpack.c.bf16 %v1803_v43, %v1802_v5  ;;  %v4379_v10 = vunpack.i.h.bf16 %v9794_v44  ;;  %v4812_v5 = vpop.permute.xlu0 %4811  ;;  %v9799_v43 = vld [vmem:[#allocation84_spill] sm:$0xff] }
 0x22e   : > { %v4378_v25 = vunpack.i.l.bf16 %v9794_v44  ;;  %v4414_v11 = vunpack.i.h.bf16 %v9795_v63  ;;  %v4413_v26 = vunpack.i.l.bf16 %v9795_v63  ;;  %v1587_v52 = vsel %vm199_vm0, %v9796_v54, %v4253_v50  ;;  %v9803_v54 = vld [vmem:[#allocation7_spill] sm:$0xff] }
 0x22f   : > { %v4494_v56 = vunpack.i.h.bf16 %v9797_v55  ;;  %v4493_v6 = vunpack.i.l.bf16 %v9797_v55  ;;  %v1838_v48 = vpack.c.bf16 %v1817_v36, %v1816_v41  ;;  %v4269_v8 = vunpack.i.h.bf16 %v9798_v13 }
 0x230   : > { %v4268_v59 = vunpack.i.l.bf16 %v9798_v13  ;;  %v4459_v23 = vunpack.i.h.bf16 %v6752_v27  ;;  %v4458_v30 = vunpack.i.l.bf16 %v6752_v27  ;;  %v1607_v62 = vsel %vm1597_vm5, %v6956_v51, %v4299_v2 }
 0x231   : > { %4127 = vmatmul.msk.bf16.gmra.mxu0 %vm1864_vm11, %v1831_v24  ;;  %v1606_v58 = vsel %vm1597_vm5, %v6947_v17, %v4298_v31  ;;  %v1621_v22 = vsel %vm1597_vm5, %v1588_v46, %v4334_v20  ;;  %v1620_v38 = vsel %vm1597_vm5, %v1587_v52, %v4333_v29  ;;  %v1640_v14 = vsel %vm1630_vm4, %v1607_v62, %v4379_v10  ;;  %v9801_v24 = vld [vmem:[#allocation48_spill] sm:$0xff]  ;;  %v9802_v10 = vld [vmem:[#allocation54_spill] sm:$0xff] }
 0x232   : > { %v1639_v28 = vsel %vm1630_vm4, %v1606_v58, %v4378_v25  ;;  %v1653_v57 = vsel %vm1630_vm4, %v1620_v38, %v4413_v26  ;;  %v1654_v27 = vsel %vm1630_vm4, %v1621_v22, %v4414_v11  ;;  %v4539_v17 = vunpack.i.h.bf16 %v6776_v21  ;;  %v9805_v58 = vld [vmem:[#allocation57_spill] sm:$0xff] }
 0x233   : > { %4134 = vmatmul.msk.bf16.gmra.mxu2 %vm1864_vm11, %v1838_v48  ;;  %v1687_v1 = vsel %vm1663_vm6, %v1654_v27, %v4494_v56  ;;  %v1686_v51 = vsel %vm1663_vm6, %v1653_v57, %v4493_v6  ;;  %v4538_v35 = vunpack.i.l.bf16 %v6776_v21  ;;  %v1672_v37 = vsel %vm1663_vm6, %v1639_v28, %v4458_v30  ;;  %v9804_v48 = vld [vmem:[#allocation17_spill] sm:$0xff]  ;;  %v9806_v28 = vld [vmem:[#allocation60_spill] sm:$0xff] }
 0x234   : > { %v1673_v42 = vsel %vm1663_vm6, %v1640_v14, %v4459_v23  ;;  %v4619_v19 = vunpack.i.h.bf16 %v6873_v47  ;;  %v4618_v0 = vunpack.i.l.bf16 %v6873_v47  ;;  %v4574_v40 = vunpack.i.h.bf16 %v6833_v61 }
 0x235   : > { %v4573_v15 = vunpack.i.l.bf16 %v6833_v61  ;;  %v4699_v33 = vunpack.i.h.bf16 %v6911_v34  ;;  %v4698_v32 = vunpack.i.l.bf16 %v6911_v34  ;;  %v4654_v49 = vunpack.i.h.bf16 %v9799_v43 }
 0x236   : > { %v4653_v21 = vunpack.i.l.bf16 %v9799_v43  ;;  %v4779_v4 = vunpack.i.h.bf16 %v7112_v7  ;;  %v4778_v50 = vunpack.i.l.bf16 %v7112_v7  ;;  %v1706_v18 = vsel %vm1696_vm8, %v1673_v42, %v4539_v17 }
 0x237   : > { %v1705_v47 = vsel %vm1696_vm8, %v1672_v37, %v4538_v35  ;;  %v4734_v39 = vunpack.i.h.bf16 %v9800_v60  ;;  %v4733_v61 = vunpack.i.l.bf16 %v9800_v60  ;;  %v1739_v34 = vsel %vm1729_vm7, %v1706_v18, %v4619_v19  ;;  %v9808_v37 = vld [vmem:[#allocation40_spill] sm:$0xff]  ;;  %v9809_v19 = vld [vmem:[#allocation39_spill] sm:$0xff] }
 0x238   : > { %v1738_v9 = vsel %vm1729_vm7, %v1705_v47, %v4618_v0  ;;  %v4814_v46 = vunpack.i.h.bf16 %v4812_v5  ;;  %v4813_v53 = vunpack.i.l.bf16 %v4812_v5  ;;  %v1719_v2 = vsel %vm1696_vm8, %v1686_v51, %v4573_v15 }
 0x239   : > { %v1720_v41 = vsel %vm1696_vm8, %v1687_v1, %v4574_v40  ;;  %v1771_v7 = vsel %vm1762_vm9, %v1738_v9, %v4698_v32  ;;  %v1772_v36 = vsel %vm1762_vm9, %v1739_v34, %v4699_v33  ;;  %v1752_v31 = vsel %vm1729_vm7, %v1719_v2, %v4653_v21  ;;  %v9807_v1 = vld [vmem:[#allocation62_spill] sm:$0xff] }
 0x23a   : > { %v1753_v45 = vsel %vm1729_vm7, %v1720_v41, %v4654_v49  ;;  %v1804_v20 = vsel %vm1795_vm10, %v1771_v7, %v4778_v50  ;;  %v1805_v29 = vsel %vm1795_vm10, %v1772_v36, %v4779_v4  ;;  %v4229_v44 = vunpack.i.h.bf16 %v9801_v24  ;;  %v9810_v40 = vld [vmem:[#allocation70_spill] sm:$0xff]  ;;  %v9814_v7 = vld [vmem:[#allocation77_spill] sm:$0xff] }
 0x23b   : > { %v4259_v25 = vunpack.i.h.bf16 %v9802_v10  ;;  %v1785_v63 = vsel %vm1762_vm9, %v1752_v31, %v4733_v61  ;;  %v1786_v11 = vsel %vm1762_vm9, %v1753_v45, %v4734_v39  ;;  %v4258_v26 = vunpack.i.l.bf16 %v9802_v10  ;;  %v9811_v32 = vld [vmem:[#allocation94_spill] sm:$0xff]  ;;  %v9815_v45 = vld [vmem:[#allocation88_spill] sm:$0xff]  ;;  %v4817_v10 = vpop.permute.xlu1 %4816 }
 0x23c   : > { %v4304_v52 = vunpack.i.h.bf16 %v9803_v54  ;;  %v1818_v55 = vsel %vm1795_vm10, %v1785_v63, %v4813_v53  ;;  %v1819_v56 = vsel %vm1795_vm10, %v1786_v11, %v4814_v46  ;;  %v4303_v6 = vunpack.i.l.bf16 %v9803_v54  ;;  %v9812_v61 = vld [vmem:[#allocation74_spill] sm:$0xff]  ;;  %v9813_v53 = vld [vmem:[#allocation81_spill] sm:$0xff] }
 0x23d   : > { %v4339_v23 = vunpack.i.h.bf16 %v9804_v48  ;;  %v4338_v30 = vunpack.i.l.bf16 %v9804_v48  ;;  %v1832_v62 = vpack.c.bf16 %v1805_v29, %v1804_v20  ;;  %v4419_v22 = vunpack.i.h.bf16 %v9805_v58 }
 0x23e   : > { %v4418_v38 = vunpack.i.l.bf16 %v9805_v58  ;;  %v4384_v14 = vunpack.i.h.bf16 %v9806_v28  ;;  %v4383_v57 = vunpack.i.l.bf16 %v9806_v28  ;;  %v4228_v27 = vunpack.i.l.bf16 %v9801_v24 }
 0x23f   : > { %v4464_v51 = vunpack.i.h.bf16 %v9807_v1  ;;  %v4463_v17 = vunpack.i.l.bf16 %v9807_v1  ;;  %v1839_v35 = vpack.c.bf16 %v1819_v56, %v1818_v55  ;;  %v1590_v42 = vsel %vm199_vm0, %v9808_v37, %v4259_v25  ;;  %v9816_v25 = vld [vmem:[#allocation83_spill] sm:$0xff]  ;;  %v9819_v37 = vld [vmem:[#allocation30_spill] sm:$0xff] }
 0x240   : > { %v1589_v0 = vsel %vm199_vm0, %v9809_v19, %v4258_v26  ;;  %v4499_v15 = vunpack.i.h.bf16 %v9810_v40  ;;  %v4498_v33 = vunpack.i.l.bf16 %v9810_v40  ;;  %v1609_v5 = vsel %vm1597_vm5, %v9811_v32, %v4304_v52  ;;  %v9817_v26 = vld [vmem:[#allocation49_spill] sm:$0xff]  ;;  %v9821_v32 = vld [vmem:[#allocation8_spill] sm:$0xff] }
 0x241   : > { %4128 = vmatmul.msk.bf16.gmra.mxu0 %vm1864_vm11, %v1832_v62  ;;  %v1608_v43 = vsel %vm1597_vm5, %v7225_v12, %v4303_v6  ;;  %v1622_v49 = vsel %vm1597_vm5, %v1589_v0, %v4338_v30  ;;  %v1623_v21 = vsel %vm1597_vm5, %v1590_v42, %v4339_v23  ;;  %v1642_v47 = vsel %vm1630_vm4, %v1609_v5, %v4384_v14  ;;  %v9818_v6 = vld [vmem:[#allocation91_spill] sm:$0xff]  ;;  %v9820_v19 = vld [vmem:[#allocation5_spill] sm:$0xff] }
 0x242   : > { %v1656_v4 = vsel %vm1630_vm4, %v1623_v21, %v4419_v22  ;;  %v1655_v50 = vsel %vm1630_vm4, %v1622_v49, %v4418_v38  ;;  %v1641_v18 = vsel %vm1630_vm4, %v1608_v43, %v4383_v57  ;;  %v1675_v60 = vsel %vm1663_vm6, %v1642_v47, %v4464_v51  ;;  %v9823_v47 = vld [vmem:[#allocation16_spill] sm:$0xff] }
 0x243   : > { %4135 = vmatmul.msk.bf16.gmra.mxu2 %vm1864_vm11, %v1839_v35  ;;  %v1674_v39 = vsel %vm1663_vm6, %v1641_v18, %v4463_v17  ;;  %v4544_v12 = vunpack.i.h.bf16 %v9812_v61  ;;  %v4543_v9 = vunpack.i.l.bf16 %v9812_v61  ;;  %v1688_v34 = vsel %vm1663_vm6, %v1655_v50, %v4498_v33  ;;  %v9824_v61 = vld [vmem:[#allocation64_spill] sm:$0xff] }
 0x244   : > { %v1689_v46 = vsel %vm1663_vm6, %v1656_v4, %v4499_v15  ;;  %v4624_v2 = vunpack.i.h.bf16 %v9813_v53  ;;  %v4623_v41 = vunpack.i.l.bf16 %v9813_v53  ;;  %v4579_v36 = vunpack.i.h.bf16 %v9814_v7  ;;  %v9822_v4 = vld [vmem:[#allocation11_spill] sm:$0xff]  ;;  %v9826_v53 = vld [vmem:[#allocation68_spill] sm:$0xff] }
 0x245   : > { %v4578_v31 = vunpack.i.l.bf16 %v9814_v7  ;;  %v4704_v20 = vunpack.i.h.bf16 %v9815_v45  ;;  %v4703_v29 = vunpack.i.l.bf16 %v9815_v45  ;;  %v4659_v63 = vunpack.i.h.bf16 %v9816_v25  ;;  %v9828_v45 = vld [vmem:[#allocation37_spill] sm:$0xff] }
 0x246   : > { %v4658_v11 = vunpack.i.l.bf16 %v9816_v25  ;;  %v4784_v54 = vunpack.i.h.bf16 %v9817_v26  ;;  %v4783_v52 = vunpack.i.l.bf16 %v9817_v26  ;;  %v1707_v55 = vsel %vm1696_vm8, %v1674_v39, %v4543_v9 }
 0x247   : > { %v1708_v56 = vsel %vm1696_vm8, %v1675_v60, %v4544_v12  ;;  %v4739_v48 = vunpack.i.h.bf16 %v9818_v6  ;;  %v4738_v23 = vunpack.i.l.bf16 %v9818_v6  ;;  %v1740_v30 = vsel %vm1729_vm7, %v1707_v55, %v4623_v41 }
 0x248   : > { %v1741_v62 = vsel %vm1729_vm7, %v1708_v56, %v4624_v2  ;;  %v4819_v58 = vunpack.i.h.bf16 %v4817_v10  ;;  %v4818_v22 = vunpack.i.l.bf16 %v4817_v10  ;;  %v1721_v38 = vsel %vm1696_vm8, %v1688_v34, %v4578_v31  ;;  %v9825_v34 = vld [vmem:[#allocation29_spill] sm:$0xff] }
 0x249   : > { %v1722_v28 = vsel %vm1696_vm8, %v1689_v46, %v4579_v36  ;;  %v1773_v14 = vsel %vm1762_vm9, %v1740_v30, %v4703_v29  ;;  %v1774_v57 = vsel %vm1762_vm9, %v1741_v62, %v4704_v20  ;;  %v1754_v1 = vsel %vm1729_vm7, %v1721_v38, %v4658_v11  ;;  %v9827_v36 = vld [vmem:[#allocation38_spill] sm:$0xff]  ;;  %v9829_v29 = vld [vmem:[#allocation71_spill] sm:$0xff] }
 0x24a   : > { %v1755_v51 = vsel %vm1729_vm7, %v1722_v28, %v4659_v63  ;;  %v1806_v17 = vsel %vm1795_vm10, %v1773_v14, %v4783_v52  ;;  %v1807_v35 = vsel %vm1795_vm10, %v1774_v57, %v4784_v54  ;;  %v1578_v42 = vsel %vm199_vm0, %v9819_v37, %v4229_v44  ;;  %v9832_v14 = vld [vmem:[#allocation76_spill] sm:$0xff]  ;;  %v4822_v37 = vpop.permute.xlu2 %4821 }
 0x24b   : > { %v4264_v0 = vunpack.i.h.bf16 %v9820_v19  ;;  %v1787_v40 = vsel %vm1762_vm9, %v1754_v1, %v4738_v23  ;;  %v1788_v15 = vsel %vm1762_vm9, %v1755_v51, %v4739_v48  ;;  %v4263_v33 = vunpack.i.l.bf16 %v9820_v19  ;;  %v9830_v48 = vld [vmem:[#allocation75_spill] sm:$0xff]  ;;  %v9833_v51 = vld [vmem:[#allocation89_spill] sm:$0xff] }
 0x24c   : > { %v4344_v5 = vunpack.i.h.bf16 %v9821_v32  ;;  %v1820_v43 = vsel %vm1795_vm10, %v1787_v40, %v4818_v22  ;;  %v1821_v49 = vsel %vm1795_vm10, %v1788_v15, %v4819_v58  ;;  %v4343_v21 = vunpack.i.l.bf16 %v9821_v32  ;;  %v9831_v22 = vld [vmem:[#allocation80_spill] sm:$0xff] }
 0x24d   : > { %v4309_v50 = vunpack.i.h.bf16 %v9822_v4  ;;  %v4308_v44 = vunpack.i.l.bf16 %v9822_v4  ;;  %v1833_v18 = vpack.c.bf16 %v1807_v35, %v1806_v17  ;;  %v4389_v60 = vunpack.i.h.bf16 %v9823_v47 }
 0x24e   : > { %v4388_v39 = vunpack.i.l.bf16 %v9823_v47  ;;  %v4424_v12 = vunpack.i.h.bf16 %v9824_v61  ;;  %v4423_v9 = vunpack.i.l.bf16 %v9824_v61  ;;  %v1577_v46 = vsel %vm199_vm0, %v9825_v34, %v4228_v27  ;;  %v9836_v34 = vld [vmem:[#allocation42_spill] sm:$0xff] }
 0x24f   : > { %v4469_v2 = vunpack.i.h.bf16 %v9826_v53  ;;  %v4468_v41 = vunpack.i.l.bf16 %v9826_v53  ;;  %v1840_v7 = vpack.c.bf16 %v1821_v49, %v1820_v43  ;;  %v1592_v31 = vsel %vm199_vm0, %v9827_v36, %v4264_v0  ;;  %v9837_v53 = vld [vmem:[#allocation50_spill] sm:$0xff] }
 0x250   : > { %v1591_v20 = vsel %vm199_vm0, %v9828_v45, %v4263_v33  ;;  %v4504_v10 = vunpack.i.h.bf16 %v9829_v29  ;;  %v4503_v24 = vunpack.i.l.bf16 %v9829_v29  ;;  %v1625_v25 = vsel %vm1597_vm5, %v1592_v31, %v4344_v5  ;;  %v9835_v5 = vld [vmem:[#allocation93_spill] sm:$0xff]  ;;  %v9838_v31 = vld [vmem:[#allocation3_spill] sm:$0xff] }
 0x251   : > { %4129 = vmatmul.msk.bf16.gmra.mxu0 %vm1864_vm11, %v1833_v18  ;;  %v1624_v27 = vsel %vm1597_vm5, %v1591_v20, %v4343_v21  ;;  %v1610_v63 = vsel %vm1597_vm5, %v1577_v46, %v4308_v44  ;;  %v1611_v11 = vsel %vm1597_vm5, %v1578_v42, %v4309_v50  ;;  %v1658_v55 = vsel %vm1630_vm4, %v1625_v25, %v4424_v12  ;;  %v9834_v42 = vld [vmem:[#allocation85_spill] sm:$0xff] }
 0x252   : > { %v1644_v26 = vsel %vm1630_vm4, %v1611_v11, %v4389_v60  ;;  %v1643_v54 = vsel %vm1630_vm4, %v1610_v63, %v4388_v39  ;;  %v1657_v52 = vsel %vm1630_vm4, %v1624_v27, %v4423_v9  ;;  %v4549_v23 = vunpack.i.h.bf16 %v9830_v48  ;;  %v9840_v63 = vld [vmem:[#allocation61_spill] sm:$0xff] }
 0x253   : > { %4136 = vmatmul.msk.bf16.gmra.mxu2 %vm1864_vm11, %v1840_v7  ;;  %v1676_v56 = vsel %vm1663_vm6, %v1643_v54, %v4468_v41  ;;  %v1677_v6 = vsel %vm1663_vm6, %v1644_v26, %v4469_v2  ;;  %v4548_v30 = vunpack.i.l.bf16 %v9830_v48  ;;  %v1690_v62 = vsel %vm1663_vm6, %v1657_v52, %v4503_v24  ;;  %v9839_v24 = vld [vmem:[#allocation15_spill] sm:$0xff]  ;;  %v9841_v54 = vld [vmem:[#allocation65_spill] sm:$0xff] }
 0x254   : > { %v1691_v58 = vsel %vm1663_vm6, %v1658_v55, %v4504_v10  ;;  %v4629_v38 = vunpack.i.h.bf16 %v9831_v22  ;;  %v4628_v28 = vunpack.i.l.bf16 %v9831_v22  ;;  %v4584_v57 = vunpack.i.h.bf16 %v9832_v14  ;;  %v9843_v48 = vld [vmem:[#allocation67_spill] sm:$0xff] }
 0x255   : > { %v4583_v1 = vunpack.i.l.bf16 %v9832_v14  ;;  %v4709_v17 = vunpack.i.h.bf16 %v9833_v51  ;;  %v4708_v35 = vunpack.i.l.bf16 %v9833_v51  ;;  %v4664_v19 = vunpack.i.h.bf16 %v9834_v42  ;;  %v9846_v14 = vld [vmem:[#allocation69_spill] sm:$0xff] }
 0x256   : > { %v4663_v0 = vunpack.i.l.bf16 %v9834_v42  ;;  %v4789_v40 = vunpack.i.h.bf16 %v7075_v16  ;;  %v4788_v15 = vunpack.i.l.bf16 %v7075_v16  ;;  %v1709_v33 = vsel %vm1696_vm8, %v1676_v56, %v4548_v30  ;;  %v9842_v56 = vld [vmem:[#allocation41_spill] sm:$0xff] }
 0x257   : > { %v1710_v32 = vsel %vm1696_vm8, %v1677_v6, %v4549_v23  ;;  %v4744_v43 = vunpack.i.h.bf16 %v9835_v5  ;;  %v4743_v49 = vunpack.i.l.bf16 %v9835_v5  ;;  %v1742_v21 = vsel %vm1729_vm7, %v1709_v33, %v4628_v28 }
 0x258   : > { %v1743_v4 = vsel %vm1729_vm7, %v1710_v32, %v4629_v38  ;;  %v4824_v50 = vunpack.i.h.bf16 %v4822_v37  ;;  %v4823_v44 = vunpack.i.l.bf16 %v4822_v37  ;;  %v1724_v18 = vsel %vm1696_vm8, %v1691_v58, %v4584_v57  ;;  %v9844_v58 = vld [vmem:[#allocation28_spill] sm:$0xff]  ;;  %v9845_v38 = vld [vmem:[#allocation27_spill] sm:$0xff] }
 0x259   : > { %v1723_v47 = vsel %vm1696_vm8, %v1690_v62, %v4583_v1  ;;  %v1775_v16 = vsel %vm1762_vm9, %v1742_v21, %v4708_v35  ;;  %v1776_v60 = vsel %vm1762_vm9, %v1743_v4, %v4709_v17  ;;  %v1757_v61 = vsel %vm1729_vm7, %v1724_v18, %v4664_v19 }
 0x25a   : > { %v1756_v39 = vsel %vm1729_vm7, %v1723_v47, %v4663_v0  ;;  %v1808_v12 = vsel %vm1795_vm10, %v1775_v16, %v4788_v15  ;;  %v1809_v9 = vsel %vm1795_vm10, %v1776_v60, %v4789_v40  ;;  %v1594_v46 = vsel %vm199_vm0, %v9836_v34, %v4269_v8  ;;  %v9847_v15 = vld [vmem:[#allocation73_spill] sm:$0xff]  ;;  %v9850_v47 = vld [vmem:[#allocation90_spill] sm:$0xff] }
 0x25b   : > { %v4234_v2 = vunpack.i.h.bf16 %v9837_v53  ;;  %v1789_v41 = vsel %vm1762_vm9, %v1756_v39, %v4743_v49  ;;  %v1790_v7 = vsel %vm1762_vm9, %v1757_v61, %v4744_v43  ;;  %v4233_v36 = vunpack.i.l.bf16 %v9837_v53  ;;  %v9848_v49 = vld [vmem:[#allocation82_spill] sm:$0xff]  ;;  %v4827_v39 = vpop.permute.xlu0 %4826  ;;  %v9851_v61 = vld [vmem:[#allocation87_spill] sm:$0xff] }
 0x25c   : > { %v4314_v45 = vunpack.i.h.bf16 %v9838_v31  ;;  %v1822_v20 = vsel %vm1795_vm10, %v1789_v41, %v4823_v44  ;;  %v1823_v29 = vsel %vm1795_vm10, %v1790_v7, %v4824_v50  ;;  %v4313_v10 = vunpack.i.l.bf16 %v9838_v31  ;;  %v9849_v50 = vld [vmem:[#allocation78_spill] sm:$0xff]  ;;  %v9852_v41 = vld [vmem:[#allocation96_spill] sm:$0xff] }
 0x25d   : > { %v4349_v25 = vunpack.i.h.bf16 %v9839_v24  ;;  %v4348_v8 = vunpack.i.l.bf16 %v9839_v24  ;;  %v1834_v27 = vpack.c.bf16 %v1809_v9, %v1808_v12  ;;  %v4394_v11 = vunpack.i.h.bf16 %v9840_v63 }
 0x25e   : > { %v4393_v26 = vunpack.i.l.bf16 %v9840_v63  ;;  %v4429_v52 = vunpack.i.h.bf16 %v9841_v54  ;;  %v4428_v55 = vunpack.i.l.bf16 %v9841_v54  ;;  %v1593_v6 = vsel %vm199_vm0, %v9842_v56, %v4268_v59 }
 0x25f   : > { %v4509_v23 = vunpack.i.h.bf16 %v9843_v48  ;;  %v4508_v30 = vunpack.i.l.bf16 %v9843_v48  ;;  %v1841_v62 = vpack.c.bf16 %v1823_v29, %v1822_v20  ;;  %v1580_v22 = vsel %vm199_vm0, %v9844_v58, %v4234_v2  ;;  %v9853_v48 = vld [vmem:[#allocation55_spill] sm:$0xff] }
 0x260   : > { %v1579_v28 = vsel %vm199_vm0, %v9845_v38, %v4233_v36  ;;  %v4474_v57 = vunpack.i.h.bf16 %v9846_v14  ;;  %v4473_v13 = vunpack.i.l.bf16 %v9846_v14  ;;  %v1613_v1 = vsel %vm1597_vm5, %v1580_v22, %v4314_v45  ;;  %v9855_v38 = vld [vmem:[#allocation59_spill] sm:$0xff] }
 0x261   : > { %4130 = vmatmul.msk.bf16.gmra.mxu0 %vm1864_vm11, %v1834_v27  ;;  %v1612_v59 = vsel %vm1597_vm5, %v1579_v28, %v4313_v10  ;;  %v1627_v51 = vsel %vm1597_vm5, %v1594_v46, %v4349_v25  ;;  %v1626_v17 = vsel %vm1597_vm5, %v1593_v6, %v4348_v8  ;;  %v1646_v37 = vsel %vm1630_vm4, %v1613_v1, %v4394_v11 }
 0x262   : > { %v1645_v35 = vsel %vm1630_vm4, %v1612_v59, %v4393_v26  ;;  %v1659_v42 = vsel %vm1630_vm4, %v1626_v17, %v4428_v55  ;;  %v1660_v19 = vsel %vm1630_vm4, %v1627_v51, %v4429_v52  ;;  %v4554_v33 = vunpack.i.h.bf16 %v9847_v15  ;;  %v9857_v59 = vld [vmem:[#allocation45_spill] sm:$0xff]  ;;  %v9858_v17 = vld [vmem:[#allocation44_spill] sm:$0xff] }
 0x263   : > { %4137 = vmatmul.msk.bf16.gmra.mxu2 %vm1864_vm11, %v1841_v62  ;;  %v1693_v0 = vsel %vm1663_vm6, %v1660_v19, %v4509_v23  ;;  %v1692_v40 = vsel %vm1663_vm6, %v1659_v42, %v4508_v30  ;;  %v4553_v32 = vunpack.i.l.bf16 %v9847_v15  ;;  %v1678_v5 = vsel %vm1663_vm6, %v1645_v35, %v4473_v13  ;;  %v9854_v62 = vld [vmem:[#allocation18_spill] sm:$0xff] }
 0x264   : > { %v1679_v43 = vsel %vm1663_vm6, %v1646_v37, %v4474_v57  ;;  %v4634_v21 = vunpack.i.h.bf16 %v9848_v49  ;;  %v4633_v4 = vunpack.i.l.bf16 %v9848_v49  ;;  %v4589_v44 = vunpack.i.h.bf16 %v9849_v50  ;;  %v9856_v57 = vld [vmem:[#allocation72_spill] sm:$0xff]  ;;  %v9859_v37 = vld [vmem:[#allocation79_spill] sm:$0xff] }
 0x265   : > { %v4588_v18 = vunpack.i.l.bf16 %v9849_v50  ;;  %v4714_v16 = vunpack.i.h.bf16 %v9850_v47  ;;  %v4713_v60 = vunpack.i.l.bf16 %v9850_v47  ;;  %v4669_v12 = vunpack.i.h.bf16 %v9851_v61 }
 0x266   : > { %v4668_v9 = vunpack.i.l.bf16 %v9851_v61  ;;  %v4794_v34 = vunpack.i.h.bf16 %v7154_v3  ;;  %v4793_v46 = vunpack.i.l.bf16 %v7154_v3  ;;  %v1712_v53 = vsel %vm1696_vm8, %v1679_v43, %v4554_v33  ;;  %v9860_v33 = vld [vmem:[#allocation86_spill] sm:$0xff]  ;;  %v7535_v61 = vld [vmem:[%s9403_s3 + $0x2] ss:$0 sm:$0xff] }
 0x267   : > { %v1711_v2 = vsel %vm1696_vm8, %v1678_v5, %v4553_v32  ;;  %v4749_v7 = vunpack.i.h.bf16 %v9852_v41  ;;  %v4748_v36 = vunpack.i.l.bf16 %v9852_v41  ;;  %v1745_v45 = vsel %vm1729_vm7, %v1712_v53, %v4634_v21  ;;  %v9861_v21 = vld [vmem:[#allocation95_spill] sm:$0xff] }
 0x268   : > { %v1744_v31 = vsel %vm1729_vm7, %v1711_v2, %v4633_v4  ;;  %v4829_v20 = vunpack.i.h.bf16 %v4827_v39  ;;  %v4828_v29 = vunpack.i.l.bf16 %v4827_v39  ;;  %v1725_v10 = vsel %vm1696_vm8, %v1692_v40, %v4588_v18  ;;  %v7544_v53 = vld [vmem:[%s9403_s3 + $0x3] ss:$0 sm:$0xff] }
 0x269   : > { %v1726_v24 = vsel %vm1696_vm8, %v1693_v0, %v4589_v44  ;;  %v1777_v3 = vsel %vm1762_vm9, %v1744_v31, %v4713_v60  ;;  %v1778_v25 = vsel %vm1762_vm9, %v1745_v45, %v4714_v16  ;;  %v1758_v8 = vsel %vm1729_vm7, %v1725_v10, %v4668_v9  ;;  %v4832_v0 = vpop.permute.xlu1 %4831  ;;  %v5621_v10 = vld [vmem:[%s5834_s21] sm:$0xff] }
 0x26a   : > { %v1759_v27 = vsel %vm1729_vm7, %v1726_v24, %v4669_v12  ;;  %v1810_v63 = vsel %vm1795_vm10, %v1777_v3, %v4793_v46  ;;  %v1811_v11 = vsel %vm1795_vm10, %v1778_v25, %v4794_v34  ;;  %v1791_v26 = vsel %vm1762_vm9, %v1758_v8, %v4748_v36  ;;  %v7562_v3 = vld [vmem:[%s9403_s3 + $0x5] ss:$0 sm:$0xff] }
 0x26b   : > { %v1792_v54 = vsel %vm1762_vm9, %v1759_v27, %v4749_v7  ;;  %v1824_v52 = vsel %vm1795_vm10, %v1791_v26, %v4828_v29  ;;  %v1835_v56 = vpack.c.bf16 %v1811_v11, %v1810_v63  ;;  %v4274_v23 = vunpack.i.h.bf16 %v9853_v48 }
 0x26c   : > { %v1825_v55 = vsel %vm1795_vm10, %v1792_v54, %v4829_v20  ;;  %v4273_v30 = vunpack.i.l.bf16 %v9853_v48  ;;  %v4354_v58 = vunpack.i.h.bf16 %v9854_v62  ;;  %v4353_v22 = vunpack.i.l.bf16 %v9854_v62  ;;  %v7553_v20 = vld [vmem:[%s9403_s3 + $0x4] ss:$0 sm:$0xff]  ;;  %v5622_v54 = vld [vmem:[%s5834_s21 + $0x8] sm:$0xff] }
 0x26d   : > { %v1842_v6 = vpack.c.bf16 %v1825_v55, %v1824_v52  ;;  %v4434_v28 = vunpack.i.h.bf16 %v9855_v38  ;;  %v4433_v14 = vunpack.i.l.bf16 %v9855_v38  ;;  %v4514_v13 = vunpack.i.h.bf16 %v9856_v57 }
 0x26e   : > { %v4513_v1 = vunpack.i.l.bf16 %v9856_v57  ;;  %v1596_v51 = vsel %vm199_vm0, %v9857_v59, %v4274_v23  ;;  %v1595_v35 = vsel %vm199_vm0, %v9858_v17, %v4273_v30  ;;  %v4594_v42 = vunpack.i.h.bf16 %v9859_v37 }
 0x26f   : > { %v4593_v19 = vunpack.i.l.bf16 %v9859_v37  ;;  %v1628_v40 = vsel %vm1597_vm5, %v1595_v35, %v4353_v22  ;;  %v1629_v15 = vsel %vm1597_vm5, %v1596_v51, %v4354_v58  ;;  %v4674_v32 = vunpack.i.h.bf16 %v9860_v33  ;;  %v5623_v58 = vld [vmem:[%s5834_s21 + $0x10] sm:$0xff]  ;;  %v7589_v35 = vld [vmem:[#allocation2 + $0x8] sm:$0xff] }
 0x270   : > { %v4673_v5 = vunpack.i.l.bf16 %v9860_v33  ;;  %v1662_v43 = vsel %vm1630_vm4, %v1629_v15, %v4434_v28  ;;  %v1661_v49 = vsel %vm1630_vm4, %v1628_v40, %v4433_v14  ;;  %v4754_v4 = vunpack.i.h.bf16 %v9861_v21  ;;  %v7591_v37 = vld [vmem:[#allocation2 + $0x10] sm:$0xff]  ;;  %v5624_v40 = vld [vmem:[%s5834_s21 + $0x80] sm:$0xff]  ;;  %v5625_v33 = vld [vmem:[%s5834_s21 + $0x18] sm:$0xff] }
 0x271   : > { %4131 = vmatmul.msk.bf16.gmra.mxu0 %vm1864_vm11, %v1835_v56  ;;  %v4753_v50 = vunpack.i.l.bf16 %v9861_v21  ;;  %v1694_v44 = vsel %vm1663_vm6, %v1661_v49, %v4513_v1  ;;  %v1695_v18 = vsel %vm1663_vm6, %v1662_v43, %v4514_v13  ;;  %v4834_v47 = vunpack.i.h.bf16 %v4832_v0 }
 0x272   : > { %v4833_v16 = vunpack.i.l.bf16 %v4832_v0  ;;  %v1727_v60 = vsel %vm1696_vm8, %v1694_v44, %v4593_v19  ;;  %v1728_v39 = vsel %vm1696_vm8, %v1695_v18, %v4594_v42  ;;  %v4835_v0 = vpack.i.bf16 %v7591_v37, %v7589_v35 }
 0x273   : > { %4138 = vmatmul.msk.bf16.gmra.mxu2 %vm1864_vm11, %v1842_v6  ;;  %v1760_v12 = vsel %vm1729_vm7, %v1727_v60, %v4673_v5  ;;  %v1761_v9 = vsel %vm1729_vm7, %v1728_v39, %v4674_v32  ;;  %v2309_v5 = vld [vmem:[#allocation2 + $0x38] sm:$0xff] }
 0x274   : > { %v1793_v34 = vsel %vm1762_vm9, %v1760_v12, %v4753_v50  ;;  %v1794_v46 = vsel %vm1762_vm9, %v1761_v9, %v4754_v4  ;;  %4836 = vrot.lane.b32.xlu2 %v4835_v0, %s5674_s17 }
 0x275   : > { %v1826_v41 = vsel %vm1795_vm10, %v1793_v34, %v4833_v16  ;;  %v1827_v7 = vsel %vm1795_vm10, %v1794_v46, %v4834_v47  ;;  %v2558_v47 = vrot.slane %v2309_v5, 1 }
 0x276   : > { %v1843_v45 = vpack.c.bf16 %v1827_v7, %v1826_v41 }
 0x27e   : > { %v1926_v2 = vpop.f32.mrf.mxu0 }
 0x27f   : > { %v2007_v36 = vmul.f32 %v7535_v61, %v1926_v2 }
 0x281   : > { %vm2039_vm12 = vcmp.ge.f32.partialorder %v2007_v36, 0.0  ;;  %v2072_v31 = vmul.f32 %v7544_v53, %v2007_v36 }
 0x283   : > { %v2104_v29 = vsel %vm2039_vm12, %v2007_v36, %v2072_v31  ;;  %4139 = vmatmul.msk.bf16.gmra.mxu2 %vm1864_vm11, %v1843_v45 }
 0x284   : > { %v7557_v24 = vadd.f32 %v5621_v10, %v2104_v29  ;;  %v5626_v29 = vld [vmem:[%s5834_s21 + $0x88] sm:$0xff] }
 0x286   : > { %9862 = vst [vmem:[#allocation43_spill] sm:$0xff] %v7557_v24  ;;  %v2173_v25 = vmul.f32 %v7553_v20, %v7557_v24  ;;  %v1928_v8 = vpop.f32.mrf.mxu0 }
 0x287   : > { %v2008_v27 = vmul.f32 %v7535_v61, %v1928_v8 }
 0x288   : > { %v2206_v63 = vadd.f32 %v7562_v3, %v2173_v25  ;;  %v5627_v25 = vld [vmem:[%s5834_s21 + $0x20] sm:$0xff] }
 0x289   : > { %vm2040_vm13 = vcmp.ge.f32.partialorder %v2008_v27, 0.0  ;;  %v2073_v11 = vmul.f32 %v7544_v53, %v2008_v27 }
 0x28a   : > { %5547 = vtanh.f32 %v2206_v63 }
 0x28b   : > { %v2105_v26 = vsel %vm2040_vm13, %v2008_v27, %v2073_v11 }
 0x28c   : > { %v7570_v52 = vadd.f32 %v5622_v54, %v2105_v26 }
 0x28e   : > { %9863 = vst [vmem:[#allocation22_spill] sm:$0xff] %v7570_v52  ;;  %v2174_v55 = vmul.f32 %v7553_v20, %v7570_v52  ;;  %v1931_v56 = vpop.f32.mrf.mxu0 }
 0x28f   : > { %v2009_v6 = vmul.f32 %v7535_v61, %v1931_v56 }
 0x290   : > { %v5548_v48 = vpop.eup %5547  ;;  %v2207_v23 = vadd.f32 %v7562_v3, %v2174_v55 }
 0x291   : > { %2270 = vst.msk [vmem:[#allocation2 + $0x28] sm:$0xff] %vm199_vm0, %v5548_v48  ;;  %vm2041_vm14 = vcmp.ge.f32.partialorder %v2009_v6, 0.0  ;;  %v2074_v30 = vmul.f32 %v7544_v53, %v2009_v6 }
 0x292   : > { %5549 = vtanh.f32 %v2207_v23 }
 0x293   : > { %v2106_v62 = vsel %vm2041_vm14, %v2009_v6, %v2074_v30 }
 0x294   : > { %v7579_v22 = vadd.f32 %v5623_v58, %v2106_v62 }
 0x296   : > { %9864 = vst [vmem:[#allocation10_spill] sm:$0xff] %v7579_v22  ;;  %v2175_v38 = vmul.f32 %v7553_v20, %v7579_v22  ;;  %v1966_v28 = vpop.f32.mrf.mxu2  ;;  %v1933_v14 = vpop.f32.mrf.mxu0 }
 0x297   : > { %v2023_v57 = vmul.f32 %v7535_v61, %v1966_v28  ;;  %v2010_v13 = vmul.f32 %v7535_v61, %v1933_v14 }
 0x298   : > { %v5550_v1 = vpop.eup %5549  ;;  %v2208_v59 = vadd.f32 %v7562_v3, %v2175_v38  ;;  %v7601_v43 = vld [vmem:[#allocation2 + $0x28] sm:$0xff] }
 0x299   : > { %2271 = vst.msk [vmem:[#allocation2 + $0x30] sm:$0xff] %vm199_vm0, %v5550_v1  ;;  %vm2055_vm15 = vcmp.ge.f32.partialorder %v2023_v57, 0.0  ;;  %v2088_v51 = vmul.f32 %v7544_v53, %v2023_v57  ;;  %vm2042_vm12 = vcmp.ge.f32.partialorder %v2010_v13, 0.0  ;;  %v2075_v17 = vmul.f32 %v7544_v53, %v2010_v13  ;;  %v5628_v1 = vld [vmem:[%s5834_s21 + $0x90] sm:$0xff] }
 0x29a   : > { %5551 = vtanh.f32 %v2208_v59  ;;  %v9534_v9 = vrot.slane %v7601_v43, 7  ;;  %v2555_v34 = vrot.slane %v7601_v43, 1 }
 0x29b   : > { %v2120_v42 = vsel %vm2055_vm15, %v2023_v57, %v2088_v51  ;;  %v2107_v19 = vsel %vm2042_vm12, %v2010_v13, %v2075_v17  ;;  %v5629_v51 = vld [vmem:[%s5834_s21 + $0x28] sm:$0xff] }
 0x29c   : > { %v7596_v15 = vadd.f32 %v5624_v40, %v2120_v42  ;;  %v7599_v32 = vadd.f32 %v5625_v33, %v2107_v19 }
 0x29e   : > { %9865 = vst [vmem:[#allocation23_spill] sm:$0xff] %v7596_v15  ;;  %v2189_v49 = vmul.f32 %v7553_v20, %v7596_v15  ;;  %v2176_v21 = vmul.f32 %v7553_v20, %v7599_v32  ;;  %v1968_v4 = vpop.f32.mrf.mxu2  ;;  %v1936_v50 = vpop.f32.mrf.mxu0 }
 0x29f   : > { %9866 = vst [vmem:[#allocation20_spill] sm:$0xff] %v7599_v32  ;;  %v2024_v44 = vmul.f32 %v7535_v61, %v1968_v4  ;;  %v2011_v18 = vmul.f32 %v7535_v61, %v1936_v50 }
 0x2a0   : > { %v5552_v16 = vpop.eup %5551  ;;  %v2222_v60 = vadd.f32 %v7562_v3, %v2189_v49  ;;  %v2209_v39 = vadd.f32 %v7562_v3, %v2176_v21  ;;  %v2308_v12 = vld [vmem:[#allocation2 + $0x30] sm:$0xff] }
 0x2a1   : > { %2272 = vst.msk [vmem:[#allocation2 + $0x48] sm:$0xff] %vm199_vm0, %v5552_v16  ;;  %vm2056_vm13 = vcmp.ge.f32.partialorder %v2024_v44, 0.0  ;;  %v2089_v46 = vmul.f32 %v7544_v53, %v2024_v44  ;;  %vm2043_vm14 = vcmp.ge.f32.partialorder %v2011_v18, 0.0  ;;  %v2076_v2 = vmul.f32 %v7544_v53, %v2011_v18 }
 0x2a2   : > { %5553 = vtanh.f32 %v2222_v60  ;;  %v7618_v41 = vpack.i.bf16 %v2308_v12, %v7601_v43  ;;  %v2430_v7 = vrot.slane %v2308_v12, 7  ;;  %v2556_v36 = vrot.slane %v2308_v12, 1 }
 0x2a3   : > { %5555 = vtanh.f32 %v2209_v39  ;;  %v2121_v31 = vsel %vm2056_vm13, %v2024_v44, %v2089_v46  ;;  %v2108_v45 = vsel %vm2043_vm14, %v2011_v18, %v2076_v2  ;;  %v5631_v2 = vld [vmem:[%s5834_s21 + $0x30] sm:$0xff] }
 0x2a4   : > { %v7621_v10 = vadd.f32 %v5626_v29, %v2121_v31  ;;  %v7624_v8 = vadd.f32 %v5627_v25, %v2108_v45  ;;  %4841 = vrot.lane.b32.xlu0 %v7618_v41, %s5674_s17  ;;  %v2557_v27 = vsel %vm688_vm1, %v2555_v34, %v2556_v36  ;;  %v2559_v63 = vsel %vm688_vm1, %v2556_v36, %v2558_v47  ;;  %v5630_v34 = vld [vmem:[%s5834_s21 + $0x98] sm:$0xff] }
 0x2a5   : > { %v7630_v11 = vpack.i.bf16 %v2559_v63, %v2557_v27  ;;  %v7635_v26 = vsel %vm559_vm2, %v9534_v9, %v2430_v7 }
 0x2a6   : > { %9867 = vst [vmem:[#allocation21_spill] sm:$0xff] %v7621_v10  ;;  %v2190_v54 = vmul.f32 %v7553_v20, %v7621_v10  ;;  %v2177_v55 = vmul.f32 %v7553_v20, %v7624_v8  ;;  %v1971_v56 = vpop.f32.mrf.mxu2  ;;  %v1938_v6 = vpop.f32.mrf.mxu0  ;;  %v5649_v10 = vld [vmem:[%s5834_s21 + $0x78] sm:$0xff] }
 0x2a7   : > { %9868 = vst [vmem:[#allocation47_spill] sm:$0xff] %v7624_v8  ;;  %v2025_v48 = vmul.f32 %v7535_v61, %v1971_v56  ;;  %v2012_v23 = vmul.f32 %v7535_v61, %v1938_v6 }
 0x2a8   : > { %v5554_v30 = vpop.eup %5553  ;;  %v2223_v62 = vadd.f32 %v7562_v3, %v2190_v54  ;;  %v2210_v58 = vadd.f32 %v7562_v3, %v2177_v55  ;;  %v7666_v47 = vld [vmem:[#allocation2 + $0x48] sm:$0xff] }
 0x2a9   : > { %v5556_v38 = vpop.eup %5555  ;;  %2286 = vst.msk [vmem:[#allocation2 + $0x128] sm:$0xff] %vm199_vm0, %v5554_v30  ;;  %vm2057_vm15 = vcmp.ge.f32.partialorder %v2025_v48, 0.0  ;;  %v2090_v28 = vmul.f32 %v7544_v53, %v2025_v48  ;;  %vm2044_vm12 = vcmp.ge.f32.partialorder %v2012_v23, 0.0  ;;  %v2077_v14 = vmul.f32 %v7544_v53, %v2012_v23 }
 0x2aa   : > { %2273 = vst.msk [vmem:[#allocation2 + $0x50] sm:$0xff] %vm199_vm0, %v5556_v38  ;;  %5557 = vtanh.f32 %v2223_v62  ;;  %v5632_v62 = vld [vmem:[%s5834_s21 + $0xa0] sm:$0xff]  ;;  %v5633_v38 = vld [vmem:[%s5834_s21 + $0x38] sm:$0xff] }
 0x2ab   : > { %5559 = vtanh.f32 %v2210_v58  ;;  %v2122_v57 = vsel %vm2057_vm15, %v2025_v48, %v2090_v28  ;;  %v2109_v13 = vsel %vm2044_vm12, %v2012_v23, %v2077_v14 }
 0x2ac   : > { %v7650_v59 = vadd.f32 %v5628_v1, %v2122_v57  ;;  %v7653_v17 = vadd.f32 %v5629_v51, %v2109_v13 }
 0x2ae   : > { %9869 = vst [vmem:[#allocation56_spill] sm:$0xff] %v7650_v59  ;;  %v2191_v42 = vmul.f32 %v7553_v20, %v7650_v59  ;;  %v2178_v19 = vmul.f32 %v7553_v20, %v7653_v17  ;;  %v1973_v0 = vpop.f32.mrf.mxu2  ;;  %v1941_v40 = vpop.f32.mrf.mxu0  ;;  %v5648_v59 = vld [vmem:[%s5834_s21 + $0xe0] sm:$0xff] }
 0x2af   : > { %9870 = vst [vmem:[#allocation51_spill] sm:$0xff] %v7653_v17  ;;  %v2026_v33 = vmul.f32 %v7535_v61, %v1973_v0  ;;  %v2013_v5 = vmul.f32 %v7535_v61, %v1941_v40  ;;  %v5645_v17 = vld [vmem:[%s5834_s21 + $0x68] sm:$0xff] }
 0x2b0   : > { %v5558_v49 = vpop.eup %5557  ;;  %v2224_v21 = vadd.f32 %v7562_v3, %v2191_v42  ;;  %v2211_v4 = vadd.f32 %v7562_v3, %v2178_v19 }
 0x2b1   : > { %v5560_v50 = vpop.eup %5559  ;;  %2287 = vst.msk [vmem:[#allocation2 + $0x130] sm:$0xff] %vm199_vm0, %v5558_v49  ;;  %vm2058_vm13 = vcmp.ge.f32.partialorder %v2026_v33, 0.0  ;;  %v2091_v44 = vmul.f32 %v7544_v53, %v2026_v33  ;;  %vm2045_vm14 = vcmp.ge.f32.partialorder %v2013_v5, 0.0  ;;  %v2078_v18 = vmul.f32 %v7544_v53, %v2013_v5  ;;  %v7668_v16 = vld [vmem:[#allocation2 + $0x50] sm:$0xff] }
 0x2b2   : > { %2274 = vst.msk [vmem:[#allocation2 + $0x68] sm:$0xff] %vm199_vm0, %v5560_v50  ;;  %5561 = vtanh.f32 %v2224_v21  ;;  %v4845_v60 = vpack.i.bf16 %v7668_v16, %v7666_v47  ;;  %v2561_v9 = vrot.slane %v7668_v16, 1 }
 0x2b3   : > { %5563 = vtanh.f32 %v2211_v4  ;;  %v2123_v39 = vsel %vm2058_vm13, %v2026_v33, %v2091_v44  ;;  %v2110_v12 = vsel %vm2045_vm14, %v2013_v5, %v2078_v18 }
 0x2b4   : > { %v7674_v46 = vadd.f32 %v5630_v34, %v2123_v39  ;;  %v7677_v7 = vadd.f32 %v5631_v2, %v2110_v12  ;;  %4846 = vrot.lane.b32.xlu1 %v4845_v60, %s5674_s17  ;;  %v5634_v60 = vld [vmem:[%s5834_s21 + $0xa8] sm:$0xff]  ;;  %v5635_v12 = vld [vmem:[%s5834_s21 + $0x40] sm:$0xff] }
 0x2b6   : > { %9871 = vst [vmem:[#allocation4_spill] sm:$0xff] %v7674_v46  ;;  %v2192_v36 = vmul.f32 %v7553_v20, %v7674_v46  ;;  %v2179_v31 = vmul.f32 %v7553_v20, %v7677_v7  ;;  %v1976_v45 = vpop.f32.mrf.mxu2  ;;  %v1943_v29 = vpop.f32.mrf.mxu0 }
 0x2b7   : > { %9872 = vst [vmem:[#allocation14_spill] sm:$0xff] %v7677_v7  ;;  %v2027_v25 = vmul.f32 %v7535_v61, %v1976_v45  ;;  %v2014_v27 = vmul.f32 %v7535_v61, %v1943_v29 }
 0x2b8   : > { %v5562_v63 = vpop.eup %5561  ;;  %v2225_v54 = vadd.f32 %v7562_v3, %v2192_v36  ;;  %v2212_v55 = vadd.f32 %v7562_v3, %v2179_v31 }
 0x2b9   : > { %v5564_v56 = vpop.eup %5563  ;;  %2288 = vst.msk [vmem:[#allocation2 + $0x148] sm:$0xff] %vm199_vm0, %v5562_v63  ;;  %vm2059_vm15 = vcmp.ge.f32.partialorder %v2027_v25, 0.0  ;;  %v2092_v6 = vmul.f32 %v7544_v53, %v2027_v25  ;;  %vm2046_vm12 = vcmp.ge.f32.partialorder %v2014_v27, 0.0  ;;  %v2079_v48 = vmul.f32 %v7544_v53, %v2014_v27  ;;  %v7709_v21 = vld [vmem:[#allocation2 + $0x68] sm:$0xff] }
 0x2ba   : > { %2275 = vst.msk [vmem:[#allocation2 + $0x70] sm:$0xff] %vm199_vm0, %v5564_v56  ;;  %5565 = vtanh.f32 %v2225_v54 }
 0x2bb   : > { %5567 = vtanh.f32 %v2212_v55  ;;  %v2124_v23 = vsel %vm2059_vm15, %v2027_v25, %v2092_v6  ;;  %v2111_v30 = vsel %vm2046_vm12, %v2014_v27, %v2079_v48  ;;  %v7729_v27 = vld [vmem:[#allocation2 + $0x130] sm:$0xff] }
 0x2bc   : > { %v7693_v58 = vadd.f32 %v5632_v62, %v2124_v23  ;;  %v7696_v28 = vadd.f32 %v5633_v38, %v2111_v30  ;;  %v7740_v62 = vld [vmem:[#allocation2 + $0x128] sm:$0xff] }
 0x2be   : > { %9873 = vst [vmem:[#allocation19_spill] sm:$0xff] %v7693_v58  ;;  %v2193_v14 = vmul.f32 %v7553_v20, %v7693_v58  ;;  %v2180_v57 = vmul.f32 %v7553_v20, %v7696_v28  ;;  %v1978_v13 = vpop.f32.mrf.mxu2  ;;  %v1946_v1 = vpop.f32.mrf.mxu0 }
 0x2bf   : > { %9874 = vst [vmem:[#allocation34_spill] sm:$0xff] %v7696_v28  ;;  %v2028_v51 = vmul.f32 %v7535_v61, %v1978_v13  ;;  %v2015_v42 = vmul.f32 %v7535_v61, %v1946_v1  ;;  %v2345_v1 = vld [vmem:[#allocation2 + $0x158] sm:$0xff] }
 0x2c0   : > { %v5566_v19 = vpop.eup %5565  ;;  %v2226_v0 = vadd.f32 %v7562_v3, %v2193_v14  ;;  %v2213_v40 = vadd.f32 %v7562_v3, %v2180_v57  ;;  %v7738_v30 = vld [vmem:[#allocation2 + $0x148] sm:$0xff]  ;;  %v4855_v14 = vpack.i.bf16 %v7729_v27, %v7740_v62 }
 0x2c1   : > { %v5568_v33 = vpop.eup %5567  ;;  %2289 = vst.msk [vmem:[#allocation2 + $0x150] sm:$0xff] %vm199_vm0, %v5566_v19  ;;  %vm2060_vm13 = vcmp.ge.f32.partialorder %v2028_v51, 0.0  ;;  %v2093_v5 = vmul.f32 %v7544_v53, %v2028_v51  ;;  %vm2047_vm14 = vcmp.ge.f32.partialorder %v2015_v42, 0.0  ;;  %v2080_v49 = vmul.f32 %v7544_v53, %v2015_v42  ;;  %v7711_v4 = vld [vmem:[#allocation2 + $0x70] sm:$0xff]  ;;  %v5637_v19 = vld [vmem:[%s5834_s21 + $0x48] sm:$0xff] }
 0x2c2   : > { %2276 = vst.msk [vmem:[#allocation2 + $0x88] sm:$0xff] %vm199_vm0, %v5568_v33  ;;  %5569 = vtanh.f32 %v2226_v0  ;;  %v4850_v50 = vpack.i.bf16 %v7711_v4, %v7709_v21  ;;  %v2321_v33 = vld [vmem:[#allocation2 + $0x98] sm:$0xff] }
 0x2c3   : > { %5571 = vtanh.f32 %v2213_v40  ;;  %v2125_v44 = vsel %vm2060_vm13, %v2028_v51, %v2093_v5  ;;  %v2112_v18 = vsel %vm2047_vm14, %v2015_v42, %v2080_v49  ;;  %v5636_v51 = vld [vmem:[%s5834_s21 + $0xb0] sm:$0xff]  ;;  %v2305_v40 = vld [vmem:[#allocation2 + $0x18] sm:$0xff]  ;;  %v9533_v5 = vrot.slane %v7738_v30, 7 }
 0x2c4   : > { %v7717_v39 = vadd.f32 %v5634_v60, %v2125_v44  ;;  %v7720_v34 = vadd.f32 %v5635_v12, %v2112_v18  ;;  %4851 = vrot.lane.b32.xlu2 %v4850_v50, %s5674_s17  ;;  %v2551_v50 = vrot.slane %v7591_v37, 1  ;;  %v2550_v44 = vrot.slane %v7589_v35, 1 }
 0x2c6   : > { %9875 = vst [vmem:[#allocation33_spill] sm:$0xff] %v7717_v39  ;;  %v2194_v2 = vmul.f32 %v7553_v20, %v7717_v39  ;;  %v2181_v36 = vmul.f32 %v7553_v20, %v7720_v34  ;;  %v1981_v31 = vpop.f32.mrf.mxu2  ;;  %v1948_v45 = vpop.f32.mrf.mxu0 }
 0x2c7   : > { %9876 = vst [vmem:[#allocation25_spill] sm:$0xff] %v7720_v34  ;;  %v2029_v29 = vmul.f32 %v7535_v61, %v1981_v31  ;;  %v2016_v25 = vmul.f32 %v7535_v61, %v1948_v45 }
 0x2c8   : > { %v5570_v63 = vpop.eup %5569  ;;  %v2227_v54 = vadd.f32 %v7562_v3, %v2194_v2  ;;  %v2214_v55 = vadd.f32 %v7562_v3, %v2181_v36  ;;  %v7733_v56 = vld [vmem:[#allocation2 + $0x150] sm:$0xff]  ;;  %v2603_v36 = vrot.slane %v2345_v1, 1 }
 0x2c9   : > { %v5572_v6 = vpop.eup %5571  ;;  %2290 = vst.msk [vmem:[#allocation2 + $0x168] sm:$0xff] %vm199_vm0, %v5570_v63  ;;  %vm2061_vm15 = vcmp.ge.f32.partialorder %v2029_v29, 0.0  ;;  %v2094_v48 = vmul.f32 %v7544_v53, %v2029_v29  ;;  %vm2048_vm12 = vcmp.ge.f32.partialorder %v2016_v25, 0.0  ;;  %v2081_v23 = vmul.f32 %v7544_v53, %v2016_v25 }
 0x2ca   : > { %2277 = vst.msk [vmem:[#allocation2 + $0x90] sm:$0xff] %vm199_vm0, %v5572_v6  ;;  %5573 = vtanh.f32 %v2227_v54  ;;  %v7745_v38 = vpack.i.bf16 %v7733_v56, %v7738_v30  ;;  %v2475_v49 = vrot.slane %v7733_v56, 7  ;;  %v2553_v63 = vrot.slane %v2305_v40, 1 }
 0x2cb   : > { %5575 = vtanh.f32 %v2214_v55  ;;  %v2126_v57 = vsel %vm2061_vm15, %v2029_v29, %v2094_v48  ;;  %v2113_v13 = vsel %vm2048_vm12, %v2016_v25, %v2081_v23  ;;  %v7773_v25 = vld [vmem:[#allocation2 + $0x88] sm:$0xff]  ;;  %v2573_v54 = vrot.slane %v2321_v33, 1 }
 0x2cc   : > { %v7750_v42 = vadd.f32 %v5636_v51, %v2126_v57  ;;  %v7753_v0 = vadd.f32 %v5637_v19, %v2113_v13  ;;  %4861 = vrot.lane.b32.xlu0 %v7745_v38, %s5674_s17  ;;  %4856 = vrot.lane.b32.xlu2 %v4855_v14, %s5674_s17  ;;  %v7769_v31 = vsel %vm559_vm2, %v9533_v5, %v2475_v49  ;;  %v2601_v23 = vrot.slane %v7733_v56, 1 }
 0x2cd   : > { %v2570_v56 = vrot.slane %v7773_v25, 1  ;;  %v2600_v49 = vrot.slane %v7738_v30, 1  ;;  %v2552_v5 = vsel %vm688_vm1, %v2550_v44, %v2551_v50 }
 0x2ce   : > { %9877 = vst [vmem:[#allocation53_spill] sm:$0xff] %v7750_v42  ;;  %v2195_v18 = vmul.f32 %v7553_v20, %v7750_v42  ;;  %v2182_v60 = vmul.f32 %v7553_v20, %v7753_v0  ;;  %v1983_v12 = vpop.f32.mrf.mxu2  ;;  %v1951_v2 = vpop.f32.mrf.mxu0 }
 0x2cf   : > { %9878 = vst [vmem:[#allocation6_spill] sm:$0xff] %v7753_v0  ;;  %v2030_v45 = vmul.f32 %v7535_v61, %v1983_v12  ;;  %v2017_v29 = vmul.f32 %v7535_v61, %v1951_v2  ;;  %v5639_v12 = vld [vmem:[%s5834_s21 + $0x50] sm:$0xff]  ;;  %v5642_v0 = vld [vmem:[%s5834_s21 + $0xc8] sm:$0xff] }
 0x2d0   : > { %v5574_v55 = vpop.eup %5573  ;;  %v2228_v6 = vadd.f32 %v7562_v3, %v2195_v18  ;;  %v2215_v48 = vadd.f32 %v7562_v3, %v2182_v60  ;;  %v5638_v18 = vld [vmem:[%s5834_s21 + $0xb8] sm:$0xff] }
 0x2d1   : > { %v5576_v14 = vpop.eup %5575  ;;  %2291 = vst.msk [vmem:[#allocation2 + $0x170] sm:$0xff] %vm199_vm0, %v5574_v55  ;;  %vm2062_vm13 = vcmp.ge.f32.partialorder %v2030_v45, 0.0  ;;  %v2095_v57 = vmul.f32 %v7544_v53, %v2030_v45  ;;  %vm2049_vm14 = vcmp.ge.f32.partialorder %v2017_v29, 0.0  ;;  %v2082_v13 = vmul.f32 %v7544_v53, %v2017_v29  ;;  %v7781_v1 = vld [vmem:[#allocation2 + $0x90] sm:$0xff] }
 0x2d2   : > { %2278 = vst.msk [vmem:[#allocation2 + $0xa8] sm:$0xff] %vm199_vm0, %v5576_v14  ;;  %5577 = vtanh.f32 %v2228_v6  ;;  %v4870_v51 = vpack.i.bf16 %v7781_v1, %v7773_v25  ;;  %v2571_v19 = vrot.slane %v7781_v1, 1  ;;  %v2349_v14 = vld [vmem:[#allocation2 + $0x178] sm:$0xff] }
 0x2d3   : > { %5579 = vtanh.f32 %v2215_v48  ;;  %v2127_v40 = vsel %vm2062_vm13, %v2030_v45, %v2095_v57  ;;  %v2114_v33 = vsel %vm2049_vm14, %v2017_v29, %v2082_v13  ;;  %v2554_v45 = vsel %vm688_vm1, %v2551_v50, %v2553_v63 }
 0x2d4   : > { %v7790_v60 = vadd.f32 %v5638_v18, %v2127_v40  ;;  %v7793_v2 = vadd.f32 %v5639_v12, %v2114_v33  ;;  %4871 = vrot.lane.b32.xlu0 %v4870_v51, %s5674_s17  ;;  %v2572_v55 = vsel %vm688_vm1, %v2570_v56, %v2571_v19  ;;  %v2574_v6 = vsel %vm688_vm1, %v2571_v19, %v2573_v54  ;;  %v7808_v19 = vld [vmem:[#allocation2 + $0x168] sm:$0xff] }
 0x2d5   : > { %v2602_v29 = vsel %vm688_vm1, %v2600_v49, %v2601_v23  ;;  %v2604_v48 = vsel %vm688_vm1, %v2601_v23, %v2603_v36  ;;  %v2608_v44 = vrot.slane %v2349_v14, 1  ;;  %v7810_v50 = vpack.i.bf16 %v2574_v6, %v2572_v55 }
 0x2d6   : > { %9879 = vst [vmem:[#allocation9_spill] sm:$0xff] %v7790_v60  ;;  %v2196_v57 = vmul.f32 %v7553_v20, %v7790_v60  ;;  %v2183_v13 = vmul.f32 %v7553_v20, %v7793_v2  ;;  %v1986_v51 = vpop.f32.mrf.mxu2  ;;  %v1953_v40 = vpop.f32.mrf.mxu0  ;;  %v4875_v49 = vpack.i.bf16 %v2554_v45, %v2552_v5  ;;  %v7814_v18 = vpack.i.bf16 %v2604_v48, %v2602_v29  ;;  %v5640_v48 = vld [vmem:[%s5834_s21 + $0xc0] sm:$0xff] }
 0x2d7   : > { %9880 = vst [vmem:[#allocation13_spill] sm:$0xff] %v7793_v2  ;;  %v2031_v56 = vmul.f32 %v7535_v61, %v1986_v51  ;;  %v2018_v54 = vmul.f32 %v7535_v61, %v1953_v40  ;;  %v2605_v5 = vrot.slane %v7808_v19, 1 }
 0x2d8   : > { %9881 = vst [vmem:[#allocation24_spill] sm:$0xff] %v7810_v50  ;;  %v5578_v63 = vpop.eup %5577  ;;  %v2229_v36 = vadd.f32 %v7562_v3, %v2196_v57  ;;  %v2216_v23 = vadd.f32 %v7562_v3, %v2183_v13  ;;  %v2348_v33 = vld [vmem:[#allocation2 + $0x170] sm:$0xff]  ;;  %v5641_v13 = vld [vmem:[%s5834_s21 + $0x58] sm:$0xff] }
 0x2d9   : > { %9882 = vst [vmem:[#allocation32_spill] sm:$0xff] %v7814_v18  ;;  %v5580_v12 = vpop.eup %5579  ;;  %vm2063_vm15 = vcmp.ge.f32.partialorder %v2031_v56, 0.0  ;;  %v2096_v51 = vmul.f32 %v7544_v53, %v2031_v56  ;;  %vm2050_vm12 = vcmp.ge.f32.partialorder %v2018_v54, 0.0  ;;  %v2083_v55 = vmul.f32 %v7544_v53, %v2018_v54 }
 0x2da   : > { %2292 = vst.msk [vmem:[#allocation2 + $0x188] sm:$0xff] %vm199_vm0, %v5578_v63  ;;  %5581 = vtanh.f32 %v2229_v36  ;;  %v7821_v6 = vpack.i.bf16 %v2348_v33, %v7808_v19  ;;  %v2606_v14 = vrot.slane %v2348_v33, 1  ;;  %v2325_v36 = vld [vmem:[#allocation2 + $0xb8] sm:$0xff] }
 0x2db   : > { %2279 = vst.msk [vmem:[#allocation2 + $0xb0] sm:$0xff] %vm199_vm0, %v5580_v12  ;;  %5583 = vtanh.f32 %v2216_v23  ;;  %v2128_v45 = vsel %vm2063_vm15, %v2031_v56, %v2096_v51  ;;  %v2115_v29 = vsel %vm2050_vm12, %v2018_v54, %v2083_v55  ;;  %v9536_v23 = vrot.slane %v7808_v19, 7 }
 0x2dc   : > { %v7825_v57 = vadd.f32 %v5640_v48, %v2128_v45  ;;  %v7828_v40 = vadd.f32 %v5641_v13, %v2115_v29  ;;  %4866 = vrot.lane.b32.xlu1 %v7821_v6, %s5674_s17  ;;  %4876 = vrot.lane.b32.xlu0 %v4875_v49, %s5675_s26  ;;  %v2607_v63 = vsel %vm688_vm1, %v2605_v5, %v2606_v14  ;;  %v2480_v56 = vrot.slane %v2348_v33, 7  ;;  %v7842_v48 = vld [vmem:[#allocation2 + $0xa8] sm:$0xff] }
 0x2dd   : > { %v2609_v12 = vsel %vm688_vm1, %v2606_v14, %v2608_v44 }
 0x2de   : > { %9883 = vst [vmem:[#allocation31_spill] sm:$0xff] %v7825_v57  ;;  %v2197_v54 = vmul.f32 %v7553_v20, %v7825_v57  ;;  %v2184_v51 = vmul.f32 %v7553_v20, %v7828_v40  ;;  %v1988_v55 = vpop.f32.mrf.mxu2  ;;  %v1956_v45 = vpop.f32.mrf.mxu0  ;;  %v7847_v44 = vsel %vm559_vm2, %v9536_v23, %v2480_v56  ;;  %v7849_v33 = vpack.i.bf16 %v2609_v12, %v2607_v63  ;;  %v2313_v56 = vld [vmem:[#allocation2 + $0x58] sm:$0xff]  ;;  %v5643_v57 = vld [vmem:[%s5834_s21 + $0x60] sm:$0xff] }
 0x2df   : > { %9884 = vst [vmem:[#allocation26_spill] sm:$0xff] %v7828_v40  ;;  %v2032_v29 = vmul.f32 %v7535_v61, %v1988_v55  ;;  %v2019_v49 = vmul.f32 %v7535_v61, %v1956_v45  ;;  %v2578_v40 = vrot.slane %v2325_v36, 1  ;;  %v9544_v36 = vrot.slane %v7842_v48, 7 }
 0x2e0   : > { %9885 = vst [vmem:[#allocation36_spill] sm:$0xff] %v7849_v33  ;;  %v5582_v5 = vpop.eup %5581  ;;  %v2230_v14 = vadd.f32 %v7562_v3, %v2197_v54  ;;  %v2217_v13 = vadd.f32 %v7562_v3, %v2184_v51  ;;  %v2575_v54 = vrot.slane %v7842_v48, 1  ;;  %v2563_v60 = vrot.slane %v2313_v56, 1 }
 0x2e1   : > { %v5584_v55 = vpop.eup %5583  ;;  %2293 = vst.msk [vmem:[#allocation2 + $0x190] sm:$0xff] %vm199_vm0, %v5582_v5  ;;  %vm2064_vm13 = vcmp.ge.f32.partialorder %v2032_v29, 0.0  ;;  %v2097_v45 = vmul.f32 %v7544_v53, %v2032_v29  ;;  %vm2051_vm14 = vcmp.ge.f32.partialorder %v2019_v49, 0.0  ;;  %v2084_v63 = vmul.f32 %v7544_v53, %v2019_v49 }
 0x2e2   : > { %v2324_v12 = vld [vmem:[#allocation2 + $0xb0] sm:$0xff]  ;;  %2280 = vst.msk [vmem:[#allocation2 + $0xc8] sm:$0xff] %vm199_vm0, %v5584_v55  ;;  %5585 = vtanh.f32 %v2230_v14  ;;  %v2560_v14 = vrot.slane %v7666_v47, 1  ;;  %v2353_v55 = vld [vmem:[#allocation2 + $0x198] sm:$0xff] }
 0x2e3   : > { %v2576_v51 = vrot.slane %v2324_v12, 1  ;;  %5587 = vtanh.f32 %v2217_v13  ;;  %v2129_v5 = vsel %vm2064_vm13, %v2032_v29, %v2097_v45  ;;  %v2116_v23 = vsel %vm2051_vm14, %v2019_v49, %v2084_v63 }
 0x2e4   : > { %v2450_v2 = vrot.slane %v2324_v12, 7  ;;  %v7861_v34 = vadd.f32 %v5642_v0, %v2129_v5  ;;  %v7864_v28 = vadd.f32 %v5643_v57, %v2116_v23  ;;  %4881 = vrot.lane.b32.xlu1 %v7630_v11, %s5675_s26  ;;  %v2562_v45 = vsel %vm688_vm1, %v2560_v14, %v2561_v9 }
 0x2e5   : > { %v2577_v7 = vsel %vm688_vm1, %v2575_v54, %v2576_v51  ;;  %v2579_v13 = vsel %vm688_vm1, %v2576_v51, %v2578_v40  ;;  %v7882_v63 = vpack.i.bf16 %v2324_v12, %v7842_v48  ;;  %v7886_v54 = vld [vmem:[#allocation2 + $0x188] sm:$0xff] }
 0x2e6   : > { %9886 = vst [vmem:[#allocation52_spill] sm:$0xff] %v7861_v34  ;;  %v7874_v29 = vsel %vm559_vm2, %v9544_v36, %v2450_v2  ;;  %v2198_v0 = vmul.f32 %v7553_v20, %v7861_v34  ;;  %v2185_v57 = vmul.f32 %v7553_v20, %v7864_v28  ;;  %v1991_v23 = vpop.f32.mrf.mxu2  ;;  %v1958_v49 = vpop.f32.mrf.mxu0  ;;  %v2613_v2 = vrot.slane %v2353_v55, 1 }
 0x2e7   : > { %9887 = vst [vmem:[#allocation12_spill] sm:$0xff] %v7864_v28  ;;  %v2033_v40 = vmul.f32 %v7535_v61, %v1991_v23  ;;  %v2020_v56 = vmul.f32 %v7535_v61, %v1958_v49  ;;  %v7890_v34 = vpack.i.bf16 %v2579_v13, %v2577_v7  ;;  %v2610_v7 = vrot.slane %v7886_v54, 1 }
 0x2e8   : > { %9888 = vst [vmem:[#allocation58_spill] sm:$0xff] %v7882_v63  ;;  %v5586_v51 = vpop.eup %5585  ;;  %v2231_v5 = vadd.f32 %v7562_v3, %v2198_v0  ;;  %v2218_v36 = vadd.f32 %v7562_v3, %v2185_v57  ;;  %v2352_v28 = vld [vmem:[#allocation2 + $0x190] sm:$0xff]  ;;  %v2564_v49 = vsel %vm688_vm1, %v2561_v9, %v2563_v60 }
 0x2e9   : > { %9889 = vst [vmem:[#allocation63_spill] sm:$0xff] %v7890_v34  ;;  %v5588_v14 = vpop.eup %5587  ;;  %vm2065_vm15 = vcmp.ge.f32.partialorder %v2033_v40, 0.0  ;;  %v2098_v12 = vmul.f32 %v7544_v53, %v2033_v40  ;;  %vm2052_vm12 = vcmp.ge.f32.partialorder %v2020_v56, 0.0  ;;  %v2085_v23 = vmul.f32 %v7544_v53, %v2020_v56 }
 0x2ea   : > { %2294 = vst.msk [vmem:[#allocation2 + $0x1a8] sm:$0xff] %vm199_vm0, %v5586_v51  ;;  %5589 = vtanh.f32 %v2231_v5  ;;  %v7897_v55 = vpack.i.bf16 %v2352_v28, %v7886_v54  ;;  %v2611_v13 = vrot.slane %v2352_v28, 1  ;;  %v5644_v51 = vld [vmem:[%s5834_s21 + $0xd0] sm:$0xff]  ;;  %v2485_v9 = vrot.slane %v2352_v28, 7 }
 0x2eb   : > { %2281 = vst.msk [vmem:[#allocation2 + $0xd0] sm:$0xff] %vm199_vm0, %v5588_v14  ;;  %5591 = vtanh.f32 %v2218_v36  ;;  %v2130_v0 = vsel %vm2065_vm15, %v2033_v40, %v2098_v12  ;;  %v2117_v57 = vsel %vm2052_vm12, %v2020_v56, %v2085_v23  ;;  %v2329_v14 = vld [vmem:[#allocation2 + $0xd8] sm:$0xff]  ;;  %v9551_v40 = vrot.slane %v7886_v54, 7 }
 0x2ec   : > { %v7902_v42 = vadd.f32 %v5644_v51, %v2130_v0  ;;  %v7905_v39 = vadd.f32 %v5645_v17, %v2117_v57  ;;  %4886 = vrot.lane.b32.xlu2 %v7897_v55, %s5674_s17  ;;  %4896 = vrot.lane.b32.xlu1 %v7882_v63, %s5674_s17  ;;  %v2612_v5 = vsel %vm688_vm1, %v2610_v7, %v2611_v13  ;;  %v7922_v57 = vld [vmem:[#allocation2 + $0xc8] sm:$0xff] }
 0x2ed   : > { %v2614_v36 = vsel %vm688_vm1, %v2611_v13, %v2613_v2  ;;  %v7918_v23 = vpack.i.bf16 %v2564_v49, %v2562_v45  ;;  %v7927_v28 = vsel %vm559_vm2, %v9551_v40, %v2485_v9  ;;  %v2583_v45 = vrot.slane %v2329_v14, 1 }
 0x2ee   : > { %9890 = vst [vmem:[#allocation35_spill] sm:$0xff] %v7902_v42  ;;  %v2199_v60 = vmul.f32 %v7553_v20, %v7902_v42  ;;  %v2186_v17 = vmul.f32 %v7553_v20, %v7905_v39  ;;  %v1993_v56 = vpop.f32.mrf.mxu2  ;;  %v1961_v12 = vpop.f32.mrf.mxu0  ;;  %v7929_v2 = vpack.i.bf16 %v2614_v36, %v2612_v5  ;;  %v2317_v5 = vld [vmem:[#allocation2 + $0x78] sm:$0xff]  ;;  %v2580_v36 = vrot.slane %v7922_v57, 1  ;;  %v5647_v42 = vld [vmem:[%s5834_s21 + $0x70] sm:$0xff] }
 0x2ef   : > { %9891 = vst [vmem:[#allocation66_spill] sm:$0xff] %v7905_v39  ;;  %v2034_v0 = vmul.f32 %v7535_v61, %v1993_v56  ;;  %v2021_v7 = vmul.f32 %v7535_v61, %v1961_v12  ;;  %v2568_v58 = vrot.slane %v2317_v5, 1 }
 0x2f0   : > { %9892 = vst [vmem:[#allocation46_spill] sm:$0xff] %v7927_v28  ;;  %v5590_v13 = vpop.eup %5589  ;;  %v2232_v51 = vadd.f32 %v7562_v3, %v2199_v60  ;;  %v2219_v39 = vadd.f32 %v7562_v3, %v2186_v17 }
 0x2f1   : > { %9893 = vst [vmem:[#allocation84_spill] sm:$0xff] %v7929_v2  ;;  %v5592_v49 = vpop.eup %5591  ;;  %vm2066_vm13 = vcmp.ge.f32.partialorder %v2034_v0, 0.0  ;;  %v2099_v56 = vmul.f32 %v7544_v53, %v2034_v0  ;;  %vm2053_vm14 = vcmp.ge.f32.partialorder %v2021_v7, 0.0  ;;  %v2086_v9 = vmul.f32 %v7544_v53, %v2021_v7 }
 0x2f2   : > { %2295 = vst.msk [vmem:[#allocation2 + $0x1b0] sm:$0xff] %vm199_vm0, %v5590_v13  ;;  %v7936_v12 = vld [vmem:[#allocation2 + $0xd0] sm:$0xff]  ;;  %5593 = vtanh.f32 %v2232_v51  ;;  %v5646_v13 = vld [vmem:[%s5834_s21 + $0xd8] sm:$0xff] }
 0x2f3   : > { %2282 = vst.msk [vmem:[#allocation2 + $0xe8] sm:$0xff] %vm199_vm0, %v5592_v49  ;;  %v2581_v14 = vrot.slane %v7936_v12, 1  ;;  %5595 = vtanh.f32 %v2219_v39  ;;  %v2131_v60 = vsel %vm2066_vm13, %v2034_v0, %v2099_v56  ;;  %v2118_v17 = vsel %vm2053_vm14, %v2021_v7, %v2086_v9  ;;  %v2357_v0 = vld [vmem:[#allocation2 + $0x1b8] sm:$0xff] }
 0x2f4   : > { %v7942_v40 = vadd.f32 %v5646_v13, %v2131_v60  ;;  %v7945_v8 = vadd.f32 %v5647_v42, %v2118_v17  ;;  %4891 = vrot.lane.b32.xlu2 %v7918_v23, %s5675_s26  ;;  %4911 = vrot.lane.b32.xlu1 %v7810_v50, %s5675_s26  ;;  %v7956_v7 = vpack.i.bf16 %v7936_v12, %v7922_v57  ;;  %v2566_v17 = vrot.slane %v7711_v4, 1 }
 0x2f5   : > { %v2582_v51 = vsel %vm688_vm1, %v2580_v36, %v2581_v14  ;;  %v2584_v39 = vsel %vm688_vm1, %v2581_v14, %v2583_v45  ;;  %v2565_v36 = vrot.slane %v7709_v21, 1  ;;  %v7966_v14 = vld [vmem:[#allocation2 + $0x1a8] sm:$0xff]  ;;  %v2618_v46 = vrot.slane %v2357_v0, 1 }
 0x2f6   : > { %9894 = vst [vmem:[#allocation92_spill] sm:$0xff] %v7942_v40  ;;  %v2200_v42 = vmul.f32 %v7553_v20, %v7942_v40  ;;  %v2187_v56 = vmul.f32 %v7553_v20, %v7945_v8  ;;  %v1996_v9 = vpop.f32.mrf.mxu2  ;;  %v1963_v60 = vpop.f32.mrf.mxu0  ;;  %v7968_v13 = vpack.i.bf16 %v2584_v39, %v2582_v51  ;;  %v2615_v39 = vrot.slane %v7966_v14, 1 }
 0x2f7   : > { %9895 = vst [vmem:[#allocation48_spill] sm:$0xff] %v7945_v8  ;;  %v2035_v5 = vmul.f32 %v7535_v61, %v1996_v9  ;;  %v2022_v45 = vmul.f32 %v7535_v61, %v1963_v60 }
 0x2f8   : > { %9896 = vst [vmem:[#allocation54_spill] sm:$0xff] %v7956_v7  ;;  %v5594_v49 = vpop.eup %5593  ;;  %v2233_v40 = vadd.f32 %v7562_v3, %v2200_v42  ;;  %v2220_v32 = vadd.f32 %v7562_v3, %v2187_v56 }
 0x2f9   : > { %9897 = vst [vmem:[#allocation7_spill] sm:$0xff] %v7968_v13  ;;  %v2356_v8 = vld [vmem:[#allocation2 + $0x1b0] sm:$0xff]  ;;  %v5596_v22 = vpop.eup %5595  ;;  %vm2067_vm15 = vcmp.ge.f32.partialorder %v2035_v5, 0.0  ;;  %v2100_v9 = vmul.f32 %v7544_v53, %v2035_v5  ;;  %vm2054_vm12 = vcmp.ge.f32.partialorder %v2022_v45, 0.0  ;;  %v2087_v60 = vmul.f32 %v7544_v53, %v2022_v45 }
 0x2fa   : > { %2296 = vst.msk [vmem:[#allocation2 + $0x1c8] sm:$0xff] %vm199_vm0, %v5594_v49  ;;  %5597 = vtanh.f32 %v2233_v40  ;;  %v7977_v51 = vpack.i.bf16 %v2356_v8, %v7966_v14  ;;  %v2616_v0 = vrot.slane %v2356_v8, 1  ;;  %v9565_v49 = vrot.slane %v7966_v14, 7 }
 0x2fb   : > { %2283 = vst.msk [vmem:[#allocation2 + $0xf0] sm:$0xff] %vm199_vm0, %v5596_v22  ;;  %5599 = vtanh.f32 %v2220_v32  ;;  %v2132_v42 = vsel %vm2067_vm15, %v2035_v5, %v2100_v9  ;;  %v2119_v56 = vsel %vm2054_vm12, %v2022_v45, %v2087_v60  ;;  %v2490_v40 = vrot.slane %v2356_v8, 7  ;;  %v2333_v45 = vld [vmem:[#allocation2 + $0xf8] sm:$0xff] }
 0x2fc   : > { %v7982_v52 = vadd.f32 %v5648_v59, %v2132_v42  ;;  %v7985_v24 = vadd.f32 %v5649_v10, %v2119_v56  ;;  %4901 = vrot.lane.b32.xlu0 %v7977_v51, %s5674_s17  ;;  %4936 = vrot.lane.b32.xlu1 %v7814_v18, %s5675_s26  ;;  %v2617_v22 = vsel %vm688_vm1, %v2615_v39, %v2616_v0  ;;  %v2423_v32 = vrot.slane %v7589_v35, 7  ;;  %v8014_v42 = vld [vmem:[#allocation2 + $0xe8] sm:$0xff] }
 0x2fd   : > { %4916 = vrot.lane.b32.xlu2 %v7890_v34, %s5675_s26  ;;  %v2567_v59 = vsel %vm688_vm1, %v2565_v36, %v2566_v17  ;;  %v2569_v5 = vsel %vm688_vm1, %v2566_v17, %v2568_v58  ;;  %v2619_v10 = vsel %vm688_vm1, %v2616_v0, %v2618_v46  ;;  %v8005_v35 = vsel %vm559_vm2, %v9565_v49, %v2490_v40  ;;  %v5650_v49 = vld [vmem:[%s5834_s21 + $0xe8] sm:$0xff] }
 0x2fe   : > { %9898 = vst [vmem:[#allocation17_spill] sm:$0xff] %v7982_v52  ;;  %v2201_v9 = vmul.f32 %v7553_v20, %v7982_v52  ;;  %v2188_v60 = vmul.f32 %v7553_v20, %v7985_v24  ;;  %v1998_v39 = vpop.f32.mrf.mxu2  ;;  %v8008_v36 = vpack.i.bf16 %v2619_v10, %v2617_v22  ;;  %v8012_v0 = vpack.i.bf16 %v2569_v5, %v2567_v59 }
 0x2ff   : > { %9899 = vst [vmem:[#allocation57_spill] sm:$0xff] %v7985_v24  ;;  %v2036_v8 = vmul.f32 %v7535_v61, %v1998_v39  ;;  %v2588_v56 = vrot.slane %v2333_v45, 1  ;;  %v2302_v61 = vld [vmem:[#allocation2] sm:$0xff]  ;;  %v9901_v22 = vrot.slane %v7591_v37, 7  ;;  %v2361_v37 = vld [vmem:[#allocation2 + $0x1d8] sm:$0xff]  ;;  %v2595_v18 = vrot.slane %v7740_v62, 1 }
 0x300   : > { %9900 = vst [vmem:[#allocation60_spill] sm:$0xff] %v8008_v36  ;;  %v5598_v58 = vpop.eup %5597  ;;  %v2234_v46 = vadd.f32 %v7562_v3, %v2201_v9  ;;  %v2221_v17 = vadd.f32 %v7562_v3, %v2188_v60  ;;  %v4837_v9 = vpop.permute.xlu2 %4836  ;;  %v2422_v59 = vrot.slane %v2302_v61, 7 }
 0x301   : > { %v5600_v24 = vpop.eup %5599  ;;  %2297 = vst.msk [vmem:[#allocation2 + $0x1d0] sm:$0xff] %vm199_vm0, %v5598_v58  ;;  %vm2068_vm13 = vcmp.ge.f32.partialorder %v2036_v8, 0.0  ;;  %v2101_v40 = vmul.f32 %v7544_v53, %v2036_v8  ;;  %v2426_v10 = vsel %vm559_vm2, %v2423_v32, %v9901_v22  ;;  %v4839_v5 = vunpack.i.h.bf16 %v4837_v9 }
 0x302   : > { %v8021_v39 = vld [vmem:[#allocation2 + $0xf0] sm:$0xff]  ;;  %2284 = vst.msk [vmem:[#allocation2 + $0x108] sm:$0xff] %vm199_vm0, %v5600_v24  ;;  %5601 = vtanh.f32 %v2234_v46  ;;  %v4838_v45 = vunpack.i.l.bf16 %v4837_v9  ;;  %v2585_v58 = vrot.slane %v8014_v42, 1  ;;  %v2424_v22 = vsel %vm559_vm2, %v2422_v59, %v2423_v32  ;;  %v2341_v46 = vld [vmem:[#allocation2 + $0x138] sm:$0xff]  ;;  %v5651_v9 = vld [vmem:[%s9403_s3 + $0x2] ss:$0 sm:$0xff] }
 0x303   : > { %5603 = vtanh.f32 %v2221_v17  ;;  %v2133_v60 = vsel %vm2068_vm13, %v2036_v8, %v2101_v40  ;;  %v2586_v53 = vrot.slane %v8021_v39, 1  ;;  %v8033_v24 = vsel %vm199_vm0, %v2426_v10, %v4839_v5  ;;  %v8037_v8 = vld [vmem:[#allocation2 + $0x1c8] sm:$0xff] }
 0x304   : > { %v8027_v52 = vadd.f32 %v5650_v49, %v2133_v60  ;;  %4906 = vrot.lane.b32.xlu0 %v8012_v0, %s5675_s26  ;;  %v8040_v17 = vsel %vm199_vm0, %v2424_v22, %v4838_v45  ;;  %v8048_v10 = vpack.i.bf16 %v8021_v39, %v8014_v42  ;;  %v2623_v5 = vrot.slane %v2361_v37, 1 }
 0x305   : > { %4921 = vrot.lane.b32.xlu2 %v7956_v7, %s5674_s17  ;;  %v2587_v49 = vsel %vm688_vm1, %v2585_v58, %v2586_v53  ;;  %v2589_v40 = vsel %vm688_vm1, %v2586_v53, %v2588_v56  ;;  %v2598_v53 = vrot.slane %v2341_v46, 1  ;;  %v2596_v46 = vrot.slane %v7729_v27, 1 }
 0x306   : > { %9902 = vst [vmem:[#allocation62_spill] sm:$0xff] %v8027_v52  ;;  %v2202_v61 = vmul.f32 %v7553_v20, %v8027_v52  ;;  %v2001_v32 = vpop.f32.mrf.mxu2  ;;  %v8053_v45 = vpack.i.bf16 %v2589_v40, %v2587_v49  ;;  %v2620_v20 = vrot.slane %v8037_v8, 1  ;;  %v5653_v52 = vld [vmem:[%s5834_s21 + $0xf0] sm:$0xff] }
 0x307   : > { %9903 = vst [vmem:[#allocation40_spill] sm:$0xff] %v8048_v10  ;;  %v2037_v59 = vmul.f32 %v5651_v9, %v2001_v32  ;;  %v5652_v32 = vld [vmem:[%s9403_s3 + $0x3] ss:$0 sm:$0xff] }
 0x308   : > { %9904 = vst [vmem:[#allocation39_spill] sm:$0xff] %v8053_v45  ;;  %v5602_v60 = vpop.eup %5601  ;;  %v2235_v58 = vadd.f32 %v7562_v3, %v2202_v61  ;;  %v8056_v56 = vld [vmem:[#allocation2 + $0x1d0] sm:$0xff] }
 0x309   : > { %v5604_v22 = vpop.eup %5603  ;;  %2298 = vst.msk [vmem:[#allocation2 + $0x1e8] sm:$0xff] %vm199_vm0, %v5602_v60  ;;  %vm2069_vm14 = vcmp.ge.f32.partialorder %v2037_v59, 0.0  ;;  %v2102_v37 = vmul.f32 %v5652_v32, %v2037_v59  ;;  %v8065_v49 = vpack.i.bf16 %v8056_v56, %v8037_v8  ;;  %v2621_v3 = vrot.slane %v8056_v56, 1 }
 0x30a   : > { %2285 = vst.msk [vmem:[#allocation2 + $0x110] sm:$0xff] %vm199_vm0, %v5604_v22  ;;  %5605 = vtanh.f32 %v2235_v58  ;;  %v2337_v58 = vld [vmem:[#allocation2 + $0x118] sm:$0xff] }
 0x30b   : > { %9905 = vst [vmem:[#allocation70_spill] sm:$0xff] %v8065_v49  ;;  %v2134_v40 = vsel %vm2069_vm14, %v2037_v59, %v2102_v37  ;;  %4946 = vrot.lane.b32.xlu1 %v8065_v49, %s5674_s17  ;;  %v2622_v61 = vsel %vm688_vm1, %v2620_v20, %v2621_v3  ;;  %v2624_v60 = vsel %vm688_vm1, %v2621_v3, %v2623_v5  ;;  %v5654_v20 = vld [vmem:[%s9403_s3 + $0x4] ss:$0 sm:$0xff] }
 0x30c   : > { %v8075_v15 = vadd.f32 %v5653_v52, %v2134_v40  ;;  %4926 = vrot.lane.b32.xlu0 %v7968_v13, %s5675_s26  ;;  %v8082_v59 = vpack.i.bf16 %v2624_v60, %v2622_v61  ;;  %v2597_v52 = vsel %vm688_vm1, %v2595_v18, %v2596_v46  ;;  %v2599_v3 = vsel %vm688_vm1, %v2596_v46, %v2598_v53  ;;  %v8090_v40 = vld [vmem:[#allocation2 + $0x108] sm:$0xff]  ;;  %v5655_v61 = vld [vmem:[%s9403_s3 + $0x5] ss:$0 sm:$0xff] }
 0x30d   : > { %4941 = vrot.lane.b32.xlu2 %v7849_v33, %s5675_s26  ;;  %v2593_v33 = vrot.slane %v2337_v58, 1  ;;  %v8098_v18 = vpack.i.bf16 %v2599_v3, %v2597_v52 }
 0x30e   : > { %9906 = vst [vmem:[#allocation94_spill] sm:$0xff] %v8075_v15  ;;  %v2203_v5 = vmul.f32 %v5654_v20, %v8075_v15  ;;  %v2003_v22 = vpop.f32.mrf.mxu2 }
 0x30f   : > { %9907 = vst [vmem:[#allocation74_spill] sm:$0xff] %v8082_v59  ;;  %v2038_v37 = vmul.f32 %v5651_v9, %v2003_v22  ;;  %v2590_v9 = vrot.slane %v8090_v40, 1 }
 0x310   : > { %v5606_v13 = vpop.eup %5605  ;;  %v2236_v60 = vadd.f32 %v5655_v61, %v2203_v5  ;;  %9908 = vst [vmem:[#allocation81_spill] sm:$0xff] %v8098_v18 }
 0x311   : > { %2299 = vst.msk [vmem:[#allocation2 + $0x1f0] sm:$0xff] %vm199_vm0, %v5606_v13  ;;  %vm2070_vm15 = vcmp.ge.f32.partialorder %v2038_v37, 0.0  ;;  %v2103_v15 = vmul.f32 %v5652_v32, %v2038_v37  ;;  %v8096_v50 = vld [vmem:[#allocation2 + $0x110] sm:$0xff]  ;;  %v5656_v13 = vld [vmem:[%s5834_s21 + $0xf8] sm:$0xff] }
 0x312   : > { %5607 = vtanh.f32 %v2236_v60  ;;  %v2591_v53 = vrot.slane %v8096_v50, 1  ;;  %v8106_v58 = vpack.i.bf16 %v8096_v50, %v8090_v40  ;;  %v8120_v60 = vld [vmem:[#allocation2 + $0x1e8] sm:$0xff] }
 0x313   : > { %v2135_v46 = vsel %vm2070_vm15, %v2038_v37, %v2103_v15  ;;  %4961 = vrot.lane.b32.xlu1 %v8008_v36, %s5675_s26  ;;  %v2322_v36 = vld [vmem:[#allocation2 + $0xa0] sm:$0xff] }
 0x314   : > { %9909 = vst [vmem:[#allocation77_spill] sm:$0xff] %v8106_v58  ;;  %v8109_v5 = vadd.f32 %v5656_v13, %v2135_v46  ;;  %4931 = vrot.lane.b32.xlu0 %v8098_v18, %s5675_s26  ;;  %v2592_v32 = vsel %vm688_vm1, %v2590_v9, %v2591_v53  ;;  %v2594_v22 = vsel %vm688_vm1, %v2591_v53, %v2593_v33  ;;  %v2306_v13 = vld [vmem:[#allocation2 + $0x20] sm:$0xff]  ;;  %v2463_v18 = vrot.slane %v8090_v40, 7 }
 0x315   : > { %4966 = vrot.lane.b32.xlu2 %v8082_v59, %s5675_s26  ;;  %v8117_v15 = vpack.i.bf16 %v2594_v22, %v2592_v32  ;;  %v2310_v33 = vld [vmem:[#allocation2 + $0x40] sm:$0xff]  ;;  %v2427_v53 = vrot.slane %v2306_v13, 7  ;;  %v2433_v32 = vrot.slane %v7666_v47, 7  ;;  %v2365_v13 = vld [vmem:[#allocation2 + $0x1f8] sm:$0xff] }
 0x316   : > { %9910 = vst [vmem:[#allocation88_spill] sm:$0xff] %v8109_v5  ;;  %v2204_v52 = vmul.f32 %v5654_v20, %v8109_v5  ;;  %v2435_v20 = vrot.slane %v7668_v16, 7 }
 0x317   : > { %9911 = vst [vmem:[#allocation83_spill] sm:$0xff] %v8117_v15 }
 0x318   : > { %v5608_v37 = vpop.eup %5607  ;;  %v2237_v3 = vadd.f32 %v5655_v61, %v2204_v52  ;;  %v8122_v46 = vld [vmem:[#allocation2 + $0x1f0] sm:$0xff]  ;;  %v2432_v61 = vrot.slane %v2310_v33, 7  ;;  %v9913_v52 = vrot.slane %v7601_v43, 7  ;;  %v2628_v33 = vrot.slane %v2365_v13, 1 }
 0x319   : > { %2300 = vst.msk [vmem:[#allocation2 + $0x208] sm:$0xff] %vm199_vm0, %v5608_v37  ;;  %v8127_v9 = vpack.i.bf16 %v8122_v46, %v8120_v60  ;;  %v2626_v43 = vrot.slane %v8122_v46, 1  ;;  %v2440_v13 = vrot.slane %v7711_v4, 7  ;;  %v2447_v4 = vrot.slane %v2322_v36, 7 }
 0x31a   : > { %5609 = vtanh.f32 %v2237_v3  ;;  %v8140_v37 = vsel %vm559_vm2, %v2427_v53, %v9913_v52  ;;  %v8143_v3 = vsel %vm559_vm2, %v2433_v32, %v2435_v20  ;;  %v8149_v5 = vsel %vm559_vm2, %v2432_v61, %v2433_v32  ;;  %v2318_v32 = vld [vmem:[#allocation2 + $0x80] sm:$0xff] }
 0x31b   : > { %9912 = vst [vmem:[#allocation49_spill] sm:$0xff] %v8127_v9  ;;  %4971 = vrot.lane.b32.xlu1 %v8053_v45, %s5675_s26  ;;  %v4985_v16 = vpack.i.bf16 %v7635_v26, %v8140_v37  ;;  %v8153_v47 = vpack.i.bf16 %v8143_v3, %v8149_v5  ;;  %v2625_v53 = vrot.slane %v8120_v60, 1  ;;  %v2629_v61 = vsel %vm688_vm1, %v2626_v43, %v2628_v33 }
 0x31c   : > { %4951 = vrot.lane.b32.xlu0 %v8048_v10, %s5674_s17  ;;  %v9918_v36 = vrot.slane %v7842_v48, 7 }
 0x31d   : > { %4976 = vrot.lane.b32.xlu2 %v8127_v9, %s5674_s17  ;;  %9914 = vst [vmem:[#allocation91_spill] sm:$0xff] %v8153_v47  ;;  %v2627_v20 = vsel %vm688_vm1, %v2625_v53, %v2626_v43  ;;  %v2443_v53 = vrot.slane %v7773_v25, 7  ;;  %v2438_v43 = vrot.slane %v7709_v21, 7  ;;  %v2330_v21 = vld [vmem:[#allocation2 + $0xe0] sm:$0xff] }
 0x31e   : > { %v8164_v52 = vpack.i.bf16 %v2629_v61, %v2627_v20  ;;  %v2457_v48 = vrot.slane %v2330_v21, 7 }
 0x31f   : > { %v8180_v33 = vsel %vm559_vm2, %v2438_v43, %v2440_v13  ;;  %v2455_v13 = vrot.slane %v7936_v12, 7 }
 0x320   : > { %v5610_v22 = vpop.eup %5609  ;;  %9915 = vst [vmem:[#allocation30_spill] sm:$0xff] %v8164_v52 }
 0x321   : > { %2301 = vst.msk [vmem:[#allocation2 + $0x210] sm:$0xff] %vm199_vm0, %v5610_v22  ;;  %v2314_v22 = vld [vmem:[#allocation2 + $0x60] sm:$0xff] }
 0x322   : > { %v2437_v59 = vrot.slane %v2314_v22, 7  ;;  %v8199_v22 = vsel %vm559_vm2, %v2447_v4, %v9918_v36  ;;  %v2458_v4 = vrot.slane %v8014_v42, 7 }
 0x323   : > { %4986 = vrot.lane.b32.xlu1 %v4985_v16, %s5676_s27  ;;  %v2445_v16 = vrot.slane %v7781_v1, 7 }
 0x324   : > { %4956 = vrot.lane.b32.xlu0 %v7929_v2, %s5675_s26  ;;  %v8186_v61 = vsel %vm559_vm2, %v2437_v59, %v2438_v43  ;;  %v8206_v59 = vpack.i.bf16 %v7874_v29, %v8199_v22  ;;  %v8209_v43 = vpop.permute.xlu2 %4851  ;;  %v8228_v42 = vsel %vm559_vm2, %v2457_v48, %v2458_v4  ;;  %v2470_v48 = vrot.slane %v7729_v27, 7 }
 0x325   : > { %4991 = vrot.lane.b32.xlu2 %v8153_v47, %s5676_s27  ;;  %v2442_v47 = vrot.slane %v2318_v32, 7  ;;  %v8177_v1 = vsel %vm559_vm2, %v2443_v53, %v2445_v16  ;;  %v8194_v32 = vpack.i.bf16 %v8180_v33, %v8186_v61  ;;  %v2326_v16 = vld [vmem:[#allocation2 + $0xc0] sm:$0xff]  ;;  %9921 = vst [vmem:[#allocation64_spill] sm:$0xff] %v8228_v42 }
 0x326   : > { %9919 = vst [vmem:[#allocation11_spill] sm:$0xff] %v8206_v59  ;;  %v2452_v36 = vrot.slane %v2326_v16, 7 }
 0x327   : > { %v8183_v20 = vsel %vm559_vm2, %v2442_v47, %v2443_v53  ;;  %9917 = vst [vmem:[#allocation8_spill] sm:$0xff] %v8194_v32  ;;  %v2460_v47 = vrot.slane %v8021_v39, 7  ;;  %v2334_v53 = vld [vmem:[#allocation2 + $0x100] sm:$0xff]  ;;  %v2465_v39 = vrot.slane %v8096_v50, 7 }
 0x328   : > { %v8190_v25 = vpack.i.bf16 %v8177_v1, %v8183_v20  ;;  %v2462_v2 = vrot.slane %v2334_v53, 7  ;;  %v2338_v53 = vld [vmem:[#allocation2 + $0x120] sm:$0xff]  ;;  %v2368_v45 = vld [vmem:[#allocation2 + $0x210] sm:$0xff] }
 0x329   : > { %v8221_v12 = vsel %vm559_vm2, %v2458_v4, %v2460_v47  ;;  %v8231_v50 = vsel %vm559_vm2, %v2463_v18, %v2465_v39  ;;  %v2342_v47 = vld [vmem:[#allocation2 + $0x140] sm:$0xff] }
 0x32a   : > { %9916 = vst [vmem:[#allocation5_spill] sm:$0xff] %v8190_v25  ;;  %v2346_v4 = vld [vmem:[#allocation2 + $0x160] sm:$0xff]  ;;  %v2472_v39 = vrot.slane %v2342_v47, 7 }
 0x32b   : > { %5001 = vrot.lane.b32.xlu1 %v8106_v58, %s5674_s17  ;;  %9920 = vst [vmem:[#allocation16_spill] sm:$0xff] %v8221_v12 }
 0x32c   : > { %4981 = vrot.lane.b32.xlu0 %v8164_v52, %s5675_s26  ;;  %v2453_v52 = vrot.slane %v7922_v57, 7  ;;  %9922 = vst [vmem:[#allocation29_spill] sm:$0xff] %v8231_v50  ;;  %v8238_v57 = vpack.i.bf16 %v8221_v12, %v8228_v42  ;;  %v2367_v12 = vld [vmem:[#allocation2 + $0x208] sm:$0xff] }
 0x32d   : > { %5011 = vrot.lane.b32.xlu2 %v8117_v15, %s5675_s26  ;;  %v9933_v15 = vrot.slane %v7966_v14, 7 }
 0x32e   : > { %v8225_v21 = vsel %vm559_vm2, %v2453_v52, %v2455_v13  ;;  %v8234_v16 = vsel %vm559_vm2, %v2452_v36, %v2453_v52  ;;  %9923 = vst [vmem:[#allocation68_spill] sm:$0xff] %v8238_v57  ;;  %v8245_v13 = vsel %vm559_vm2, %v2462_v2, %v2463_v18  ;;  %v2467_v36 = vrot.slane %v2338_v53, 7  ;;  %v8259_v2 = vpop.permute.xlu2 %4856  ;;  %v2354_v53 = vld [vmem:[#allocation2 + $0x1a0] sm:$0xff] }
 0x32f   : > { %v8242_v40 = vpack.i.bf16 %v8225_v21, %v8234_v16  ;;  %9925 = vst [vmem:[#allocation37_spill] sm:$0xff] %v8245_v13  ;;  %v8252_v52 = vpack.i.bf16 %v8231_v50, %v8245_v13  ;;  %v2477_v18 = vrot.slane %v2346_v4, 7  ;;  %v2493_v13 = vrot.slane %v8037_v8, 7 }
 0x331   : > { %9924 = vst [vmem:[#allocation38_spill] sm:$0xff] %v8242_v40 }
 0x332   : > { %9926 = vst [vmem:[#allocation71_spill] sm:$0xff] %v8252_v52 }
 0x333   : > { %5006 = vrot.lane.b32.xlu1 %v8190_v25, %s5676_s27  ;;  %v8218_v25 = vpop.permute.xlu0 %4841 }
 0x334   : > { %4996 = vrot.lane.b32.xlu0 %v8194_v32, %s5676_s27  ;;  %v9927_v32 = vrot.slane %v7738_v30, 7  ;;  %v2350_v30 = vld [vmem:[#allocation2 + $0x180] sm:$0xff] }
 0x335   : > { %5016 = vrot.lane.b32.xlu2 %v8206_v59, %s5676_s27  ;;  %v2468_v59 = vrot.slane %v7740_v62, 7 }
 0x336   : > { %v8269_v50 = vsel %vm559_vm2, %v2472_v39, %v9927_v32  ;;  %v2487_v39 = vrot.slane %v2354_v53, 7  ;;  %v2366_v53 = vld [vmem:[#allocation2 + $0x200] sm:$0xff] }
 0x337   : > { %v8272_v47 = vsel %vm559_vm2, %v2467_v36, %v2468_v59  ;;  %v8276_v62 = vpack.i.bf16 %v7769_v31, %v8269_v50  ;;  %v2495_v36 = vrot.slane %v8056_v56, 7 }
 0x339   : > { %9928 = vst [vmem:[#allocation75_spill] sm:$0xff] %v8276_v62  ;;  %v8309_v56 = vsel %vm559_vm2, %v2493_v13, %v2495_v36  ;;  %v2500_v36 = vrot.slane %v8122_v46, 7 }
 0x33a   : > { %9934 = vst [vmem:[#allocation85_spill] sm:$0xff] %v8309_v56 }
 0x33b   : > { %5026 = vrot.lane.b32.xlu1 %v8238_v57, %s5676_s27  ;;  %v8264_v57 = vsel %vm559_vm2, %v2468_v59, %v2470_v48  ;;  %v9930_v48 = vrot.slane %v7808_v19, 7  ;;  %v2358_v59 = vld [vmem:[#allocation2 + $0x1c0] sm:$0xff]  ;;  %v2482_v19 = vrot.slane %v2350_v30, 7  ;;  %v9935_v30 = vrot.slane %v7886_v54, 7 }
 0x33c   : > { %5021 = vrot.lane.b32.xlu0 %v8242_v40, %s5676_s27  ;;  %v4847_v40 = vpop.permute.xlu1 %4846 }
 0x33d   : > { %5031 = vrot.lane.b32.xlu2 %v8252_v52, %s5676_s27  ;;  %v8280_v52 = vpack.i.bf16 %v8264_v57, %v8272_v47  ;;  %v8285_v4 = vsel %vm559_vm2, %v2477_v18, %v9930_v48  ;;  %v4848_v42 = vunpack.i.l.bf16 %v4847_v40 }
 0x33e   : > { %v8261_v27 = vpop.permute.xlu0 %4861  ;;  %v8291_v32 = vpack.i.bf16 %v7847_v44, %v8285_v4 }
 0x33f   : > { %9929 = vst [vmem:[#allocation80_spill] sm:$0xff] %v8280_v52 }
 0x340   : > { %9931 = vst [vmem:[#allocation76_spill] sm:$0xff] %v8291_v32 }
 0x343   : > { %5041 = vrot.lane.b32.xlu1 %v8276_v62, %s5676_s27  ;;  %v2492_v62 = vrot.slane %v2358_v59, 7 }
 0x344   : > { %5036 = vrot.lane.b32.xlu0 %v8280_v52, %s5676_s27  ;;  %v8306_v52 = vsel %vm559_vm2, %v2487_v39, %v9933_v15  ;;  %v2362_v15 = vld [vmem:[#allocation2 + $0x1e0] sm:$0xff]  ;;  %v2636_v39 = vrot.slane %v2368_v45, 7 }
 0x345   : > { %5046 = vrot.lane.b32.xlu2 %v8291_v32, %s5676_s27  ;;  %v8314_v32 = vsel %vm559_vm2, %v2482_v19, %v9935_v30  ;;  %v8318_v59 = vpack.i.bf16 %v8005_v35, %v8306_v52  ;;  %v8325_v8 = vsel %vm559_vm2, %v2492_v62, %v2493_v13  ;;  %v2633_v19 = vrot.slane %v2366_v53, 7 }
 0x346   : > { %v8298_v18 = vpop.permute.xlu2 %4886  ;;  %v8300_v48 = vpop.permute.xlu0 %4871  ;;  %9936 = vst [vmem:[#allocation93_spill] sm:$0xff] %v8314_v32  ;;  %v8322_v14 = vpack.i.bf16 %v7927_v28, %v8314_v32  ;;  %v8331_v54 = vpack.i.bf16 %v8309_v56, %v8325_v8  ;;  %v2634_v30 = vrot.slane %v2367_v12, 7  ;;  %v2497_v13 = vrot.slane %v2362_v15, 7 }
 0x347   : > { %9932 = vst [vmem:[#allocation89_spill] sm:$0xff] %v8298_v18  ;;  %v4849_v18 = vunpack.i.h.bf16 %v4847_v40  ;;  %v2498_v62 = vrot.slane %v8120_v60, 7 }
 0x348   : > { %9937 = vst [vmem:[#allocation42_spill] sm:$0xff] %v8318_v59  ;;  %v2635_v40 = vsel %vm559_vm2, %v2633_v19, %v2634_v30 }
 0x349   : > { %9938 = vst [vmem:[#allocation50_spill] sm:$0xff] %v8322_v14  ;;  %v8343_v28 = vsel %vm559_vm2, %v2498_v62, %v2500_v36  ;;  %v3431_v15 = vsel %vm199_vm0, %v8143_v3, %v4849_v18  ;;  %v4843_v18 = vunpack.i.l.bf16 %v8218_v25 }
 0x34a   : > { %9939 = vst [vmem:[#allocation3_spill] sm:$0xff] %v8325_v8  ;;  %v2637_v8 = vsel %vm559_vm2, %v2634_v30, %v2636_v39 }
 0x34b   : > { %5056 = vrot.lane.b32.xlu1 %v8318_v59, %s5676_s27  ;;  %9940 = vst [vmem:[#allocation15_spill] sm:$0xff] %v8331_v54  ;;  %v8359_v36 = vpack.i.bf16 %v2637_v8, %v2635_v40  ;;  %v3428_v40 = vsel %vm199_vm0, %v8140_v37, %v4843_v18  ;;  %v5661_v37 = vld [vmem:[#allocation2 + $0x88] sm:$0xff]  ;;  %v5662_v18 = vld [vmem:[#allocation2 + $0x90] sm:$0xff] }
 0x34c   : > { %5051 = vrot.lane.b32.xlu0 %v8322_v14, %s5676_s27  ;;  %v3430_v14 = vsel %vm199_vm0, %v8149_v5, %v4848_v42  ;;  %v4844_v42 = vunpack.i.h.bf16 %v8218_v25 }
 0x34d   : > { %5061 = vrot.lane.b32.xlu2 %v8331_v54, %s5676_s27  ;;  %9941 = vst [vmem:[#allocation61_spill] sm:$0xff] %v8359_v36 }
 0x34e   : > { %v8339_v59 = vpop.permute.xlu1 %4866  ;;  %v4892_v32 = vpop.permute.xlu2 %4891 }
 0x34f   : > { %v4894_v56 = vunpack.i.h.bf16 %v4892_v32  ;;  %v4893_v46 = vunpack.i.l.bf16 %v4892_v32  ;;  %v4877_v53 = vpop.permute.xlu0 %4876  ;;  %v8357_v32 = vsel %vm559_vm2, %v2497_v13, %v2498_v62 }
 0x350   : > { %v4879_v60 = vunpack.i.h.bf16 %v4877_v53  ;;  %v4878_v54 = vunpack.i.l.bf16 %v4877_v53  ;;  %v8371_v3 = vpack.i.bf16 %v8343_v28, %v8357_v32 }
 0x351   : > { %v8351_v34 = vsel %vm1597_vm5, %v3431_v15, %v4894_v56  ;;  %v8354_v39 = vsel %vm1597_vm5, %v3430_v14, %v4893_v46  ;;  %v2369_v56 = vld [vmem:[#allocation2 + $0x218] sm:$0xff]  ;;  %v2639_v14 = vrot.slane %v2367_v12, 1  ;;  %v5657_v15 = vld [vmem:[#allocation2 + $0x68] sm:$0xff] }
 0x352   : > { %v8363_v19 = vsel %vm1597_vm5, %v8033_v24, %v4879_v60  ;;  %v8367_v5 = vsel %vm1597_vm5, %v8040_v17, %v4878_v54  ;;  %9942 = vst [vmem:[#allocation65_spill] sm:$0xff] %v8371_v3  ;;  %v8379_v24 = vpack.i.bf16 %v2368_v45, %v2367_v12  ;;  %v2640_v17 = vrot.slane %v2368_v45, 1  ;;  %v5658_v60 = vld [vmem:[#allocation2 + $0x70] sm:$0xff] }
 0x353   : > { %5071 = vrot.lane.b32.xlu1 %v8359_v36, %s5676_s27  ;;  %v2642_v8 = vrot.slane %v2369_v56, 1  ;;  %v3429_v45 = vsel %vm199_vm0, %v7635_v26, %v4844_v42  ;;  %v8399_v56 = vpack.i.bf16 %v5658_v60, %v5657_v15  ;;  %v8405_v26 = vpack.i.bf16 %v5662_v18, %v5661_v37 }
 0x354   : > { %5066 = vrot.lane.b32.xlu0 %v8371_v3, %s5676_s27  ;;  %9943 = vst [vmem:[#allocation41_spill] sm:$0xff] %v8379_v24  ;;  %v2641_v30 = vsel %vm688_vm1, %v2639_v14, %v2640_v17  ;;  %v5659_v14 = vld [vmem:[#allocation2 + $0x48] sm:$0xff] }
 0x355   : > { %5076 = vrot.lane.b32.xlu2 %v7618_v41, %s5677_s28  ;;  %v2643_v25 = vsel %vm688_vm1, %v2640_v17, %v2642_v8  ;;  %v5660_v17 = vld [vmem:[#allocation2 + $0x50] sm:$0xff] }
 0x356   : > { %v4882_v54 = vpop.permute.xlu1 %4881  ;;  %v8387_v53 = vpack.i.bf16 %v2643_v25, %v2641_v30  ;;  %v8401_v8 = vpack.i.bf16 %v5660_v17, %v5659_v14  ;;  %v4874_v30 = vunpack.i.h.bf16 %v8300_v48  ;;  %v4873_v25 = vunpack.i.l.bf16 %v8300_v48  ;;  %v5663_v14 = vld [vmem:[#allocation2 + $0x130] sm:$0xff]  ;;  %v5664_v17 = vld [vmem:[#allocation2 + $0x128] sm:$0xff] }
 0x357   : > { %v4884_v13 = vunpack.i.h.bf16 %v4882_v54  ;;  %v4883_v62 = vunpack.i.l.bf16 %v4882_v54  ;;  %v8385_v46 = vpop.permute.xlu2 %4916  ;;  %v8425_v37 = vpack.i.bf16 %v5663_v14, %v5664_v17 }
 0x358   : > { %9944 = vst [vmem:[#allocation67_spill] sm:$0xff] %v8387_v53  ;;  %v3434_v48 = vsel %vm199_vm0, %v8183_v20, %v4873_v25  ;;  %v3435_v18 = vsel %vm199_vm0, %v8177_v1, %v4874_v30  ;;  %v4863_v1 = vunpack.i.l.bf16 %v8261_v27 }
 0x359   : > { %v8394_v12 = vsel %vm1597_vm5, %v3429_v45, %v4884_v13  ;;  %v8397_v41 = vsel %vm1597_vm5, %v3428_v40, %v4883_v62  ;;  %v4869_v13 = vunpack.i.h.bf16 %v8339_v59  ;;  %v4868_v62 = vunpack.i.l.bf16 %v8339_v59  ;;  %9945 = vst [vmem:[#allocation28_spill] sm:$0xff] %v8425_v37 }
 0x35b   : > { %5086 = vrot.lane.b32.xlu1 %v8399_v56, %s5677_s28  ;;  %v3449_v59 = vsel %vm199_vm0, %v7847_v44, %v4869_v13  ;;  %v4864_v44 = vunpack.i.h.bf16 %v8261_v27 }
 0x35c   : > { %5081 = vrot.lane.b32.xlu0 %v8401_v8, %s5677_s28 }
 0x35d   : > { %5091 = vrot.lane.b32.xlu2 %v8405_v26, %s5677_s28 }
 0x35e   : > { %v8411_v42 = vpop.permute.xlu1 %4896 }
 0x35f   : > { %v8413_v54 = vpop.permute.xlu2 %4921 }
 0x363   : > { %5101 = vrot.lane.b32.xlu1 %v7956_v7, %s5677_s28 }
 0x364   : > { %5096 = vrot.lane.b32.xlu0 %v7882_v63, %s5677_s28 }
 0x365   : > { %5106 = vrot.lane.b32.xlu2 %v8048_v10, %s5677_s28  ;;  %v3448_v10 = vsel %vm199_vm0, %v8285_v4, %v4868_v62 }
 0x366   : > { %v4912_v40 = vpop.permute.xlu1 %4911 }
 0x367   : > { %v4914_v45 = vunpack.i.h.bf16 %v4912_v40  ;;  %v4913_v15 = vunpack.i.l.bf16 %v4912_v40  ;;  %v4942_v60 = vpop.permute.xlu2 %4941 }
 0x368   : > { %v4944_v53 = vunpack.i.h.bf16 %v4942_v60  ;;  %v4943_v36 = vunpack.i.l.bf16 %v4942_v60 }
 0x369   : > { %v8436_v40 = vsel %vm1597_vm5, %v3435_v18, %v4914_v45  ;;  %v8439_v14 = vsel %vm1597_vm5, %v3434_v48, %v4913_v15  ;;  %v4854_v45 = vunpack.i.h.bf16 %v8209_v43  ;;  %v4853_v15 = vunpack.i.l.bf16 %v8209_v43 }
 0x36a   : > { %v8442_v17 = vsel %vm1597_vm5, %v3449_v59, %v4944_v53  ;;  %v8445_v20 = vsel %vm1597_vm5, %v3448_v10, %v4943_v36  ;;  %v3447_v10 = vsel %vm199_vm0, %v7769_v31, %v4864_v44  ;;  %v3446_v36 = vsel %vm199_vm0, %v8269_v50, %v4863_v1 }
 0x36b   : > { %5116 = vrot.lane.b32.xlu1 %v8425_v37, %s5677_s28  ;;  %v3432_v18 = vsel %vm199_vm0, %v8186_v61, %v4853_v15  ;;  %v3433_v59 = vsel %vm199_vm0, %v8180_v33, %v4854_v45  ;;  %v4899_v1 = vunpack.i.h.bf16 %v8411_v42  ;;  %v4923_v61 = vunpack.i.l.bf16 %v8413_v54 }
 0x36c   : > { %5111 = vrot.lane.b32.xlu0 %v8106_v58, %s5677_s28 }
 0x36d   : > { %5121 = vrot.lane.b32.xlu2 %v7745_v38, %s5677_s28 }
 0x36e   : > { %v4902_v4 = vpop.permute.xlu0 %4901  ;;  %v4937_v30 = vpop.permute.xlu1 %4936 }
 0x36f   : > { %v4939_v53 = vunpack.i.h.bf16 %v4937_v30  ;;  %v4938_v25 = vunpack.i.l.bf16 %v4937_v30  ;;  %v8455_v13 = vpop.permute.xlu2 %4966  ;;  %v4898_v30 = vunpack.i.l.bf16 %v8411_v42  ;;  %v3437_v42 = vsel %vm199_vm0, %v7874_v29, %v4899_v1 }
 0x371   : > { %v8462_v27 = vsel %vm1597_vm5, %v3447_v10, %v4939_v53  ;;  %v8465_v62 = vsel %vm1597_vm5, %v3446_v36, %v4938_v25  ;;  %v4924_v53 = vunpack.i.h.bf16 %v8413_v54  ;;  %v3436_v10 = vsel %vm199_vm0, %v8199_v22, %v4898_v30 }
 0x372   : > { %v3438_v54 = vsel %vm199_vm0, %v8234_v16, %v4923_v61  ;;  %v4903_v30 = vunpack.i.l.bf16 %v4902_v4  ;;  %v4859_v61 = vunpack.i.h.bf16 %v8259_v2 }
 0x373   : > { %5131 = vrot.lane.b32.xlu1 %v7897_v55, %s5677_s28 }
 0x374   : > { %5126 = vrot.lane.b32.xlu0 %v7821_v6, %s5677_s28 }
 0x375   : > { %5136 = vrot.lane.b32.xlu2 %v7977_v51, %s5677_s28 }
 0x376   : > { %v4907_v31 = vpop.permute.xlu0 %4906 }
 0x377   : > { %v4909_v50 = vunpack.i.h.bf16 %v4907_v31  ;;  %v4908_v60 = vunpack.i.l.bf16 %v4907_v31  ;;  %v8475_v48 = vpop.permute.xlu2 %4976  ;;  %v3439_v31 = vsel %vm199_vm0, %v8225_v21, %v4924_v53  ;;  %v4904_v21 = vunpack.i.h.bf16 %v4902_v4 }
 0x379   : > { %v8482_v44 = vsel %vm1597_vm5, %v3433_v59, %v4909_v50  ;;  %v8485_v43 = vsel %vm1597_vm5, %v3432_v18, %v4908_v60  ;;  %v4919_v18 = vunpack.i.h.bf16 %v8385_v46  ;;  %v4918_v59 = vunpack.i.l.bf16 %v8385_v46 }
 0x37b   : > { %5146 = vrot.lane.b32.xlu1 %v8127_v9, %s5677_s28  ;;  %v8526_v46 = vsel %vm1597_vm5, %v3436_v10, %v4918_v59  ;;  %v8529_v53 = vsel %vm1597_vm5, %v3437_v42, %v4919_v18  ;;  %v3453_v10 = vsel %vm199_vm0, %v8005_v35, %v4904_v21  ;;  %v3452_v42 = vsel %vm199_vm0, %v8306_v52, %v4903_v30  ;;  %v9960_v9 = vld [vmem:[#allocation37_spill] sm:$0xff] }
 0x37c   : > { %5141 = vrot.lane.b32.xlu0 %v8065_v49, %s5677_s28 }
 0x37d   : > { %5151 = vrot.lane.b32.xlu2 %v8379_v24, %s5677_s28  ;;  %v8497_v33 = vpop.permute.xlu1 %4946 }
 0x37e   : > { %v4927_v25 = vpop.permute.xlu0 %4926 }
 0x37f   : > { %v4992_v36 = vpop.permute.xlu2 %4991  ;;  %v4929_v45 = vunpack.i.h.bf16 %v4927_v25  ;;  %v4928_v15 = vunpack.i.l.bf16 %v4927_v25 }
 0x380   : > { %v4994_v50 = vunpack.i.h.bf16 %v4992_v36  ;;  %v4993_v60 = vunpack.i.l.bf16 %v4992_v36 }
 0x381   : > { %v8510_v22 = vsel %vm1597_vm5, %v3438_v54, %v4928_v15  ;;  %v8513_v29 = vsel %vm1597_vm5, %v3439_v31, %v4929_v45 }
 0x382   : > { %v8517_v1 = vsel %vm1630_vm4, %v8394_v12, %v4994_v50  ;;  %v8521_v16 = vsel %vm1630_vm4, %v8397_v41, %v4993_v60  ;;  %v4858_v12 = vunpack.i.l.bf16 %v8259_v2  ;;  %v9946_v60 = vld [vmem:[#allocation63_spill] sm:$0xff] }
 0x383   : > { %5161 = vrot.lane.b32.xlu1 %v7918_v23, %s5678_s29 }
 0x384   : > { %5156 = vrot.lane.b32.xlu0 %v7630_v11, %s5678_s29  ;;  %v3445_v11 = vsel %vm199_vm0, %v8264_v57, %v4859_v61  ;;  %v3444_v2 = vsel %vm199_vm0, %v8272_v47, %v4858_v12  ;;  %v9947_v57 = vld [vmem:[#allocation24_spill] sm:$0xff]  ;;  %v9948_v47 = vld [vmem:[#allocation7_spill] sm:$0xff] }
 0x385   : > { %5166 = vrot.lane.b32.xlu2 %v8012_v0, %s5678_s29  ;;  %v4962_v41 = vpop.permute.xlu1 %4961 }
 0x386   : > { %v4964_v4 = vunpack.i.h.bf16 %v4962_v41  ;;  %v4963_v25 = vunpack.i.l.bf16 %v4962_v41  ;;  %v4932_v36 = vpop.permute.xlu0 %4931 }
 0x387   : > { %v4934_v45 = vunpack.i.h.bf16 %v4932_v36  ;;  %v4933_v15 = vunpack.i.l.bf16 %v4932_v36  ;;  %v8541_v54 = vpop.permute.xlu2 %5011  ;;  %v9949_v36 = vld [vmem:[#allocation64_spill] sm:$0xff] }
 0x388   : > { %v8548_v31 = vsel %vm1597_vm5, %v3453_v10, %v4964_v4  ;;  %v8551_v50 = vsel %vm1597_vm5, %v3452_v42, %v4963_v25  ;;  %v9950_v42 = vld [vmem:[#allocation16_spill] sm:$0xff] }
 0x389   : > { %v8554_v35 = vsel %vm1597_vm5, %v3445_v11, %v4934_v45  ;;  %v8557_v52 = vsel %vm1597_vm5, %v3444_v2, %v4933_v15 }
 0x38b   : > { %5176 = vrot.lane.b32.xlu1 %v9946_v60, %s5678_s29  ;;  %v9963_v60 = vld [vmem:[#allocation3_spill] sm:$0xff] }
 0x38c   : > { %5171 = vrot.lane.b32.xlu0 %v9947_v57, %s5678_s29 }
 0x38d   : > { %5181 = vrot.lane.b32.xlu2 %v9948_v47, %s5678_s29  ;;  %v4972_v18 = vpop.permute.xlu1 %4971 }
 0x38e   : > { %v4952_v59 = vpop.permute.xlu0 %4951  ;;  %v4974_v21 = vunpack.i.h.bf16 %v4972_v18  ;;  %v4973_v30 = vunpack.i.l.bf16 %v4972_v18 }
 0x38f   : > { %v4954_v61 = vunpack.i.h.bf16 %v4952_v59  ;;  %v4953_v12 = vunpack.i.l.bf16 %v4952_v59  ;;  %v5017_v41 = vpop.permute.xlu2 %5016  ;;  %v9951_v59 = vld [vmem:[#allocation89_spill] sm:$0xff] }
 0x390   : > { %v5019_v4 = vunpack.i.h.bf16 %v5017_v41  ;;  %v5018_v25 = vunpack.i.l.bf16 %v5017_v41  ;;  %v4889_v41 = vunpack.i.h.bf16 %v9951_v59  ;;  %v4888_v37 = vunpack.i.l.bf16 %v9951_v59 }
 0x391   : > { %v3440_v10 = vsel %vm199_vm0, %v9949_v36, %v4953_v12  ;;  %v3441_v45 = vsel %vm199_vm0, %v9950_v42, %v4954_v61  ;;  %v9952_v12 = vld [vmem:[#allocation83_spill] sm:$0xff] }
 0x392   : > { %v3472_v15 = vsel %vm1597_vm5, %v3440_v10, %v4973_v30  ;;  %v3473_v11 = vsel %vm1597_vm5, %v3441_v45, %v4974_v21  ;;  %v8573_v2 = vsel %vm1630_vm4, %v8436_v40, %v5019_v4  ;;  %v8577_v18 = vsel %vm1630_vm4, %v8439_v14, %v5018_v25  ;;  %v9953_v61 = vld [vmem:[#allocation39_spill] sm:$0xff]  ;;  %v9954_v21 = vld [vmem:[#allocation81_spill] sm:$0xff]  ;;  %v9955_v10 = vld [vmem:[#allocation46_spill] sm:$0xff] }
 0x393   : > { %5191 = vrot.lane.b32.xlu1 %v9952_v12, %s5678_s29  ;;  %v3451_v14 = vsel %vm199_vm0, %v9955_v10, %v4889_v41  ;;  %v9956_v25 = vld [vmem:[#allocation93_spill] sm:$0xff]  ;;  %v4978_v41 = vunpack.i.l.bf16 %v8475_v48 }
 0x394   : > { %5186 = vrot.lane.b32.xlu0 %v9953_v61, %s5678_s29  ;;  %v3450_v42 = vsel %vm199_vm0, %v9956_v25, %v4888_v37 }
 0x395   : > { %5196 = vrot.lane.b32.xlu2 %v9954_v21, %s5678_s29  ;;  %v4987_v30 = vpop.permute.xlu1 %4986 }
 0x396   : > { %v4957_v40 = vpop.permute.xlu0 %4956  ;;  %v4989_v4 = vunpack.i.h.bf16 %v4987_v30  ;;  %v4988_v36 = vunpack.i.l.bf16 %v4987_v30  ;;  %v4979_v30 = vunpack.i.h.bf16 %v8475_v48 }
 0x397   : > { %v4959_v45 = vunpack.i.h.bf16 %v4957_v40  ;;  %v4958_v59 = vunpack.i.l.bf16 %v4957_v40  ;;  %v5032_v58 = vpop.permute.xlu2 %5031 }
 0x398   : > { %v8593_v12 = vsel %vm1630_vm4, %v8363_v19, %v4989_v4  ;;  %v8597_v21 = vsel %vm1630_vm4, %v8367_v5, %v4988_v36  ;;  %v5034_v24 = vunpack.i.h.bf16 %v5032_v58  ;;  %v5033_v61 = vunpack.i.l.bf16 %v5032_v58  ;;  %v9957_v5 = vld [vmem:[#allocation36_spill] sm:$0xff] }
 0x399   : > { %v8602_v10 = vsel %vm1597_vm5, %v3451_v14, %v4959_v45  ;;  %v8605_v37 = vsel %vm1597_vm5, %v3450_v42, %v4958_v59  ;;  %v9958_v58 = vld [vmem:[#allocation32_spill] sm:$0xff]  ;;  %v3457_v48 = vsel %vm199_vm0, %v8343_v28, %v4979_v30  ;;  %v3456_v4 = vsel %vm199_vm0, %v8357_v32, %v4978_v41  ;;  %v9961_v41 = vld [vmem:[#allocation29_spill] sm:$0xff] }
 0x39a   : > { %v8608_v40 = vsel %vm1630_vm4, %v3473_v11, %v5034_v24  ;;  %v8611_v19 = vsel %vm1630_vm4, %v3472_v15, %v5033_v61  ;;  %v9959_v36 = vld [vmem:[#allocation84_spill] sm:$0xff]  ;;  %v4949_v11 = vunpack.i.h.bf16 %v8497_v33  ;;  %v4948_v15 = vunpack.i.l.bf16 %v8497_v33 }
 0x39b   : > { %5206 = vrot.lane.b32.xlu1 %v9957_v5, %s5678_s29  ;;  %v5014_v42 = vunpack.i.h.bf16 %v8541_v54  ;;  %v5013_v45 = vunpack.i.l.bf16 %v8541_v54 }
 0x39c   : > { %5201 = vrot.lane.b32.xlu0 %v9958_v58, %s5678_s29 }
 0x39d   : > { %5211 = vrot.lane.b32.xlu2 %v9959_v36, %s5678_s29  ;;  %v5002_v24 = vpop.permute.xlu1 %5001 }
 0x39e   : > { %v4982_v61 = vpop.permute.xlu0 %4981  ;;  %v5004_v14 = vunpack.i.h.bf16 %v5002_v24  ;;  %v5003_v25 = vunpack.i.l.bf16 %v5002_v24 }
 0x39f   : > { %v4984_v59 = vunpack.i.h.bf16 %v4982_v61  ;;  %v4983_v28 = vunpack.i.l.bf16 %v4982_v61  ;;  %v5047_v30 = vpop.permute.xlu2 %5046  ;;  %v9962_v61 = vld [vmem:[#allocation85_spill] sm:$0xff] }
 0x3a0   : > { %v3442_v32 = vsel %vm199_vm0, %v9960_v9, %v5003_v25  ;;  %v3443_v3 = vsel %vm199_vm0, %v9961_v41, %v5004_v14  ;;  %v5049_v7 = vunpack.i.h.bf16 %v5047_v30  ;;  %v5048_v47 = vunpack.i.l.bf16 %v5047_v30 }
 0x3a1   : > { %v8632_v33 = vsel %vm1597_vm5, %v3457_v48, %v4984_v59  ;;  %v8635_v24 = vsel %vm1597_vm5, %v3456_v4, %v4983_v28  ;;  %v3474_v49 = vsel %vm1597_vm5, %v3442_v32, %v5013_v45  ;;  %v3475_v54 = vsel %vm1597_vm5, %v3443_v3, %v5014_v42  ;;  %v9964_v3 = vld [vmem:[#allocation74_spill] sm:$0xff] }
 0x3a2   : > { %v3455_v63 = vsel %vm199_vm0, %v9962_v61, %v4949_v11  ;;  %v3454_v9 = vsel %vm199_vm0, %v9963_v60, %v4948_v15  ;;  %v8645_v14 = vsel %vm1630_vm4, %v8462_v27, %v5049_v7  ;;  %v8649_v48 = vsel %vm1630_vm4, %v8465_v62, %v5048_v47  ;;  %v9965_v11 = vld [vmem:[#allocation60_spill] sm:$0xff]  ;;  %v9966_v60 = vld [vmem:[#allocation75_spill] sm:$0xff] }
 0x3a3   : > { %v4969_v4 = vunpack.i.h.bf16 %v8455_v13  ;;  %v4968_v25 = vunpack.i.l.bf16 %v8455_v13  ;;  %5221 = vrot.lane.b32.xlu1 %v9964_v3, %s5678_s29 }
 0x3a4   : > { %5216 = vrot.lane.b32.xlu0 %v9965_v11, %s5678_s29 }
 0x3a5   : > { %5226 = vrot.lane.b32.xlu2 %v9966_v60, %s5679_s30  ;;  %v5007_v15 = vpop.permute.xlu1 %5006  ;;  %v8660_v7 = vsel %vm1597_vm5, %v3454_v9, %v4968_v25  ;;  %v8663_v27 = vsel %vm1597_vm5, %v3455_v63, %v4969_v4 }
 0x3a6   : > { %v4997_v62 = vpop.permute.xlu0 %4996  ;;  %v5009_v47 = vunpack.i.h.bf16 %v5007_v15  ;;  %v5008_v42 = vunpack.i.l.bf16 %v5007_v15 }
 0x3a7   : > { %v4999_v13 = vunpack.i.h.bf16 %v4997_v62  ;;  %v4998_v45 = vunpack.i.l.bf16 %v4997_v62  ;;  %v5062_v59 = vpop.permute.xlu2 %5061 }
 0x3a8   : > { %v3497_v28 = vsel %vm1630_vm4, %v8482_v44, %v5009_v47  ;;  %v3496_v30 = vsel %vm1630_vm4, %v8485_v43, %v5008_v42  ;;  %v5064_v32 = vunpack.i.h.bf16 %v5062_v59  ;;  %v5063_v41 = vunpack.i.l.bf16 %v5062_v59 }
 0x3a9   : > { %v8671_v61 = vsel %vm1630_vm4, %v8351_v34, %v4999_v13  ;;  %v8675_v63 = vsel %vm1630_vm4, %v8354_v39, %v4998_v45  ;;  %v9967_v34 = vld [vmem:[#allocation91_spill] sm:$0xff] }
 0x3aa   : > { %v8679_v9 = vsel %vm1630_vm4, %v8548_v31, %v5064_v32  ;;  %v8683_v44 = vsel %vm1630_vm4, %v8551_v50, %v5063_v41 }
 0x3ab   : > { %5236 = vrot.lane.b32.xlu1 %v9958_v58, %s5681_s6 }
 0x3ac   : > { %5231 = vrot.lane.b32.xlu0 %v7745_v38, %s5680_s5 }
 0x3ad   : > { %5241 = vrot.lane.b32.xlu2 %v9967_v34, %s5679_s30  ;;  %v5027_v43 = vpop.permute.xlu1 %5026 }
 0x3ae   : > { %v5022_v39 = vpop.permute.xlu0 %5021  ;;  %v5029_v4 = vunpack.i.h.bf16 %v5027_v43  ;;  %v5028_v25 = vunpack.i.l.bf16 %v5027_v43 }
 0x3af   : > { %v5024_v60 = vunpack.i.h.bf16 %v5022_v39  ;;  %v5023_v31 = vunpack.i.l.bf16 %v5022_v39  ;;  %v5077_v15 = vpop.permute.xlu2 %5076 }
 0x3b0   : > { %v3503_v50 = vsel %vm1630_vm4, %v8513_v29, %v5029_v4  ;;  %v3502_v62 = vsel %vm1630_vm4, %v8510_v22, %v5028_v25  ;;  %v5079_v58 = vunpack.i.h.bf16 %v5077_v15  ;;  %v5078_v47 = vunpack.i.l.bf16 %v5077_v15  ;;  %v9968_v22 = vld [vmem:[#allocation76_spill] sm:$0xff] }
 0x3b1   : > { %v8697_v38 = vsel %vm1630_vm4, %v8529_v53, %v5024_v60  ;;  %v8701_v42 = vsel %vm1630_vm4, %v8526_v46, %v5023_v31 }
 0x3b2   : > { %v8705_v13 = vsel %vm1663_vm6, %v8593_v12, %v5079_v58  ;;  %v8709_v29 = vsel %vm1663_vm6, %v8597_v21, %v5078_v47 }
 0x3b3   : > { %5251 = vrot.lane.b32.xlu1 %v7918_v23, %s5681_s6 }
 0x3b4   : > { %5246 = vrot.lane.b32.xlu0 %v8401_v8, %s5680_s5 }
 0x3b5   : > { %5256 = vrot.lane.b32.xlu2 %v9968_v22, %s5679_s30  ;;  %v5042_v53 = vpop.permute.xlu1 %5041 }
 0x3b6   : > { %v5037_v46 = vpop.permute.xlu0 %5036  ;;  %v5044_v45 = vunpack.i.h.bf16 %v5042_v53  ;;  %v5043_v59 = vunpack.i.l.bf16 %v5042_v53 }
 0x3b7   : > { %v5039_v32 = vunpack.i.h.bf16 %v5037_v46  ;;  %v5038_v12 = vunpack.i.l.bf16 %v5037_v46  ;;  %v5092_v41 = vpop.permute.xlu2 %5091 }
 0x3b8   : > { %v3509_v21 = vsel %vm1630_vm4, %v8554_v35, %v5044_v45  ;;  %v3508_v34 = vsel %vm1630_vm4, %v8557_v52, %v5043_v59  ;;  %v5094_v23 = vunpack.i.h.bf16 %v5092_v41  ;;  %v5093_v43 = vunpack.i.l.bf16 %v5092_v41  ;;  %v9969_v35 = vld [vmem:[#allocation8_spill] sm:$0xff] }
 0x3b9   : > { %v8722_v8 = vsel %vm1630_vm4, %v3474_v49, %v5038_v12  ;;  %v8725_v39 = vsel %vm1630_vm4, %v3475_v54, %v5039_v32 }
 0x3ba   : > { %v8728_v4 = vsel %vm1663_vm6, %v3497_v28, %v5094_v23  ;;  %v8731_v25 = vsel %vm1663_vm6, %v3496_v30, %v5093_v43 }
 0x3bb   : > { %5266 = vrot.lane.b32.xlu1 %v9957_v5, %s5681_s6 }
 0x3bc   : > { %5261 = vrot.lane.b32.xlu0 %v7821_v6, %s5680_s5 }
 0x3bd   : > { %5271 = vrot.lane.b32.xlu2 %v9969_v35, %s5679_s30  ;;  %v5057_v49 = vpop.permute.xlu1 %5056 }
 0x3be   : > { %v5052_v52 = vpop.permute.xlu0 %5051  ;;  %v5059_v60 = vunpack.i.h.bf16 %v5057_v49  ;;  %v5058_v54 = vunpack.i.l.bf16 %v5057_v49 }
 0x3bf   : > { %v5054_v31 = vunpack.i.h.bf16 %v5052_v52  ;;  %v5053_v15 = vunpack.i.l.bf16 %v5052_v52  ;;  %v5107_v28 = vpop.permute.xlu2 %5106 }
 0x3c0   : > { %v3515_v30 = vsel %vm1630_vm4, %v8602_v10, %v5059_v60  ;;  %v3514_v58 = vsel %vm1630_vm4, %v8605_v37, %v5058_v54  ;;  %v5109_v5 = vunpack.i.h.bf16 %v5107_v28  ;;  %v5108_v47 = vunpack.i.l.bf16 %v5107_v28  ;;  %v9970_v10 = vld [vmem:[#allocation50_spill] sm:$0xff] }
 0x3c1   : > { %v8745_v6 = vsel %vm1630_vm4, %v8442_v17, %v5054_v31  ;;  %v8749_v22 = vsel %vm1630_vm4, %v8445_v20, %v5053_v15 }
 0x3c2   : > { %v8752_v53 = vsel %vm1663_vm6, %v3503_v50, %v5109_v5  ;;  %v8755_v46 = vsel %vm1663_vm6, %v3502_v62, %v5108_v47 }
 0x3c3   : > { %5281 = vrot.lane.b32.xlu1 %v8012_v0, %s5681_s6 }
 0x3c4   : > { %5276 = vrot.lane.b32.xlu0 %v8399_v56, %s5680_s5 }
 0x3c5   : > { %5286 = vrot.lane.b32.xlu2 %v9970_v10, %s5679_s30  ;;  %v5072_v17 = vpop.permute.xlu1 %5071 }
 0x3c6   : > { %v5067_v37 = vpop.permute.xlu0 %5066  ;;  %v5074_v45 = vunpack.i.h.bf16 %v5072_v17  ;;  %v5073_v20 = vunpack.i.l.bf16 %v5072_v17 }
 0x3c7   : > { %v5069_v59 = vunpack.i.h.bf16 %v5067_v37  ;;  %v5068_v32 = vunpack.i.l.bf16 %v5067_v37  ;;  %v5122_v50 = vpop.permute.xlu2 %5121 }
 0x3c8   : > { %v3521_v62 = vsel %vm1630_vm4, %v8632_v33, %v5074_v45  ;;  %v3520_v12 = vsel %vm1630_vm4, %v8635_v24, %v5073_v20  ;;  %v5124_v0 = vunpack.i.h.bf16 %v5122_v50  ;;  %v5123_v41 = vunpack.i.l.bf16 %v5122_v50  ;;  %v9971_v33 = vld [vmem:[#allocation5_spill] sm:$0xff] }
 0x3c9   : > { %v8769_v56 = vsel %vm1630_vm4, %v8663_v27, %v5069_v59  ;;  %v8773_v23 = vsel %vm1630_vm4, %v8660_v7, %v5068_v32 }
 0x3ca   : > { %v8776_v43 = vsel %vm1663_vm6, %v3509_v21, %v5124_v0  ;;  %v8779_v35 = vsel %vm1663_vm6, %v3508_v34, %v5123_v41 }
 0x3cb   : > { %5296 = vrot.lane.b32.xlu1 %v9959_v36, %s5681_s6 }
 0x3cc   : > { %5291 = vrot.lane.b32.xlu0 %v7897_v55, %s5680_s5 }
 0x3cd   : > { %5301 = vrot.lane.b32.xlu2 %v9971_v33, %s5679_s30  ;;  %v5087_v24 = vpop.permute.xlu1 %5086 }
 0x3ce   : > { %v5082_v27 = vpop.permute.xlu0 %5081  ;;  %v5089_v49 = vunpack.i.h.bf16 %v5087_v24  ;;  %v5088_v7 = vunpack.i.l.bf16 %v5087_v24  ;;  %v9974_v24 = vld [vmem:[#allocation63_spill] sm:$0xff] }
 0x3cf   : > { %v5084_v52 = vunpack.i.h.bf16 %v5082_v27  ;;  %v5083_v60 = vunpack.i.l.bf16 %v5082_v27  ;;  %v5137_v21 = vpop.permute.xlu2 %5136  ;;  %v9975_v27 = vld [vmem:[#allocation58_spill] sm:$0xff] }
 0x3d0   : > { %v3527_v34 = vsel %vm1663_vm6, %v8671_v61, %v5089_v49  ;;  %v3526_v54 = vsel %vm1663_vm6, %v8675_v63, %v5088_v7  ;;  %v5139_v36 = vunpack.i.h.bf16 %v5137_v21  ;;  %v5138_v31 = vunpack.i.l.bf16 %v5137_v21  ;;  %v9972_v61 = vld [vmem:[#allocation42_spill] sm:$0xff]  ;;  %v9976_v49 = vld [vmem:[#allocation15_spill] sm:$0xff] }
 0x3d1   : > { %v8793_v55 = vsel %vm1663_vm6, %v8517_v1, %v5084_v52  ;;  %v8797_v15 = vsel %vm1663_vm6, %v8521_v16, %v5083_v60 }
 0x3d2   : > { %v8800_v28 = vsel %vm1663_vm6, %v3515_v30, %v5139_v36  ;;  %v8803_v5 = vsel %vm1663_vm6, %v3514_v58, %v5138_v31 }
 0x3d3   : > { %5311 = vrot.lane.b32.xlu1 %v9947_v57, %s5681_s6 }
 0x3d4   : > { %5306 = vrot.lane.b32.xlu0 %v8405_v26, %s5680_s5 }
 0x3d5   : > { %5316 = vrot.lane.b32.xlu2 %v9972_v61, %s5679_s30  ;;  %v5102_v1 = vpop.permute.xlu1 %5101 }
 0x3d6   : > { %v5097_v63 = vpop.permute.xlu0 %5096  ;;  %v5104_v47 = vunpack.i.h.bf16 %v5102_v1  ;;  %v5103_v16 = vunpack.i.l.bf16 %v5102_v1 }
 0x3d7   : > { %v5099_v10 = vunpack.i.h.bf16 %v5097_v63  ;;  %v5098_v17 = vunpack.i.l.bf16 %v5097_v63  ;;  %v5152_v30 = vpop.permute.xlu2 %5151 }
 0x3d8   : > { %v3533_v58 = vsel %vm1663_vm6, %v8697_v38, %v5104_v47  ;;  %v3532_v37 = vsel %vm1663_vm6, %v8701_v42, %v5103_v16  ;;  %v5154_v57 = vunpack.i.h.bf16 %v5152_v30  ;;  %v5153_v45 = vunpack.i.l.bf16 %v5152_v30  ;;  %v9973_v38 = vld [vmem:[#allocation11_spill] sm:$0xff]  ;;  %v9978_v16 = vld [vmem:[#allocation38_spill] sm:$0xff] }
 0x3d9   : > { %v8817_v26 = vsel %vm1663_vm6, %v8577_v18, %v5098_v17  ;;  %v8821_v20 = vsel %vm1663_vm6, %v8573_v2, %v5099_v10 }
 0x3da   : > { %v8824_v59 = vsel %vm1663_vm6, %v3521_v62, %v5154_v57  ;;  %v8827_v32 = vsel %vm1663_vm6, %v3520_v12, %v5153_v45 }
 0x3db   : > { %5326 = vrot.lane.b32.xlu1 %v9965_v11, %s5681_s6 }
 0x3dc   : > { %5321 = vrot.lane.b32.xlu0 %v7977_v51, %s5680_s5 }
 0x3dd   : > { %5331 = vrot.lane.b32.xlu2 %v9973_v38, %s5679_s30  ;;  %v8835_v18 = vpop.permute.xlu1 %5116 }
 0x3de   : > { %v5112_v42 = vpop.permute.xlu0 %5111 }
 0x3df   : > { %v5114_v2 = vunpack.i.h.bf16 %v5112_v42  ;;  %v5113_v50 = vunpack.i.l.bf16 %v5112_v42  ;;  %v5167_v0 = vpop.permute.xlu2 %5166  ;;  %v9979_v42 = vld [vmem:[#allocation7_spill] sm:$0xff] }
 0x3e0   : > { %v5169_v62 = vunpack.i.h.bf16 %v5167_v0  ;;  %v5168_v41 = vunpack.i.l.bf16 %v5167_v0 }
 0x3e1   : > { %v8839_v12 = vsel %vm1663_vm6, %v8611_v19, %v5113_v50  ;;  %v8843_v11 = vsel %vm1663_vm6, %v8608_v40, %v5114_v2  ;;  %v9980_v2 = vld [vmem:[#allocation54_spill] sm:$0xff] }
 0x3e2   : > { %v8846_v51 = vsel %vm1696_vm8, %v3527_v34, %v5169_v62  ;;  %v8849_v33 = vsel %vm1696_vm8, %v3526_v54, %v5168_v41  ;;  %v9983_v41 = vld [vmem:[#allocation49_spill] sm:$0xff] }
 0x3e3   : > { %5341 = vrot.lane.b32.xlu1 %v9974_v24, %s5681_s6  ;;  %v9984_v24 = vld [vmem:[#allocation68_spill] sm:$0xff] }
 0x3e4   : > { %5336 = vrot.lane.b32.xlu0 %v9975_v27, %s5680_s5 }
 0x3e5   : > { %5346 = vrot.lane.b32.xlu2 %v9976_v49, %s5679_s30  ;;  %v5132_v19 = vpop.permute.xlu1 %5131 }
 0x3e6   : > { %v5127_v7 = vpop.permute.xlu0 %5126  ;;  %v5134_v52 = vunpack.i.h.bf16 %v5132_v19  ;;  %v5133_v40 = vunpack.i.l.bf16 %v5132_v19 }
 0x3e7   : > { %v5129_v60 = vunpack.i.h.bf16 %v5127_v7  ;;  %v5128_v21 = vunpack.i.l.bf16 %v5127_v7  ;;  %v5182_v34 = vpop.permute.xlu2 %5181 }
 0x3e8   : > { %v8859_v54 = vsel %vm1663_vm6, %v8745_v6, %v5134_v52  ;;  %v8863_v36 = vsel %vm1663_vm6, %v8749_v22, %v5133_v40  ;;  %v5184_v31 = vunpack.i.h.bf16 %v5182_v34  ;;  %v5183_v61 = vunpack.i.l.bf16 %v5182_v34  ;;  %v9977_v22 = vld [vmem:[#allocation70_spill] sm:$0xff] }
 0x3e9   : > { %v8867_v1 = vsel %vm1663_vm6, %v8649_v48, %v5128_v21  ;;  %v8871_v63 = vsel %vm1663_vm6, %v8645_v14, %v5129_v60 }
 0x3ea   : > { %v8874_v47 = vsel %vm1696_vm8, %v3533_v58, %v5184_v31  ;;  %v8877_v6 = vsel %vm1696_vm8, %v3532_v37, %v5183_v61 }
 0x3eb   : > { %5356 = vrot.lane.b32.xlu1 %v9964_v3, %s5681_s6 }
 0x3ec   : > { %5351 = vrot.lane.b32.xlu0 %v9977_v22, %s5680_s5  ;;  %v4171_v22 = vld [vmem:[%s9402_s2 + $0x8] sm:$0xff] }
 0x3ed   : > { %5361 = vrot.lane.b32.xlu2 %v9978_v16, %s5679_s30  ;;  %v5147_v48 = vpop.permute.xlu1 %5146 }
 0x3ee   : > { %v5142_v10 = vpop.permute.xlu0 %5141  ;;  %v5149_v17 = vunpack.i.h.bf16 %v5147_v48  ;;  %v5148_v14 = vunpack.i.l.bf16 %v5147_v48 }
 0x3ef   : > { %v5144_v30 = vunpack.i.h.bf16 %v5142_v10  ;;  %v5143_v57 = vunpack.i.l.bf16 %v5142_v10  ;;  %v8885_v58 = vpop.permute.xlu2 %5196  ;;  %v4170_v10 = vld [vmem:[%s9402_s2] sm:$0xff] }
 0x3f0   : > { %v8889_v37 = vsel %vm1663_vm6, %v8769_v56, %v5149_v17  ;;  %v8893_v3 = vsel %vm1663_vm6, %v8773_v23, %v5148_v14  ;;  %v9981_v56 = vld [vmem:[#allocation65_spill] sm:$0xff] }
 0x3f1   : > { %v8897_v45 = vsel %vm1663_vm6, %v8683_v44, %v5143_v57  ;;  %v8901_v38 = vsel %vm1663_vm6, %v8679_v9, %v5144_v30  ;;  %v3702_v9 = vld [vmem:[%s9402_s2 + $0x10] sm:$0x3]  ;;  %v9982_v44 = vld [vmem:[#allocation30_spill] sm:$0xff] }
 0x3f2   : > { %v3712_v62 = vunpack.c.l.b16 %v3702_v9 }
 0x3f3   : > { %5371 = vrot.lane.b32.xlu1 %v9979_v42, %s5681_s6 }
 0x3f4   : > { %5366 = vrot.lane.b32.xlu0 %v9980_v2, %s5680_s5  ;;  %v3715_v49 = vpack.c.b16 %v3712_v62, %v3712_v62  ;;  %v9987_v62 = vld [vmem:[#allocation41_spill] sm:$0xff] }
 0x3f5   : > { %5376 = vrot.lane.b32.xlu2 %v9981_v56, %s5679_s30  ;;  %v8909_v50 = vpop.permute.xlu1 %5161 }
 0x3f6   : > { %v8911_v23 = vpop.permute.xlu0 %5156  ;;  %v3767_v34 = vsel %vm1913_vm3, %v3715_v49, 0 }
 0x3f7   : > { %v8913_v0 = vpop.permute.xlu2 %5211  ;;  %4175 = vmatpush.bf16.msra.mxu3 %v3767_v34  ;;  %3774 = vmatpush.bf16.msra.mxu1 %v3767_v34 }
 0x3fb   : > { %5386 = vrot.lane.b32.xlu1 %v9982_v44, %s5681_s6  ;;  %4176 = vmatpush.bf16.msra.mxu3 %v4171_v22 }
 0x3fc   : > { %5381 = vrot.lane.b32.xlu0 %v9983_v41, %s5680_s5  ;;  %3775 = vmatpush.bf16.msra.mxu1 %v4171_v22  ;;  %v9989_v41 = vld [vmem:[#allocation67_spill] sm:$0xff] }
 0x3fd   : > { %5391 = vrot.lane.b32.xlu2 %v9984_v24, %s5679_s30  ;;  %v5177_v27 = vpop.permute.xlu1 %5176  ;;  %v2370_v24 = vld [vmem:[#allocation2 + $0x220] sm:$0xff] }
 0x3fe   : > { %v5172_v19 = vpop.permute.xlu0 %5171  ;;  %v5179_v7 = vunpack.i.h.bf16 %v5177_v27  ;;  %v5178_v52 = vunpack.i.l.bf16 %v5177_v27  ;;  %v2371_v27 = vld [vmem:[#allocation2 + $0x228] sm:$0xff] }
 0x3ff   : > { %v5174_v40 = vunpack.i.h.bf16 %v5172_v19  ;;  %v5173_v60 = vunpack.i.l.bf16 %v5172_v19  ;;  %v8924_v21 = vpop.permute.xlu2 %5226  ;;  %4177 = vmatpush.bf16.msra.mxu3 %v4170_v10 }
 0x400   : > { %v8929_v31 = vsel %vm1696_vm8, %v8817_v26, %v5178_v52  ;;  %v8933_v61 = vsel %vm1696_vm8, %v8821_v20, %v5179_v7  ;;  %v9985_v26 = vld [vmem:[#allocation39_spill] sm:$0xff]  ;;  %v9986_v20 = vld [vmem:[#allocation40_spill] sm:$0xff]  ;;  %3776 = vmatpush.bf16.msra.mxu1 %v4170_v10  ;;  %v2648_v7 = vrot.slane %v2371_v27, 7 }
 0x401   : > { %v8940_v16 = vsel %vm1696_vm8, %v8731_v25, %v5173_v60  ;;  %v8944_v48 = vsel %vm1696_vm8, %v8728_v4, %v5174_v40  ;;  %v9990_v40 = vld [vmem:[#allocation77_spill] sm:$0xff]  ;;  %v9991_v60 = vld [vmem:[#allocation71_spill] sm:$0xff] }
 0x403   : > { %5401 = vrot.lane.b32.xlu1 %v9985_v26, %s5681_s6  ;;  %v9992_v26 = vld [vmem:[#allocation83_spill] sm:$0xff] }
 0x404   : > { %5396 = vrot.lane.b32.xlu0 %v9986_v20, %s5680_s5 }
 0x405   : > { %5406 = vrot.lane.b32.xlu2 %v9982_v44, %s5678_s29  ;;  %v5192_v25 = vpop.permute.xlu1 %5191 }
 0x406   : > { %v5187_v17 = vpop.permute.xlu0 %5186  ;;  %v5194_v14 = vunpack.i.h.bf16 %v5192_v25  ;;  %v5193_v4 = vunpack.i.l.bf16 %v5192_v25 }
 0x407   : > { %v5189_v30 = vunpack.i.h.bf16 %v5187_v17  ;;  %v5188_v57 = vunpack.i.l.bf16 %v5187_v17  ;;  %v8955_v42 = vpop.permute.xlu2 %5241 }
 0x408   : > { %v8959_v2 = vsel %vm1696_vm8, %v8839_v12, %v5193_v4  ;;  %v8963_v56 = vsel %vm1696_vm8, %v8843_v11, %v5194_v14  ;;  %v9988_v12 = vld [vmem:[#allocation61_spill] sm:$0xff]  ;;  %v2373_v14 = vld [vmem:[#allocation2 + $0x238] sm:$0xff] }
 0x409   : > { %v8967_v9 = vsel %vm1696_vm8, %v8755_v46, %v5188_v57  ;;  %v8971_v44 = vsel %vm1696_vm8, %v8752_v53, %v5189_v30  ;;  %v2372_v46 = vld [vmem:[#allocation2 + $0x230] sm:$0xff]  ;;  %v2647_v53 = vrot.slane %v2370_v24, 7 }
 0x40a   : > { %v2650_v52 = vrot.slane %v2372_v46, 7 }
 0x40b   : > { %5416 = vrot.lane.b32.xlu1 %v9987_v62, %s5680_s5  ;;  %v2649_v34 = vsel %vm559_vm2, %v2647_v53, %v2648_v7  ;;  %v5450_v53 = vpack.i.bf16 %v2372_v46, %v2371_v27 }
 0x40c   : > { %5411 = vrot.lane.b32.xlu0 %v9988_v12, %s5679_s30  ;;  %v2651_v22 = vsel %vm559_vm2, %v2648_v7, %v2650_v52  ;;  %v2653_v7 = vrot.slane %v2371_v27, 1  ;;  %v5229_v27 = vunpack.i.h.bf16 %v8924_v21 }
 0x40d   : > { %5421 = vrot.lane.b32.xlu2 %v9989_v41, %s5681_s6  ;;  %v8979_v11 = vpop.permute.xlu1 %5206  ;;  %v5445_v57 = vpack.i.bf16 %v2651_v22, %v2649_v34  ;;  %v2656_v34 = vrot.slane %v2373_v14, 1  ;;  %v5118_v22 = vunpack.i.l.bf16 %v8835_v18 }
 0x40e   : > { %v8981_v49 = vpop.permute.xlu0 %5201 }
 0x40f   : > { %v8983_v19 = vpop.permute.xlu2 %5256 }
 0x413   : > { %5431 = vrot.lane.b32.xlu1 %v9990_v40, %s5680_s5 }
 0x414   : > { %5426 = vrot.lane.b32.xlu0 %v9991_v60, %s5679_s30  ;;  %v2654_v60 = vrot.slane %v2372_v46, 1 }
 0x415   : > { %5436 = vrot.lane.b32.xlu2 %v9992_v26, %s5681_s6  ;;  %v5222_v20 = vpop.permute.xlu1 %5221  ;;  %v5198_v26 = vunpack.i.l.bf16 %v8885_v58 }
 0x416   : > { %v5217_v10 = vpop.permute.xlu0 %5216  ;;  %v5224_v25 = vunpack.i.h.bf16 %v5222_v20  ;;  %v5223_v17 = vunpack.i.l.bf16 %v5222_v20  ;;  %v2655_v46 = vsel %vm688_vm1, %v2653_v7, %v2654_v60  ;;  %v3538_v20 = vsel %vm1663_vm6, %v8722_v8, %v5118_v22 }
 0x417   : > { %v5219_v4 = vunpack.i.h.bf16 %v5217_v10  ;;  %v5218_v30 = vunpack.i.l.bf16 %v5217_v10  ;;  %v9001_v24 = vpop.permute.xlu2 %5271  ;;  %v5158_v22 = vunpack.i.l.bf16 %v8911_v23 }
 0x418   : > { %v8995_v62 = vsel %vm1696_vm8, %v8897_v45, %v5223_v17  ;;  %v8999_v12 = vsel %vm1696_vm8, %v8901_v38, %v5224_v25  ;;  %v5119_v45 = vunpack.i.h.bf16 %v8835_v18  ;;  %v5199_v38 = vunpack.i.h.bf16 %v8885_v58 }
 0x419   : > { %v9005_v52 = vsel %vm1696_vm8, %v8803_v5, %v5218_v30  ;;  %v9009_v40 = vsel %vm1696_vm8, %v8800_v28, %v5219_v4  ;;  %v5228_v5 = vunpack.i.l.bf16 %v8924_v21  ;;  %v2657_v18 = vsel %vm688_vm1, %v2654_v60, %v2656_v34 }
 0x41a   : > { %v3539_v58 = vsel %vm1663_vm6, %v8725_v39, %v5119_v45  ;;  %v3570_v21 = vsel %vm1696_vm8, %v3538_v20, %v5198_v26  ;;  %v5159_v45 = vunpack.i.h.bf16 %v8911_v23  ;;  %v3554_v23 = vsel %vm1696_vm8, %v8709_v29, %v5158_v22 }
 0x41b   : > { %5446 = vrot.lane.b32.xlu1 %v5445_v57, %s5679_s30  ;;  %v3602_v30 = vsel %vm1729_vm7, %v3570_v21, %v5228_v5  ;;  %v5243_v5 = vunpack.i.l.bf16 %v8955_v42 }
 0x41c   : > { %5441 = vrot.lane.b32.xlu0 %v9989_v41, %s5678_s29  ;;  %v3571_v41 = vsel %vm1696_vm8, %v3539_v58, %v5199_v38  ;;  %v9993_v38 = vld [vmem:[#allocation80_spill] sm:$0xff] }
 0x41d   : > { %5451 = vrot.lane.b32.xlu2 %v5450_v53, %s5680_s5  ;;  %v5237_v28 = vpop.permute.xlu1 %5236  ;;  %v3603_v57 = vsel %vm1729_vm7, %v3571_v41, %v5229_v27  ;;  %v5455_v53 = vpack.i.bf16 %v2657_v18, %v2655_v46  ;;  %v5244_v27 = vunpack.i.h.bf16 %v8955_v42  ;;  %v3586_v42 = vsel %vm1729_vm7, %v3554_v23, %v5243_v5 }
 0x41e   : > { %v5232_v10 = vpop.permute.xlu0 %5231  ;;  %v5239_v25 = vunpack.i.h.bf16 %v5237_v28  ;;  %v5238_v17 = vunpack.i.l.bf16 %v5237_v28  ;;  %v9994_v28 = vld [vmem:[#allocation28_spill] sm:$0xff]  ;;  %v5204_v41 = vunpack.i.h.bf16 %v8981_v49 }
 0x41f   : > { %v5234_v14 = vunpack.i.h.bf16 %v5232_v10  ;;  %v5233_v4 = vunpack.i.l.bf16 %v5232_v10  ;;  %v9033_v60 = vpop.permute.xlu2 %5286  ;;  %v3555_v10 = vsel %vm1696_vm8, %v8705_v13, %v5159_v45  ;;  %v5259_v13 = vunpack.i.h.bf16 %v8983_v19 }
 0x420   : > { %v3587_v21 = vsel %vm1729_vm7, %v3555_v10, %v5244_v27  ;;  %v5274_v10 = vunpack.i.h.bf16 %v9001_v24 }
 0x421   : > { %v3634_v7 = vsel %vm1762_vm9, %v3602_v30, %v5233_v4  ;;  %v3635_v8 = vsel %vm1762_vm9, %v3603_v57, %v5234_v14  ;;  %v5203_v14 = vunpack.i.l.bf16 %v8981_v49 }
 0x422   : > { %v3666_v39 = vsel %vm1795_vm10, %v3634_v7, %v5238_v17  ;;  %v3667_v34 = vsel %vm1795_vm10, %v3635_v8, %v5239_v25  ;;  %v5258_v7 = vunpack.i.l.bf16 %v8983_v19 }
 0x423   : > { %5461 = vrot.lane.b32.xlu1 %v9993_v38, %s5679_s30  ;;  %v3690_v26 = vpack.c.bf16 %v3667_v34, %v3666_v39  ;;  %v9995_v39 = vld [vmem:[#allocation81_spill] sm:$0xff]  ;;  %v3572_v49 = vsel %vm1696_vm8, %v8779_v35, %v5203_v14  ;;  %v3573_v34 = vsel %vm1696_vm8, %v8776_v43, %v5204_v41 }
 0x424   : > { %5456 = vrot.lane.b32.xlu0 %v5455_v53, %s5681_s6  ;;  %v3604_v19 = vsel %vm1729_vm7, %v3572_v49, %v5258_v7  ;;  %v5209_v49 = vunpack.i.h.bf16 %v8979_v11 }
 0x425   : > { %5466 = vrot.lane.b32.xlu2 %v9994_v28, %s5680_s5  ;;  %4156 = vmatmul.msk.bf16.vlgmr.msra.gmra.mxu3 %vm1864_vm11, %v3690_v26  ;;  %v5252_v46 = vpop.permute.xlu1 %5251  ;;  %v3605_v28 = vsel %vm1729_vm7, %v3573_v34, %v5259_v13 }
 0x426   : > { %v5247_v18 = vpop.permute.xlu0 %5246  ;;  %v5254_v20 = vunpack.i.h.bf16 %v5252_v46  ;;  %v5253_v58 = vunpack.i.l.bf16 %v5252_v46 }
 0x427   : > { %v5249_v25 = vunpack.i.h.bf16 %v5247_v18  ;;  %v5248_v17 = vunpack.i.l.bf16 %v5247_v18  ;;  %v9061_v8 = vpop.permute.xlu2 %5301 }
 0x429   : > { %v3618_v4 = vsel %vm1762_vm9, %v3586_v42, %v5248_v17  ;;  %v3619_v30 = vsel %vm1762_vm9, %v3587_v21, %v5249_v25  ;;  %v5273_v25 = vunpack.i.l.bf16 %v9001_v24 }
 0x42a   : > { %v3650_v57 = vsel %vm1795_vm10, %v3618_v4, %v5253_v58  ;;  %v3651_v29 = vsel %vm1795_vm10, %v3619_v30, %v5254_v20  ;;  %v5164_v20 = vunpack.i.h.bf16 %v8909_v50  ;;  %v5163_v58 = vunpack.i.l.bf16 %v8909_v50 }
 0x42b   : > { %v3682_v53 = vpack.c.bf16 %v3651_v29, %v3650_v57 }
 0x42c   : > { %5471 = vrot.lane.b32.xlu0 %v9995_v39, %s5681_s6  ;;  %v3557_v4 = vsel %vm1696_vm8, %v8793_v55, %v5164_v20  ;;  %v3556_v30 = vsel %vm1696_vm8, %v8797_v15, %v5163_v58  ;;  %v5208_v55 = vunpack.i.l.bf16 %v8979_v11  ;;  %v5289_v15 = vunpack.i.h.bf16 %v9033_v60 }
 0x42d   : > { %4148 = vmatmul.msk.bf16.vlgmr.msra.gmra.mxu1 %vm1864_vm11, %v3682_v53  ;;  %v5267_v45 = vpop.permute.xlu1 %5266  ;;  %v3589_v29 = vsel %vm1729_vm7, %v3557_v4, %v5274_v10  ;;  %v3588_v24 = vsel %vm1729_vm7, %v3556_v30, %v5273_v25 }
 0x42e   : > { %v5262_v22 = vpop.permute.xlu0 %5261  ;;  %v5269_v38 = vunpack.i.h.bf16 %v5267_v45  ;;  %v5268_v26 = vunpack.i.l.bf16 %v5267_v45  ;;  %v5288_v45 = vunpack.i.l.bf16 %v9033_v60 }
 0x42f   : > { %v5264_v27 = vunpack.i.h.bf16 %v5262_v22  ;;  %v5263_v5 = vunpack.i.l.bf16 %v5262_v22  ;;  %v9081_v42 = vpop.permute.xlu2 %5316 }
 0x431   : > { %v3636_v46 = vsel %vm1762_vm9, %v3604_v19, %v5263_v5  ;;  %v3637_v18 = vsel %vm1762_vm9, %v3605_v28, %v5264_v27  ;;  %v3574_v5 = vsel %vm1696_vm8, %v8867_v1, %v5208_v55  ;;  %v3575_v19 = vsel %vm1696_vm8, %v8871_v63, %v5209_v49 }
 0x432   : > { %v3668_v35 = vsel %vm1795_vm10, %v3636_v46, %v5268_v26  ;;  %v3669_v43 = vsel %vm1795_vm10, %v3637_v18, %v5269_v38  ;;  %v3606_v11 = vsel %vm1729_vm7, %v3574_v5, %v5288_v45  ;;  %v3607_v18 = vsel %vm1729_vm7, %v3575_v19, %v5289_v15 }
 0x433   : > { %v3691_v23 = vpack.c.bf16 %v3669_v43, %v3668_v35  ;;  %v5304_v1 = vunpack.i.h.bf16 %v9061_v8  ;;  %v5303_v63 = vunpack.i.l.bf16 %v9061_v8 }
 0x435   : > { %4157 = vmatmul.msk.bf16.gmra.mxu3 %vm1864_vm11, %v3691_v23  ;;  %v5282_v17 = vpop.permute.xlu1 %5281  ;;  %v3590_v4 = vsel %vm1729_vm7, %v8849_v33, %v5303_v63  ;;  %v3591_v30 = vsel %vm1729_vm7, %v8846_v51, %v5304_v1  ;;  %v5318_v33 = vunpack.i.l.bf16 %v9081_v42 }
 0x436   : > { %v5277_v21 = vpop.permute.xlu0 %5276  ;;  %v5284_v41 = vunpack.i.h.bf16 %v5282_v17  ;;  %v5283_v14 = vunpack.i.l.bf16 %v5282_v17 }
 0x437   : > { %v5279_v50 = vunpack.i.h.bf16 %v5277_v21  ;;  %v5278_v57 = vunpack.i.l.bf16 %v5277_v21  ;;  %v5332_v35 = vpop.permute.xlu2 %5331 }
 0x439   : > { %v3620_v53 = vsel %vm1762_vm9, %v3588_v24, %v5278_v57  ;;  %v3621_v13 = vsel %vm1762_vm9, %v3589_v29, %v5279_v50 }
 0x43a   : > { %v3652_v7 = vsel %vm1795_vm10, %v3620_v53, %v5283_v14  ;;  %v3653_v39 = vsel %vm1795_vm10, %v3621_v13, %v5284_v41  ;;  %v5214_v53 = vunpack.i.h.bf16 %v8913_v0  ;;  %v5213_v13 = vunpack.i.l.bf16 %v8913_v0 }
 0x43b   : > { %v3683_v34 = vpack.c.bf16 %v3653_v39, %v3652_v7  ;;  %v5319_v39 = vunpack.i.h.bf16 %v9081_v42 }
 0x43c   : > { %v3577_v15 = vsel %vm1696_vm8, %v8859_v54, %v5214_v53  ;;  %v3576_v45 = vsel %vm1696_vm8, %v8863_v36, %v5213_v13  ;;  %v5333_v54 = vunpack.i.l.bf16 %v5332_v35 }
 0x43d   : > { %4149 = vmatmul.msk.bf16.gmra.mxu1 %vm1864_vm11, %v3683_v34  ;;  %v5297_v22 = vpop.permute.xlu1 %5296  ;;  %v3608_v0 = vsel %vm1729_vm7, %v3576_v45, %v5318_v33 }
 0x43e   : > { %v5292_v38 = vpop.permute.xlu0 %5291  ;;  %v5299_v26 = vunpack.i.h.bf16 %v5297_v22  ;;  %v5298_v27 = vunpack.i.l.bf16 %v5297_v22 }
 0x43f   : > { %v5294_v28 = vunpack.i.h.bf16 %v5292_v38  ;;  %v5293_v46 = vunpack.i.l.bf16 %v5292_v38  ;;  %v5347_v29 = vpop.permute.xlu2 %5346 }
 0x441   : > { %v3638_v60 = vsel %vm1762_vm9, %v3606_v11, %v5293_v46  ;;  %v3639_v43 = vsel %vm1762_vm9, %v3607_v18, %v5294_v28  ;;  %v5334_v46 = vunpack.i.h.bf16 %v5332_v35 }
 0x442   : > { %v3670_v20 = vsel %vm1795_vm10, %v3638_v60, %v5298_v27  ;;  %v3671_v58 = vsel %vm1795_vm10, %v3639_v43, %v5299_v26  ;;  %v3609_v26 = vsel %vm1729_vm7, %v3577_v15, %v5319_v39 }
 0x443   : > { %v3692_v23 = vpack.c.bf16 %v3671_v58, %v3670_v20  ;;  %v3593_v1 = vsel %vm1729_vm7, %v8944_v48, %v5334_v46 }
 0x445   : > { %4158 = vmatmul.msk.bf16.gmra.mxu3 %vm1864_vm11, %v3692_v23  ;;  %v5312_v10 = vpop.permute.xlu1 %5311  ;;  %v3592_v23 = vsel %vm1729_vm7, %v8940_v16, %v5333_v54 }
 0x446   : > { %v5307_v25 = vpop.permute.xlu0 %5306  ;;  %v5314_v17 = vunpack.i.h.bf16 %v5312_v10  ;;  %v5313_v21 = vunpack.i.l.bf16 %v5312_v10 }
 0x447   : > { %v5309_v41 = vunpack.i.h.bf16 %v5307_v25  ;;  %v5308_v14 = vunpack.i.l.bf16 %v5307_v25  ;;  %v5362_v11 = vpop.permute.xlu2 %5361 }
 0x448   : > { %v5364_v33 = vunpack.i.h.bf16 %v5362_v11 }
 0x449   : > { %v3622_v50 = vsel %vm1762_vm9, %v3590_v4, %v5308_v14  ;;  %v3623_v57 = vsel %vm1762_vm9, %v3591_v30, %v5309_v41  ;;  %v5348_v41 = vunpack.i.l.bf16 %v5347_v29 }
 0x44a   : > { %v3654_v8 = vsel %vm1795_vm10, %v3622_v50, %v5313_v21  ;;  %v3655_v24 = vsel %vm1795_vm10, %v3623_v57, %v5314_v17  ;;  %v5349_v21 = vunpack.i.h.bf16 %v5347_v29 }
 0x44b   : > { %v3684_v7 = vpack.c.bf16 %v3655_v24, %v3654_v8  ;;  %v3610_v8 = vsel %vm1729_vm7, %v9005_v52, %v5348_v41 }
 0x44c   : > { %v3611_v24 = vsel %vm1729_vm7, %v9009_v40, %v5349_v21  ;;  %v3595_v40 = vsel %vm1729_vm7, %v8933_v61, %v5364_v33 }
 0x44d   : > { %4150 = vmatmul.msk.bf16.gmra.mxu1 %vm1864_vm11, %v3684_v7  ;;  %v5327_v51 = vpop.permute.xlu1 %5326 }
 0x44e   : > { %v5322_v49 = vpop.permute.xlu0 %5321  ;;  %v5329_v55 = vunpack.i.h.bf16 %v5327_v51  ;;  %v5328_v34 = vunpack.i.l.bf16 %v5327_v51  ;;  %v5363_v51 = vunpack.i.l.bf16 %v5362_v11 }
 0x44f   : > { %v5324_v22 = vunpack.i.h.bf16 %v5322_v49  ;;  %v5323_v38 = vunpack.i.l.bf16 %v5322_v49  ;;  %v5377_v4 = vpop.permute.xlu2 %5376 }
 0x451   : > { %v3640_v42 = vsel %vm1762_vm9, %v3608_v0, %v5323_v38  ;;  %v3641_v27 = vsel %vm1762_vm9, %v3609_v26, %v5324_v22  ;;  %v3594_v22 = vsel %vm1729_vm7, %v8929_v31, %v5363_v51 }
 0x452   : > { %v3672_v5 = vsel %vm1795_vm10, %v3640_v42, %v5328_v34  ;;  %v3673_v19 = vsel %vm1795_vm10, %v3641_v27, %v5329_v55 }
 0x453   : > { %v3693_v28 = vpack.c.bf16 %v3673_v19, %v3672_v5  ;;  %v5379_v19 = vunpack.i.h.bf16 %v5377_v4 }
 0x455   : > { %4159 = vmatmul.msk.bf16.gmra.mxu3 %vm1864_vm11, %v3693_v28  ;;  %v5342_v36 = vpop.permute.xlu1 %5341  ;;  %v5378_v28 = vunpack.i.l.bf16 %v5377_v4 }
 0x456   : > { %v5337_v18 = vpop.permute.xlu0 %5336  ;;  %v5344_v60 = vunpack.i.h.bf16 %v5342_v36  ;;  %v5343_v43 = vunpack.i.l.bf16 %v5342_v36 }
 0x457   : > { %v5339_v20 = vunpack.i.h.bf16 %v5337_v18  ;;  %v5338_v58 = vunpack.i.l.bf16 %v5337_v18  ;;  %v5392_v38 = vpop.permute.xlu2 %5391  ;;  %v3612_v18 = vsel %vm1729_vm7, %v8995_v62, %v5378_v28 }
 0x459   : > { %v3624_v63 = vsel %vm1762_vm9, %v3592_v23, %v5338_v58  ;;  %v3625_v10 = vsel %vm1762_vm9, %v3593_v1, %v5339_v20 }
 0x45a   : > { %v3656_v35 = vsel %vm1795_vm10, %v3624_v63, %v5343_v43  ;;  %v3657_v25 = vsel %vm1795_vm10, %v3625_v10, %v5344_v60  ;;  %v3613_v60 = vsel %vm1729_vm7, %v8999_v12, %v5379_v19  ;;  %v5394_v10 = vunpack.i.h.bf16 %v5392_v38 }
 0x45b   : > { %v3685_v17 = vpack.c.bf16 %v3657_v25, %v3656_v35  ;;  %v5393_v35 = vunpack.i.l.bf16 %v5392_v38 }
 0x45c   : > { %v3597_v4 = vsel %vm1729_vm7, %v8874_v47, %v5394_v10 }
 0x45d   : > { %4151 = vmatmul.msk.bf16.gmra.mxu1 %vm1864_vm11, %v3685_v17  ;;  %v5357_v14 = vpop.permute.xlu1 %5356 }
 0x45e   : > { %v5352_v30 = vpop.permute.xlu0 %5351  ;;  %v5359_v16 = vunpack.i.h.bf16 %v5357_v14  ;;  %v5358_v50 = vunpack.i.l.bf16 %v5357_v14  ;;  %v3596_v14 = vsel %vm1729_vm7, %v8877_v6, %v5393_v35 }
 0x45f   : > { %v5354_v57 = vunpack.i.h.bf16 %v5352_v30  ;;  %v5353_v48 = vunpack.i.l.bf16 %v5352_v30  ;;  %v5407_v58 = vpop.permute.xlu2 %5406 }
 0x461   : > { %v3642_v53 = vsel %vm1762_vm9, %v3610_v8, %v5353_v48  ;;  %v3643_v13 = vsel %vm1762_vm9, %v3611_v24, %v5354_v57  ;;  %v5409_v8 = vunpack.i.h.bf16 %v5407_v58  ;;  %v5408_v24 = vunpack.i.l.bf16 %v5407_v58 }
 0x462   : > { %v3674_v29 = vsel %vm1795_vm10, %v3642_v53, %v5358_v50  ;;  %v3675_v7 = vsel %vm1795_vm10, %v3643_v13, %v5359_v16 }
 0x463   : > { %v3694_v39 = vpack.c.bf16 %v3675_v7, %v3674_v29  ;;  %v3583_v33 = vsel %vm1696_vm8, %v8889_v37, %v5409_v8  ;;  %v3582_v51 = vsel %vm1696_vm8, %v8893_v3, %v5408_v24 }
 0x465   : > { %4160 = vmatmul.msk.bf16.gmra.mxu3 %vm1864_vm11, %v3694_v39  ;;  %v5372_v49 = vpop.permute.xlu1 %5371 }
 0x466   : > { %v5367_v55 = vpop.permute.xlu0 %5366  ;;  %v5374_v34 = vunpack.i.h.bf16 %v5372_v49  ;;  %v5373_v52 = vunpack.i.l.bf16 %v5372_v49 }
 0x467   : > { %v5369_v15 = vunpack.i.h.bf16 %v5367_v55  ;;  %v5368_v45 = vunpack.i.l.bf16 %v5367_v55  ;;  %v5422_v53 = vpop.permute.xlu2 %5421 }
 0x468   : > { %v5424_v49 = vunpack.i.h.bf16 %v5422_v53  ;;  %v5423_v55 = vunpack.i.l.bf16 %v5422_v53 }
 0x469   : > { %v3626_v0 = vsel %vm1762_vm9, %v3594_v22, %v5368_v45  ;;  %v3627_v26 = vsel %vm1762_vm9, %v3595_v40, %v5369_v15 }
 0x46a   : > { %v3658_v42 = vsel %vm1795_vm10, %v3626_v0, %v5373_v52  ;;  %v3659_v27 = vsel %vm1795_vm10, %v3627_v26, %v5374_v34 }
 0x46b   : > { %v3686_v5 = vpack.c.bf16 %v3659_v27, %v3658_v42 }
 0x46d   : > { %4152 = vmatmul.msk.bf16.gmra.mxu1 %vm1864_vm11, %v3686_v5  ;;  %v5387_v46 = vpop.permute.xlu1 %5386 }
 0x46e   : > { %v5382_v54 = vpop.permute.xlu0 %5381  ;;  %v5389_v61 = vunpack.i.h.bf16 %v5387_v46  ;;  %v5388_v11 = vunpack.i.l.bf16 %v5387_v46 }
 0x46f   : > { %v5384_v36 = vunpack.i.h.bf16 %v5382_v54  ;;  %v5383_v31 = vunpack.i.l.bf16 %v5382_v54  ;;  %v5437_v37 = vpop.permute.xlu2 %5436 }
 0x470   : > { %v5439_v19 = vunpack.i.h.bf16 %v5437_v37  ;;  %v5438_v28 = vunpack.i.l.bf16 %v5437_v37  ;;  %v9997_v37 = vld [vmem:[#allocation43_spill] sm:$0xff] }
 0x471   : > { %v3644_v43 = vsel %vm1762_vm9, %v3612_v18, %v5383_v31  ;;  %v3645_v20 = vsel %vm1762_vm9, %v3613_v60, %v5384_v36 }
 0x472   : > { %v3676_v23 = vsel %vm1795_vm10, %v3644_v43, %v5388_v11  ;;  %v3677_v1 = vsel %vm1795_vm10, %v3645_v20, %v5389_v61 }
 0x473   : > { %v3695_v63 = vpack.c.bf16 %v3677_v1, %v3676_v23 }
 0x475   : > { %4161 = vmatmul.msk.bf16.gmra.mxu3 %vm1864_vm11, %v3695_v63  ;;  %v5402_v25 = vpop.permute.xlu1 %5401 }
 0x476   : > { %v5397_v17 = vpop.permute.xlu0 %5396  ;;  %v5404_v62 = vunpack.i.h.bf16 %v5402_v25  ;;  %v5403_v21 = vunpack.i.l.bf16 %v5402_v25 }
 0x477   : > { %v5399_v41 = vunpack.i.h.bf16 %v5397_v17  ;;  %v5398_v12 = vunpack.i.l.bf16 %v5397_v17  ;;  %v5452_v23 = vpop.permute.xlu2 %5451 }
 0x478   : > { %v5454_v10 = vunpack.i.h.bf16 %v5452_v23  ;;  %v5453_v35 = vunpack.i.l.bf16 %v5452_v23 }
 0x479   : > { %v3628_v30 = vsel %vm1762_vm9, %v3596_v14, %v5398_v12  ;;  %v3629_v16 = vsel %vm1762_vm9, %v3597_v4, %v5399_v41 }
 0x47a   : > { %v3660_v50 = vsel %vm1795_vm10, %v3628_v30, %v5403_v21  ;;  %v3661_v57 = vsel %vm1795_vm10, %v3629_v16, %v5404_v62 }
 0x47b   : > { %v3687_v48 = vpack.c.bf16 %v3661_v57, %v3660_v50 }
 0x47d   : > { %4153 = vmatmul.msk.bf16.gmra.mxu1 %vm1864_vm11, %v3687_v48  ;;  %v5417_v13 = vpop.permute.xlu1 %5416 }
 0x47e   : > { %v5412_v29 = vpop.permute.xlu0 %5411  ;;  %v5419_v6 = vunpack.i.h.bf16 %v5417_v13  ;;  %v5418_v7 = vunpack.i.l.bf16 %v5417_v13 }
 0x47f   : > { %v5414_v39 = vunpack.i.h.bf16 %v5412_v29  ;;  %v5413_v47 = vunpack.i.l.bf16 %v5412_v29  ;;  %v5467_v57 = vpop.permute.xlu2 %5466 }
 0x480   : > { %v5469_v24 = vunpack.i.h.bf16 %v5467_v57  ;;  %v5468_v53 = vunpack.i.l.bf16 %v5467_v57 }
 0x481   : > { %v3614_v34 = vsel %vm1729_vm7, %v3582_v51, %v5413_v47  ;;  %v3615_v52 = vsel %vm1729_vm7, %v3583_v33, %v5414_v39 }
 0x482   : > { %v3646_v15 = vsel %vm1762_vm9, %v3614_v34, %v5418_v7  ;;  %v3647_v45 = vsel %vm1762_vm9, %v3615_v52, %v5419_v6 }
 0x483   : > { %v3678_v40 = vsel %vm1795_vm10, %v3646_v15, %v5423_v55  ;;  %v3679_v22 = vsel %vm1795_vm10, %v3647_v45, %v5424_v49 }
 0x484   : > { %v3696_v38 = vpack.c.bf16 %v3679_v22, %v3678_v40  ;;  %v9996_v22 = vld [vmem:[#allocation23_spill] sm:$0xff] }
 0x485   : > { %v5432_v0 = vpop.permute.xlu1 %5431 }
 0x486   : > { %v5434_v26 = vunpack.i.h.bf16 %v5432_v0  ;;  %v5433_v42 = vunpack.i.l.bf16 %v5432_v0  ;;  %v5427_v3 = vpop.permute.xlu0 %5426  ;;  %4162 = vmatmul.msk.bf16.gmra.mxu3 %vm1864_vm11, %v3696_v38 }
 0x487   : > { %v5429_v27 = vunpack.i.h.bf16 %v5427_v3  ;;  %v5428_v5 = vunpack.i.l.bf16 %v5427_v3 }
 0x489   : > { %v3598_v46 = vsel %vm1729_vm7, %v8967_v9, %v5428_v5  ;;  %v3599_v54 = vsel %vm1729_vm7, %v8971_v44, %v5429_v27 }
 0x48a   : > { %v3630_v61 = vsel %vm1762_vm9, %v3598_v46, %v5433_v42  ;;  %v3631_v11 = vsel %vm1762_vm9, %v3599_v54, %v5434_v26  ;;  %v9998_v54 = vld [vmem:[#allocation21_spill] sm:$0xff] }
 0x48b   : > { %v3662_v36 = vsel %vm1795_vm10, %v3630_v61, %v5438_v28  ;;  %v3663_v31 = vsel %vm1795_vm10, %v3631_v11, %v5439_v19 }
 0x48c   : > { %v3688_v18 = vpack.c.bf16 %v3663_v31, %v3662_v36  ;;  %v9999_v36 = vld [vmem:[#allocation22_spill] sm:$0xff] }
 0x48d   : > { %v5447_v60 = vpop.permute.xlu1 %5446 }
 0x48e   : > { %v5442_v43 = vpop.permute.xlu0 %5441  ;;  %4154 = vmatmul.msk.bf16.gmra.mxu1 %vm1864_vm11, %v3688_v18  ;;  %v5449_v9 = vunpack.i.h.bf16 %v5447_v60  ;;  %v5448_v1 = vunpack.i.l.bf16 %v5447_v60 }
 0x48f   : > { %v5444_v20 = vunpack.i.h.bf16 %v5442_v43  ;;  %v5443_v58 = vunpack.i.l.bf16 %v5442_v43 }
 0x491   : > { %v3584_v44 = vsel %vm1696_vm8, %v8827_v32, %v5443_v58  ;;  %v3585_v63 = vsel %vm1696_vm8, %v8824_v59, %v5444_v20 }
 0x492   : > { %v3616_v25 = vsel %vm1729_vm7, %v3584_v44, %v5448_v1  ;;  %v3617_v17 = vsel %vm1729_vm7, %v3585_v63, %v5449_v9  ;;  %v10000_v1 = vld [vmem:[#allocation56_spill] sm:$0xff] }
 0x493   : > { %v3648_v14 = vsel %vm1762_vm9, %v3616_v25, %v5453_v35  ;;  %v3649_v4 = vsel %vm1762_vm9, %v3617_v17, %v5454_v10  ;;  %v10001_v10 = vld [vmem:[#allocation10_spill] sm:$0xff] }
 0x495   : > { %v5462_v62 = vpop.permute.xlu1 %5461 }
 0x496   : > { %v5457_v21 = vpop.permute.xlu0 %5456  ;;  %v5464_v30 = vunpack.i.h.bf16 %v5462_v62  ;;  %v5463_v16 = vunpack.i.l.bf16 %v5462_v62 }
 0x497   : > { %v5459_v41 = vunpack.i.h.bf16 %v5457_v21  ;;  %v5458_v12 = vunpack.i.l.bf16 %v5457_v21 }
 0x498   : > { %v3600_v48 = vsel %vm1729_vm7, %v8959_v2, %v5463_v16  ;;  %v3601_v8 = vsel %vm1729_vm7, %v8963_v56, %v5464_v30  ;;  %v9223_v2 = vld [vmem:[%s9403_s3 + $0x6] ss:$0 sm:$0xff]  ;;  %v9228_v56 = vld [vmem:[%s9403_s3 + $0x7] ss:$0 sm:$0xff] }
 0x499   : > { %v3680_v32 = vsel %vm1795_vm10, %v3648_v14, %v5458_v12  ;;  %v3681_v59 = vsel %vm1795_vm10, %v3649_v4, %v5459_v41  ;;  %v3632_v7 = vsel %vm1762_vm9, %v3600_v48, %v5468_v53  ;;  %v3633_v39 = vsel %vm1762_vm9, %v3601_v8, %v5469_v24  ;;  %v10002_v4 = vld [vmem:[#allocation4_spill] sm:$0xff] }
 0x49a   : > { %v3697_v50 = vpack.c.bf16 %v3681_v59, %v3680_v32  ;;  %v10003_v32 = vld [vmem:[#allocation20_spill] sm:$0xff] }
 0x49c   : > { %4163 = vmatmul.msk.bf16.gmra.mxu3 %vm1864_vm11, %v3697_v50 }
 0x49e   : > { %v5472_v13 = vpop.permute.xlu0 %5471 }
 0x49f   : > { %v5474_v29 = vunpack.i.h.bf16 %v5472_v13  ;;  %v5473_v6 = vunpack.i.l.bf16 %v5472_v13 }
 0x4a1   : > { %v3664_v47 = vsel %vm1795_vm10, %v3632_v7, %v5473_v6  ;;  %v3665_v33 = vsel %vm1795_vm10, %v3633_v39, %v5474_v29  ;;  %v10004_v29 = vld [vmem:[#allocation19_spill] sm:$0xff] }
 0x4a2   : > { %v3689_v51 = vpack.c.bf16 %v3665_v33, %v3664_v47  ;;  %v10005_v39 = vld [vmem:[#allocation47_spill] sm:$0xff] }
 0x4a4   : > { %4155 = vmatmul.msk.bf16.gmra.mxu1 %vm1864_vm11, %v3689_v51 }
 0x4a8   : > { %v3818_v49 = vpop.f32.mrf.mxu3 }
 0x4a9   : > { %v3875_v55 = vmul.f32 %v9223_v2, %v3818_v49 }
 0x4aa   : > { %v3778_v34 = vpop.f32.mrf.mxu1 }
 0x4ab   : > { %vm3907_vm1 = vcmp.ge.f32.partialorder %v3875_v55, 0.0  ;;  %v3940_v52 = vmul.f32 %v9228_v56, %v3875_v55  ;;  %v3859_v15 = vmul.f32 %v9223_v2, %v3778_v34 }
 0x4ad   : > { %v3972_v45 = vsel %vm3907_vm1, %v3875_v55, %v3940_v52  ;;  %vm3891_vm2 = vcmp.ge.f32.partialorder %v3859_v15, 0.0  ;;  %v3924_v40 = vmul.f32 %v9228_v56, %v3859_v15 }
 0x4ae   : > { %v4004_v38 = vadd.f32 %v3972_v45, %v9996_v22  ;;  %v10006_v45 = vld [vmem:[#allocation33_spill] sm:$0xff] }
 0x4af   : > { %v3956_v0 = vsel %vm3891_vm2, %v3859_v15, %v3924_v40 }
 0x4b0   : > { %4036 = vst.msk [vmem:[%s9238_s23 + $0x80] sm:$0xff] %vm199_vm0, %v4004_v38  ;;  %v3988_v26 = vadd.f32 %v3956_v0, %v9997_v37  ;;  %v3820_v42 = vpop.f32.mrf.mxu3  ;;  %v10007_v38 = vld [vmem:[#allocation51_spill] sm:$0xff] }
 0x4b1   : > { %v3876_v3 = vmul.f32 %v9223_v2, %v3820_v42 }
 0x4b2   : > { %4020 = vst.msk [vmem:[%s9238_s23] sm:$0xff] %vm199_vm0, %v3988_v26  ;;  %v3780_v27 = vpop.f32.mrf.mxu1 }
 0x4b3   : > { %vm3908_vm3 = vcmp.ge.f32.partialorder %v3876_v3, 0.0  ;;  %v3941_v5 = vmul.f32 %v9228_v56, %v3876_v3  ;;  %v3860_v19 = vmul.f32 %v9223_v2, %v3780_v27 }
 0x4b5   : > { %v3973_v28 = vsel %vm3908_vm3, %v3876_v3, %v3941_v5  ;;  %vm3892_vm4 = vcmp.ge.f32.partialorder %v3860_v19, 0.0  ;;  %v3925_v46 = vmul.f32 %v9228_v56, %v3860_v19 }
 0x4b6   : > { %v4005_v61 = vadd.f32 %v3973_v28, %v9998_v54  ;;  %v10008_v28 = vld [vmem:[#allocation53_spill] sm:$0xff] }
 0x4b7   : > { %v3957_v11 = vsel %vm3892_vm4, %v3860_v19, %v3925_v46 }
 0x4b8   : > { %4037 = vst.msk [vmem:[%s9238_s23 + $0x88] sm:$0xff] %vm199_vm0, %v4005_v61  ;;  %v3989_v31 = vadd.f32 %v3957_v11, %v9999_v36  ;;  %v3823_v18 = vpop.f32.mrf.mxu3  ;;  %v10009_v61 = vld [vmem:[#allocation14_spill] sm:$0xff] }
 0x4b9   : > { %v3877_v60 = vmul.f32 %v9223_v2, %v3823_v18 }
 0x4ba   : > { %4021 = vst.msk [vmem:[%s9238_s23 + $0x8] sm:$0xff] %vm199_vm0, %v3989_v31  ;;  %v3783_v43 = vpop.f32.mrf.mxu1 }
 0x4bb   : > { %vm3909_vm5 = vcmp.ge.f32.partialorder %v3877_v60, 0.0  ;;  %v3942_v20 = vmul.f32 %v9228_v56, %v3877_v60  ;;  %v3861_v58 = vmul.f32 %v9223_v2, %v3783_v43 }
 0x4bd   : > { %v3974_v23 = vsel %vm3909_vm5, %v3877_v60, %v3942_v20  ;;  %vm3893_vm6 = vcmp.ge.f32.partialorder %v3861_v58, 0.0  ;;  %v3926_v9 = vmul.f32 %v9228_v56, %v3861_v58 }
 0x4be   : > { %v4006_v44 = vadd.f32 %v3974_v23, %v10000_v1  ;;  %v10010_v23 = vld [vmem:[#allocation9_spill] sm:$0xff] }
 0x4bf   : > { %v3958_v63 = vsel %vm3893_vm6, %v3861_v58, %v3926_v9 }
 0x4c0   : > { %4038 = vst.msk [vmem:[%s9238_s23 + $0x90] sm:$0xff] %vm199_vm0, %v4006_v44  ;;  %v3990_v35 = vadd.f32 %v3958_v63, %v10001_v10  ;;  %v3825_v25 = vpop.f32.mrf.mxu3  ;;  %v10011_v44 = vld [vmem:[#allocation34_spill] sm:$0xff] }
 0x4c1   : > { %v3878_v17 = vmul.f32 %v9223_v2, %v3825_v25 }
 0x4c2   : > { %4022 = vst.msk [vmem:[%s9238_s23 + $0x10] sm:$0xff] %vm199_vm0, %v3990_v35  ;;  %v3785_v62 = vpop.f32.mrf.mxu1 }
 0x4c3   : > { %vm3910_vm7 = vcmp.ge.f32.partialorder %v3878_v17, 0.0  ;;  %v3943_v21 = vmul.f32 %v9228_v56, %v3878_v17  ;;  %v3862_v41 = vmul.f32 %v9223_v2, %v3785_v62 }
 0x4c5   : > { %v3975_v12 = vsel %vm3910_vm7, %v3878_v17, %v3943_v21  ;;  %vm3894_vm8 = vcmp.ge.f32.partialorder %v3862_v41, 0.0  ;;  %v3927_v14 = vmul.f32 %v9228_v56, %v3862_v41 }
 0x4c6   : > { %v4007_v30 = vadd.f32 %v3975_v12, %v10002_v4  ;;  %v10012_v12 = vld [vmem:[#allocation31_spill] sm:$0xff] }
 0x4c7   : > { %v3959_v16 = vsel %vm3894_vm8, %v3862_v41, %v3927_v14 }
 0x4c8   : > { %4039 = vst.msk [vmem:[%s9238_s23 + $0x98] sm:$0xff] %vm199_vm0, %v4007_v30  ;;  %v3991_v59 = vadd.f32 %v3959_v16, %v10003_v32  ;;  %v3828_v50 = vpop.f32.mrf.mxu3  ;;  %v10013_v30 = vld [vmem:[#allocation25_spill] sm:$0xff] }
 0x4c9   : > { %v3879_v57 = vmul.f32 %v9223_v2, %v3828_v50 }
 0x4ca   : > { %4023 = vst.msk [vmem:[%s9238_s23 + $0x18] sm:$0xff] %vm199_vm0, %v3991_v59  ;;  %v3788_v48 = vpop.f32.mrf.mxu1 }
 0x4cb   : > { %vm3911_vm9 = vcmp.ge.f32.partialorder %v3879_v57, 0.0  ;;  %v3944_v8 = vmul.f32 %v9228_v56, %v3879_v57  ;;  %v3863_v24 = vmul.f32 %v9223_v2, %v3788_v48 }
 0x4cd   : > { %v3976_v53 = vsel %vm3911_vm9, %v3879_v57, %v3944_v8  ;;  %vm3895_vm10 = vcmp.ge.f32.partialorder %v3863_v24, 0.0  ;;  %v3928_v13 = vmul.f32 %v9228_v56, %v3863_v24 }
 0x4ce   : > { %v4008_v6 = vadd.f32 %v3976_v53, %v10004_v29  ;;  %v10014_v53 = vld [vmem:[#allocation52_spill] sm:$0xff] }
 0x4cf   : > { %v3960_v7 = vsel %vm3895_vm10, %v3863_v24, %v3928_v13 }
 0x4d0   : > { %4040 = vst.msk [vmem:[%s9238_s23 + $0xa0] sm:$0xff] %vm199_vm0, %v4008_v6  ;;  %v3992_v47 = vadd.f32 %v3960_v7, %v10005_v39  ;;  %v3830_v33 = vpop.f32.mrf.mxu3  ;;  %v10015_v6 = vld [vmem:[#allocation6_spill] sm:$0xff] }
 0x4d1   : > { %v3880_v51 = vmul.f32 %v9223_v2, %v3830_v33 }
 0x4d2   : > { %4024 = vst.msk [vmem:[%s9238_s23 + $0x20] sm:$0xff] %vm199_vm0, %v3992_v47  ;;  %v3790_v49 = vpop.f32.mrf.mxu1 }
 0x4d3   : > { %vm3912_vm11 = vcmp.ge.f32.partialorder %v3880_v51, 0.0  ;;  %v3945_v55 = vmul.f32 %v9228_v56, %v3880_v51  ;;  %v3864_v34 = vmul.f32 %v9223_v2, %v3790_v49 }
 0x4d5   : > { %v3977_v52 = vsel %vm3912_vm11, %v3880_v51, %v3945_v55  ;;  %vm3896_vm12 = vcmp.ge.f32.partialorder %v3864_v34, 0.0  ;;  %v3929_v15 = vmul.f32 %v9228_v56, %v3864_v34 }
 0x4d6   : > { %v4009_v40 = vadd.f32 %v3977_v52, %v10006_v45  ;;  %v10016_v52 = vld [vmem:[#allocation35_spill] sm:$0xff] }
 0x4d7   : > { %v3961_v22 = vsel %vm3896_vm12, %v3864_v34, %v3929_v15 }
 0x4d8   : > { %4041 = vst.msk [vmem:[%s9238_s23 + $0xa8] sm:$0xff] %vm199_vm0, %v4009_v40  ;;  %v3993_v0 = vadd.f32 %v3961_v22, %v10007_v38  ;;  %v3833_v37 = vpop.f32.mrf.mxu3  ;;  %v10017_v40 = vld [vmem:[#allocation13_spill] sm:$0xff] }
 0x4d9   : > { %v3881_v26 = vmul.f32 %v9223_v2, %v3833_v37 }
 0x4da   : > { %4025 = vst.msk [vmem:[%s9238_s23 + $0x28] sm:$0xff] %vm199_vm0, %v3993_v0  ;;  %v3793_v42 = vpop.f32.mrf.mxu1 }
 0x4db   : > { %vm3913_vm13 = vcmp.ge.f32.partialorder %v3881_v26, 0.0  ;;  %v3946_v3 = vmul.f32 %v9228_v56, %v3881_v26  ;;  %v3865_v27 = vmul.f32 %v9223_v2, %v3793_v42 }
 0x4dd   : > { %v3978_v5 = vsel %vm3913_vm13, %v3881_v26, %v3946_v3  ;;  %vm3897_vm14 = vcmp.ge.f32.partialorder %v3865_v27, 0.0  ;;  %v3930_v19 = vmul.f32 %v9228_v56, %v3865_v27 }
 0x4de   : > { %v4010_v46 = vadd.f32 %v3978_v5, %v10008_v28  ;;  %v10018_v5 = vld [vmem:[#allocation92_spill] sm:$0xff] }
 0x4df   : > { %v3962_v54 = vsel %vm3897_vm14, %v3865_v27, %v3930_v19 }
 0x4e0   : > { %4042 = vst.msk [vmem:[%s9238_s23 + $0xb0] sm:$0xff] %vm199_vm0, %v4010_v46  ;;  %v3994_v11 = vadd.f32 %v3962_v54, %v10009_v61  ;;  %v3835_v36 = vpop.f32.mrf.mxu3  ;;  %v10019_v46 = vld [vmem:[#allocation26_spill] sm:$0xff] }
 0x4e1   : > { %v3882_v31 = vmul.f32 %v9223_v2, %v3835_v36 }
 0x4e2   : > { %4026 = vst.msk [vmem:[%s9238_s23 + $0x30] sm:$0xff] %vm199_vm0, %v3994_v11  ;;  %v3795_v18 = vpop.f32.mrf.mxu1 }
 0x4e3   : > { %vm3914_vm15 = vcmp.ge.f32.partialorder %v3882_v31, 0.0  ;;  %v3947_v60 = vmul.f32 %v9228_v56, %v3882_v31  ;;  %v3866_v43 = vmul.f32 %v9223_v2, %v3795_v18 }
 0x4e5   : > { %v3979_v20 = vsel %vm3914_vm15, %v3882_v31, %v3947_v60  ;;  %vm3898_vm1 = vcmp.ge.f32.partialorder %v3866_v43, 0.0  ;;  %v3931_v58 = vmul.f32 %v9228_v56, %v3866_v43 }
 0x4e6   : > { %v4011_v9 = vadd.f32 %v3979_v20, %v10010_v23  ;;  %v10020_v20 = vld [vmem:[#allocation17_spill] sm:$0xff] }
 0x4e7   : > { %v3963_v1 = vsel %vm3898_vm1, %v3866_v43, %v3931_v58 }
 0x4e8   : > { %4043 = vst.msk [vmem:[%s9238_s23 + $0xb8] sm:$0xff] %vm199_vm0, %v4011_v9  ;;  %v3995_v63 = vadd.f32 %v3963_v1, %v10011_v44  ;;  %v3838_v10 = vpop.f32.mrf.mxu3  ;;  %v10021_v9 = vld [vmem:[#allocation12_spill] sm:$0xff] }
 0x4e9   : > { %v3883_v35 = vmul.f32 %v9223_v2, %v3838_v10 }
 0x4ea   : > { %4027 = vst.msk [vmem:[%s9238_s23 + $0x38] sm:$0xff] %vm199_vm0, %v3995_v63  ;;  %v3798_v25 = vpop.f32.mrf.mxu1 }
 0x4eb   : > { %vm3915_vm2 = vcmp.ge.f32.partialorder %v3883_v35, 0.0  ;;  %v3948_v17 = vmul.f32 %v9228_v56, %v3883_v35  ;;  %v3867_v62 = vmul.f32 %v9223_v2, %v3798_v25 }
 0x4ed   : > { %v3980_v21 = vsel %vm3915_vm2, %v3883_v35, %v3948_v17  ;;  %vm3899_vm3 = vcmp.ge.f32.partialorder %v3867_v62, 0.0  ;;  %v3932_v41 = vmul.f32 %v9228_v56, %v3867_v62 }
 0x4ee   : > { %v4012_v14 = vadd.f32 %v3980_v21, %v10012_v12  ;;  %v10022_v21 = vld [vmem:[#allocation62_spill] sm:$0xff] }
 0x4ef   : > { %v3964_v4 = vsel %vm3899_vm3, %v3867_v62, %v3932_v41 }
 0x4f0   : > { %4044 = vst.msk [vmem:[%s9238_s23 + $0xc0] sm:$0xff] %vm199_vm0, %v4012_v14  ;;  %v3996_v16 = vadd.f32 %v3964_v4, %v10013_v30  ;;  %v3840_v32 = vpop.f32.mrf.mxu3  ;;  %v10023_v14 = vld [vmem:[#allocation66_spill] sm:$0xff] }
 0x4f1   : > { %v3884_v59 = vmul.f32 %v9223_v2, %v3840_v32 }
 0x4f2   : > { %4028 = vst.msk [vmem:[%s9238_s23 + $0x40] sm:$0xff] %vm199_vm0, %v3996_v16  ;;  %v3800_v50 = vpop.f32.mrf.mxu1 }
 0x4f3   : > { %vm3916_vm4 = vcmp.ge.f32.partialorder %v3884_v59, 0.0  ;;  %v3949_v57 = vmul.f32 %v9228_v56, %v3884_v59  ;;  %v3868_v48 = vmul.f32 %v9223_v2, %v3800_v50 }
 0x4f5   : > { %v3981_v8 = vsel %vm3916_vm4, %v3884_v59, %v3949_v57  ;;  %vm3900_vm5 = vcmp.ge.f32.partialorder %v3868_v48, 0.0  ;;  %v3933_v24 = vmul.f32 %v9228_v56, %v3868_v48 }
 0x4f6   : > { %v4013_v13 = vadd.f32 %v3981_v8, %v10014_v53  ;;  %v10024_v8 = vld [vmem:[#allocation94_spill] sm:$0xff] }
 0x4f7   : > { %v3965_v29 = vsel %vm3900_vm5, %v3868_v48, %v3933_v24 }
 0x4f8   : > { %4045 = vst.msk [vmem:[%s9238_s23 + $0xc8] sm:$0xff] %vm199_vm0, %v4013_v13  ;;  %v3997_v7 = vadd.f32 %v3965_v29, %v10015_v6  ;;  %v3843_v39 = vpop.f32.mrf.mxu3  ;;  %v10025_v13 = vld [vmem:[#allocation48_spill] sm:$0xff] }
 0x4f9   : > { %v3885_v47 = vmul.f32 %v9223_v2, %v3843_v39 }
 0x4fa   : > { %4029 = vst.msk [vmem:[%s9238_s23 + $0x48] sm:$0xff] %vm199_vm0, %v3997_v7  ;;  %v3803_v33 = vpop.f32.mrf.mxu1 }
 0x4fb   : > { %vm3917_vm6 = vcmp.ge.f32.partialorder %v3885_v47, 0.0  ;;  %v3950_v51 = vmul.f32 %v9228_v56, %v3885_v47  ;;  %v3869_v49 = vmul.f32 %v9223_v2, %v3803_v33 }
 0x4fd   : > { %v3982_v55 = vsel %vm3917_vm6, %v3885_v47, %v3950_v51  ;;  %vm3901_vm7 = vcmp.ge.f32.partialorder %v3869_v49, 0.0  ;;  %v3934_v34 = vmul.f32 %v9228_v56, %v3869_v49 }
 0x4fe   : > { %v4014_v15 = vadd.f32 %v3982_v55, %v10016_v52  ;;  %v10026_v55 = vld [vmem:[#allocation88_spill] sm:$0xff] }
 0x4ff   : > { %v3966_v45 = vsel %vm3901_vm7, %v3869_v49, %v3934_v34 }
 0x500   : > { %4046 = vst.msk [vmem:[%s9238_s23 + $0xd0] sm:$0xff] %vm199_vm0, %v4014_v15  ;;  %v3998_v22 = vadd.f32 %v3966_v45, %v10017_v40  ;;  %v3845_v38 = vpop.f32.mrf.mxu3  ;;  %v10027_v15 = vld [vmem:[#allocation57_spill] sm:$0xff] }
 0x501   : > { %v3886_v0 = vmul.f32 %v9223_v2, %v3845_v38 }
 0x502   : > { %4030 = vst.msk [vmem:[%s9238_s23 + $0x50] sm:$0xff] %vm199_vm0, %v3998_v22  ;;  %v3805_v37 = vpop.f32.mrf.mxu1 }
 0x503   : > { %vm3918_vm8 = vcmp.ge.f32.partialorder %v3886_v0, 0.0  ;;  %v3951_v26 = vmul.f32 %v9228_v56, %v3886_v0  ;;  %v3870_v42 = vmul.f32 %v9223_v2, %v3805_v37 }
 0x505   : > { %v3983_v3 = vsel %vm3918_vm8, %v3886_v0, %v3951_v26  ;;  %vm3902_vm9 = vcmp.ge.f32.partialorder %v3870_v42, 0.0  ;;  %v3935_v27 = vmul.f32 %v9228_v56, %v3870_v42 }
 0x506   : > { %v4015_v19 = vadd.f32 %v3983_v3, %v10018_v5 }
 0x507   : > { %v3967_v28 = vsel %vm3902_vm9, %v3870_v42, %v3935_v27 }
 0x508   : > { %4047 = vst.msk [vmem:[%s9238_s23 + $0xd8] sm:$0xff] %vm199_vm0, %v4015_v19  ;;  %v3999_v54 = vadd.f32 %v3967_v28, %v10019_v46 }
 0x509   : > { %v3848_v61 = vpop.f32.mrf.mxu3 }
 0x50a   : > { %4031 = vst.msk [vmem:[%s9238_s23 + $0x58] sm:$0xff] %vm199_vm0, %v3999_v54  ;;  %v3887_v11 = vmul.f32 %v9223_v2, %v3848_v61 }
 0x50b   : > { %v3808_v36 = vpop.f32.mrf.mxu1 }
 0x50c   : > { %vm3919_vm10 = vcmp.ge.f32.partialorder %v3887_v11, 0.0  ;;  %v3952_v31 = vmul.f32 %v9228_v56, %v3887_v11  ;;  %v3871_v18 = vmul.f32 %v9223_v2, %v3808_v36 }
 0x50e   : > { %v3984_v60 = vsel %vm3919_vm10, %v3887_v11, %v3952_v31  ;;  %vm3903_vm11 = vcmp.ge.f32.partialorder %v3871_v18, 0.0  ;;  %v3936_v43 = vmul.f32 %v9228_v56, %v3871_v18 }
 0x50f   : > { %v4016_v58 = vadd.f32 %v3984_v60, %v10020_v20 }
 0x510   : > { %v3968_v23 = vsel %vm3903_vm11, %v3871_v18, %v3936_v43 }
 0x511   : > { %4048 = vst.msk [vmem:[%s9238_s23 + $0xe0] sm:$0xff] %vm199_vm0, %v4016_v58  ;;  %v4000_v1 = vadd.f32 %v3968_v23, %v10021_v9  ;;  %v3850_v44 = vpop.f32.mrf.mxu3 }
 0x512   : > { %v3888_v63 = vmul.f32 %v9223_v2, %v3850_v44 }
 0x513   : > { %4032 = vst.msk [vmem:[%s9238_s23 + $0x60] sm:$0xff] %vm199_vm0, %v4000_v1  ;;  %v3810_v10 = vpop.f32.mrf.mxu1 }
 0x514   : > { %vm3920_vm12 = vcmp.ge.f32.partialorder %v3888_v63, 0.0  ;;  %v3953_v35 = vmul.f32 %v9228_v56, %v3888_v63  ;;  %v3872_v25 = vmul.f32 %v9223_v2, %v3810_v10 }
 0x516   : > { %v3985_v17 = vsel %vm3920_vm12, %v3888_v63, %v3953_v35  ;;  %vm3904_vm13 = vcmp.ge.f32.partialorder %v3872_v25, 0.0  ;;  %v3937_v62 = vmul.f32 %v9228_v56, %v3872_v25 }
 0x517   : > { %v4017_v41 = vadd.f32 %v3985_v17, %v10022_v21 }
 0x518   : > { %v3969_v12 = vsel %vm3904_vm13, %v3872_v25, %v3937_v62 }
 0x519   : > { %4049 = vst.msk [vmem:[%s9238_s23 + $0xe8] sm:$0xff] %vm199_vm0, %v4017_v41  ;;  %v4001_v4 = vadd.f32 %v3969_v12, %v10023_v14 }
 0x51b   : > { %4033 = vst.msk [vmem:[%s9238_s23 + $0x68] sm:$0xff] %vm199_vm0, %v4001_v4 }
 0x51f   : > { %v3853_v30 = vpop.f32.mrf.mxu3 }
 0x520   : > { %v3889_v16 = vmul.f32 %v9223_v2, %v3853_v30 }
 0x521   : > { %v3813_v32 = vpop.f32.mrf.mxu1 }
 0x522   : > { %vm3921_vm14 = vcmp.ge.f32.partialorder %v3889_v16, 0.0  ;;  %v3954_v59 = vmul.f32 %v9228_v56, %v3889_v16  ;;  %v3873_v50 = vmul.f32 %v9223_v2, %v3813_v32 }
 0x524   : > { %v3986_v57 = vsel %vm3921_vm14, %v3889_v16, %v3954_v59  ;;  %vm3905_vm15 = vcmp.ge.f32.partialorder %v3873_v50, 0.0  ;;  %v3938_v48 = vmul.f32 %v9228_v56, %v3873_v50 }
 0x525   : > { %v4018_v24 = vadd.f32 %v3986_v57, %v10024_v8 }
 0x526   : > { %v3970_v53 = vsel %vm3905_vm15, %v3873_v50, %v3938_v48 }
 0x527   : > { %4050 = vst.msk [vmem:[%s9238_s23 + $0xf0] sm:$0xff] %vm199_vm0, %v4018_v24  ;;  %v4002_v29 = vadd.f32 %v3970_v53, %v10025_v13  ;;  %v3855_v6 = vpop.f32.mrf.mxu3 }
 0x528   : > { %v3890_v7 = vmul.f32 %v9223_v2, %v3855_v6 }
 0x529   : > { %4034 = vst.msk [vmem:[%s9238_s23 + $0x70] sm:$0xff] %vm199_vm0, %v4002_v29  ;;  %v3815_v39 = vpop.f32.mrf.mxu1 }
 0x52a   : > { %vm3922_vm1 = vcmp.ge.f32.partialorder %v3890_v7, 0.0  ;;  %v3955_v47 = vmul.f32 %v9228_v56, %v3890_v7  ;;  %v3874_v33 = vmul.f32 %v9223_v2, %v3815_v39 }
 0x52c   : > { %v3987_v51 = vsel %vm3922_vm1, %v3890_v7, %v3955_v47  ;;  %vm3906_vm2 = vcmp.ge.f32.partialorder %v3874_v33, 0.0  ;;  %v3939_v49 = vmul.f32 %v9228_v56, %v3874_v33 }
 0x52d   : > { %v4019_v34 = vadd.f32 %v3987_v51, %v10026_v55 }
 0x52e   : > { %v3971_v52 = vsel %vm3906_vm2, %v3874_v33, %v3939_v49 }
 0x52f   : > { %4051 = vst.msk [vmem:[%s9238_s23 + $0xf8] sm:$0xff] %vm199_vm0, %v4019_v34  ;;  %v4003_v45 = vadd.f32 %v3971_v52, %v10027_v15 }
 0x531   : > { %4035 = vst.msk [vmem:[%s9238_s23 + $0x78] sm:$0xff] %vm199_vm0, %v4003_v45 }
 0x532 PF: > { %s14_s15 = sadd.s32 1, %s5671_s15  }
 0x533   : > { %p11_p4 = scmp.ge.s32.totalorder %s14_s15, 4  }
 0x535   :  { %13 = sbr.rel (!%p11_p4) target bundleno = 1 (0x1), region = 67 }

</bundles_post_ra>
